<compile_context>
chip_gen: v6e
topology: v6e:2x2x1
jax: 0.10.0
libtpu: 0.0.40
codegen_flags: <defaults>
</compile_context>

<pallas_src>
import functools
from typing import NamedTuple

import jax
import jax.numpy as jnp
from jax import lax
from jax.experimental import pallas as pl
from jax.experimental.pallas import tpu as pltpu


class Meta(NamedTuple):
    HP: int       # per-gate lane slot (hidden padded to 128)
    n_link: int   # num_edges * pre_len
    n_dir: int    # direction * pre_len
    SL: int       # link-head lane slot (n_link rounded up to 128)


def _round_up(x, m):
    return (x + m - 1) // m * m


def _pad_gates(w, H, HP):
    """(rows, 4H) -> (rows, 4*HP): each gate gets its own 128-lane slot."""
    rows = w.shape[0]
    w4 = w.reshape(rows, 4, H).astype(jnp.float32)
    w4 = jnp.pad(w4, ((0, 0), (0, 0), (0, HP - H)))
    return w4.reshape(rows, 4 * HP)


def _pad_rows(w, rows):
    return jnp.pad(w, ((0, rows - w.shape[0]), (0, 0)))


def prepare_params(params):
    """One-time parameter fusion & padding (hoisted out of the per-call path)."""
    H = params["w_hh"].shape[0]
    HP = _round_up(H, 128)
    edge_dim = params["link_emb"].shape[1]

    w_ih = params["w_ih"].astype(jnp.float32)                 # (E, 4H)
    w_ih_link, w_ih_dir = w_ih[:edge_dim], w_ih[edge_dim:]

    b_g = _pad_gates(params["b"].astype(jnp.float32), H, HP)  # (1, 4*HP)

    # Fold the embedding tables into the input projection; bake the gate bias into
    # the link table (every one-hot row selects exactly one table row => +b once).
    tab_link = _pad_gates(params["link_emb"].astype(jnp.float32) @ w_ih_link, H, HP) + b_g
    tab_dir = _pad_gates(params["dir_emb"].astype(jnp.float32) @ w_ih_dir, H, HP)
    tab_link = _pad_rows(tab_link, _round_up(tab_link.shape[0], 128))
    tab_dir = _pad_rows(tab_dir, _round_up(tab_dir.shape[0], 128))

    w_hh = _pad_rows(_pad_gates(params["w_hh"].astype(jnp.float32), H, HP), HP)  # (HP, 4*HP)

    # Fused output heads, each head in its own lane slot (no in-kernel rotates).
    n_link = params["w_link"].shape[1]
    n_dir = params["w_dir"].shape[1]
    SL = _round_up(n_link, 128)
    SD = _round_up(n_dir, 128)
    w_heads = jnp.zeros((HP, SL + SD), jnp.float32)
    w_heads = w_heads.at[:H, :n_link].set(params["w_link"])
    w_heads = w_heads.at[:H, SL:SL + n_dir].set(params["w_dir"])
    b_heads = jnp.zeros((1, SL + SD), jnp.float32)
    b_heads = b_heads.at[:, :n_link].set(params["b_link"])
    b_heads = b_heads.at[:, SL:SL + n_dir].set(params["b_dir"])

    kp = dict(tab_link=tab_link, tab_dir=tab_dir, w_hh=w_hh,
              w_heads=w_heads, b_heads=b_heads)
    return kp, Meta(HP=HP, n_link=n_link, n_dir=n_dir, SL=SL)


def lstm_fused_kernel(ids_link_ref, ids_dir_ref, len_ref,
                      tab_link_ref, tab_dir_ref, w_hh_ref,
                      w_heads_ref, b_heads_ref,
                      pred_ref, pred_d_ref,
                      x_scratch,
                      *, T, B, HP, n_link, n_dir, SL):
    """Fused embedding + packed-LSTM recurrence + output heads, single program.

    ids_link_ref : (T*B, 1)   i32  time-major link token ids
    ids_dir_ref  : (T*B, 1)   i32  time-major direction token ids
    len_ref      : (B, 1)     i32  valid sequence lengths
    tab_link_ref : (VL, 4*HP) f32  link_emb @ W_ih_link + b, gate lane-padded
    tab_dir_ref  : (VD, 4*HP) f32  dir_emb  @ W_ih_dir,      gate lane-padded
    w_hh_ref     : (HP, 4*HP) f32  hidden->gates, gate lane-padded (gate order i,f,g,o)
    w_heads_ref  : (HP, SL+SD)f32  [link head | dir head], each in its own lane slot
    b_heads_ref  : (1, SL+SD) f32
    pred_ref     : (B, n_link) f32
    pred_d_ref   : (B, n_dir)  f32
    x_scratch    : (T*B, 4*HP) f32 VMEM scratch for the hoisted input projection
    """
    TB = T * B
    VL = tab_link_ref.shape[0]
    VD = tab_dir_ref.shape[0]

    # ---- Embedding lookup fused with the hoisted input projection ----------
    # onehot(ids) @ (emb_table @ W_ih): one fat MXU pass per table, no gathers,
    # hoisted out of the recurrence.
    oh_l = (ids_link_ref[...] ==
            lax.broadcasted_iota(jnp.int32, (TB, VL), 1)).astype(jnp.float32)
    oh_d = (ids_dir_ref[...] ==
            lax.broadcasted_iota(jnp.int32, (TB, VD), 1)).astype(jnp.float32)
    x_scratch[...] = (
        jnp.dot(oh_l, tab_link_ref[...], preferred_element_type=jnp.float32)
        + jnp.dot(oh_d, tab_dir_ref[...], preferred_element_type=jnp.float32))

    lengths = len_ref[...]                         # (B, 1) int32
    w_hh = w_hh_ref[...]                           # (HP, 4*HP), loop-invariant

    # ---- Recurrence: fully unrolled, state in registers, lane-padded gates ----
    h = jnp.zeros((B, HP), jnp.float32)
    c = jnp.zeros((B, HP), jnp.float32)
    for t in range(T):                             # T static -> static slices
        x_t = x_scratch[t * B:(t + 1) * B, :]      # sublane-aligned (B % 8 == 0)
        gates = x_t + jnp.dot(h, w_hh, preferred_element_type=jnp.float32)
        sig = jax.nn.sigmoid(gates)                # slots i, f, o used
        i_g = sig[:, 0 * HP:1 * HP]                # vreg-aligned selections:
        f_g = sig[:, 1 * HP:2 * HP]                # no XLU lane rotates
        g_g = jnp.tanh(gates[:, 2 * HP:3 * HP])
        o_g = sig[:, 3 * HP:4 * HP]
        c_new = f_g * c + i_g * g_g
        h_new = o_g * jnp.tanh(c_new)
        valid = t < lengths                        # packed-sequence freeze
        h = jnp.where(valid, h_new, h)
        c = jnp.where(valid, c_new, c)

    # ---- Fused output heads: one MXU pass, two direct (slot-aligned) stores ----
    out = (jnp.dot(h, w_heads_ref[...], preferred_element_type=jnp.float32)
           + b_heads_ref[...])
    pred_ref[...] = out[:, :n_link]
    pred_d_ref[...] = out[:, SL:SL + n_dir]


def _rnn_forward(inputs, directions, mask, kp, meta):
    B, T = inputs.shape
    assert B % 8 == 0, "batch must be a multiple of 8 (f32 sublane tile)"

    # Only per-call glue: tiny (B,T) int transposes to time-major id columns.
    ids_link = inputs.T.reshape(T * B, 1).astype(jnp.int32)
    ids_dir = directions.T.reshape(T * B, 1).astype(jnp.int32)
    lengths = mask.astype(jnp.int32).reshape(B, 1)

    vmem = pl.BlockSpec(memory_space=pltpu.MemorySpace.VMEM)
    kernel = functools.partial(
        lstm_fused_kernel, T=T, B=B, HP=meta.HP,
        n_link=meta.n_link, n_dir=meta.n_dir, SL=meta.SL)

    pred, pred_d = pl.pallas_call(
        kernel,
        out_shape=(jax.ShapeDtypeStruct((B, meta.n_link), jnp.float32),
                   jax.ShapeDtypeStruct((B, meta.n_dir), jnp.float32)),
        in_specs=[vmem] * 8,
        out_specs=(vmem, vmem),
        scratch_shapes=[pltpu.VMEM((T * B, 4 * meta.HP), jnp.float32)],
    )(ids_link, ids_dir, lengths,
      kp["tab_link"], kp["tab_dir"], kp["w_hh"], kp["w_heads"], kp["b_heads"])
    return pred, pred_d


rnn_forward = jax.jit(_rnn_forward, static_argnames=("meta",))


def _reference_forward(inputs, directions, mask, params):
    """Pure-JAX reference for validation (same math, lax.scan)."""
    link_embs = params["link_emb"][inputs]
    dir_embs = params["dir_emb"][directions]
    embs = jnp.concatenate([link_embs, dir_embs], axis=-1)           # (B, T, E)
    B, T, _ = embs.shape
    H = params["w_hh"].shape[0]

    def step(carry, xs):
        h, c = carry
        x_t, t = xs
        gates = x_t @ params["w_ih"] + h @ params["w_hh"] + params["b"][0]
        i_g = jax.nn.sigmoid(gates[:, 0 * H:1 * H])
        f_g = jax.nn.sigmoid(gates[:, 1 * H:2 * H])
        g_g = jnp.tanh(gates[:, 2 * H:3 * H])
        o_g = jax.nn.sigmoid(gates[:, 3 * H:4 * H])
        c_new = f_g * c + i_g * g_g
        h_new = o_g * jnp.tanh(c_new)
        valid = (t < mask.astype(jnp.int32))[:, None]
        return (jnp.where(valid, h_new, h), jnp.where(valid, c_new, c)), None

    (h_n, _), _ = lax.scan(
        step,
        (jnp.zeros((B, H), jnp.float32), jnp.zeros((B, H), jnp.float32)),
        (jnp.transpose(embs, (1, 0, 2)), jnp.arange(T)),
    )
    pred = h_n @ params["w_link"] + params["b_link"][0]
    pred_d = h_n @ params["w_dir"] + params["b_dir"][0]
    return pred, pred_d


if __name__ == "__main__":
    # Small, forward-consistent hyperparameters (mirroring args.*)
    batch_size = 8
    seq_len = 8          # max observed sequence length
    num_edges = 16
    direction = 4
    edge_dim = 16
    direction_dim = 16
    hidden_dim = 32
    pre_len = 4
    E = edge_dim + direction_dim

    key = jax.random.PRNGKey(0)
    ks = jax.random.split(key, 12)

    def init(k, shape, scale=0.1):
        return jax.random.normal(k, shape, jnp.float32) * scale

    link_emb = init(ks[0], (num_edges + 1, edge_dim)).at[0].set(0.0)   # padding_idx=0
    dir_emb = init(ks[1], (direction + 1, direction_dim)).at[0].set(0.0)

    params = {
        "link_emb": link_emb,
        "dir_emb": dir_emb,
        "w_ih": init(ks[2], (E, 4 * hidden_dim)),
        "w_hh": init(ks[3], (hidden_dim, 4 * hidden_dim)),
        "b": init(ks[4], (1, 4 * hidden_dim)),                 # b_ih + b_hh combined
        "w_link": init(ks[5], (hidden_dim, num_edges * pre_len)),
        "b_link": init(ks[6], (1, num_edges * pre_len)),
        "w_dir": init(ks[7], (hidden_dim, direction * pre_len)),
        "b_dir": init(ks[8], (1, direction * pre_len)),
    }

    # One-time parameter fusion / padding (hoisted out of the per-call path).
    kparams, meta = prepare_params(params)

    # Inputs: edge / direction token ids (0 is the padding id), variable lengths >= 1.
    inputs = jax.random.randint(ks[9], (batch_size, seq_len), 1, num_edges + 1,
                                dtype=jnp.int32)
    directions = jax.random.randint(ks[10], (batch_size, seq_len), 1, direction + 1,
                                    dtype=jnp.int32)
    mask = jax.random.randint(ks[11], (batch_size,), 1, seq_len + 1, dtype=jnp.int32)
    # zero out padded positions like a padded batch would have (padding_idx rows = 0)
    pos = jnp.arange(seq_len)[None, :]
    pad = pos >= mask[:, None]
    inputs = jnp.where(pad, 0, inputs)
    directions = jnp.where(pad, 0, directions)

    pred, pred_d = rnn_forward(inputs, directions, mask, kparams, meta=meta)
    jax.block_until_ready((pred, pred_d))

    ref_pred, ref_pred_d = _reference_forward(inputs, directions, mask, params)
    assert pred.shape == (batch_size, num_edges * pre_len)
    assert pred_d.shape == (batch_size, direction * pre_len)
    assert jnp.allclose(pred, ref_pred, atol=1e-4, rtol=1e-4)
    assert jnp.allclose(pred_d, ref_pred_d, atol=1e-4, rtol=1e-4)

    print("KERNEL_OK")
</pallas_src>

<mosaic_0001>
module attributes {stable_mosaic.version = 11 : i64} {
  func.func @lstm_fused_kernel(%arg0: memref<64x1xi32, #tpu.memory_space<vmem>>, %arg1: memref<64x1xi32, #tpu.memory_space<vmem>>, %arg2: memref<8x1xi32, #tpu.memory_space<vmem>>, %arg3: memref<128x512xf32, #tpu.memory_space<vmem>>, %arg4: memref<128x512xf32, #tpu.memory_space<vmem>>, %arg5: memref<128x512xf32, #tpu.memory_space<vmem>>, %arg6: memref<128x256xf32, #tpu.memory_space<vmem>>, %arg7: memref<1x256xf32, #tpu.memory_space<vmem>>, %arg8: memref<8x64xf32, #tpu.memory_space<vmem>>, %arg9: memref<8x16xf32, #tpu.memory_space<vmem>>, %arg10: memref<64x512xf32, #tpu.memory_space<vmem>>) attributes {dimension_semantics = [], scalar_prefetch = 0 : i64, scratch_operands = 1 : i64, tpu.core_type = #tpu.core_type<tc>} {
    %c0 = arith.constant 0 : index
    %c0_0 = arith.constant 0 : index
    %0 = vector.load %arg0[%c0, %c0_0] : memref<64x1xi32, #tpu.memory_space<vmem>>, vector<64x1xi32>
    %1 = tpu.iota {dimensions = array<i32: 1>} : vector<64x128xi32>
    %2 = vector.broadcast %0 : vector<64x1xi32> to vector<64x128xi32>
    %3 = arith.cmpi eq, %2, %1 : vector<64x128xi32>
    %4 = arith.extui %3 : vector<64x128xi1> to vector<64x128xi32>
    %5 = arith.sitofp %4 : vector<64x128xi32> to vector<64x128xf32>
    %c0_1 = arith.constant 0 : index
    %c0_2 = arith.constant 0 : index
    %6 = vector.load %arg1[%c0_1, %c0_2] : memref<64x1xi32, #tpu.memory_space<vmem>>, vector<64x1xi32>
    %7 = tpu.iota {dimensions = array<i32: 1>} : vector<64x128xi32>
    %8 = vector.broadcast %6 : vector<64x1xi32> to vector<64x128xi32>
    %9 = arith.cmpi eq, %8, %7 : vector<64x128xi32>
    %10 = arith.extui %9 : vector<64x128xi1> to vector<64x128xi32>
    %11 = arith.sitofp %10 : vector<64x128xi32> to vector<64x128xf32>
    %c0_3 = arith.constant 0 : index
    %c0_4 = arith.constant 0 : index
    %12 = vector.load %arg3[%c0_3, %c0_4] : memref<128x512xf32, #tpu.memory_space<vmem>>, vector<128x512xf32>
    %cst = arith.constant dense<0.000000e+00> : vector<64x512xf32>
    %13 = tpu.matmul %5, %12, %cst {dimension_numbers = #tpu.dot_dimension_numbers<[1], [0], [0], [1], [0, 0, 1, 1], [], []>} : vector<64x128xf32>, vector<128x512xf32>, vector<64x512xf32> -> vector<64x512xf32>
    %c0_5 = arith.constant 0 : index
    %c0_6 = arith.constant 0 : index
    %14 = vector.load %arg4[%c0_5, %c0_6] : memref<128x512xf32, #tpu.memory_space<vmem>>, vector<128x512xf32>
    %cst_7 = arith.constant dense<0.000000e+00> : vector<64x512xf32>
    %15 = tpu.matmul %11, %14, %cst_7 {dimension_numbers = #tpu.dot_dimension_numbers<[1], [0], [0], [1], [0, 0, 1, 1], [], []>} : vector<64x128xf32>, vector<128x512xf32>, vector<64x512xf32> -> vector<64x512xf32>
    %16 = arith.addf %13, %15 : vector<64x512xf32>
    %c0_8 = arith.constant 0 : index
    %c0_9 = arith.constant 0 : index
    %17 = vector.load %arg10[%c0_8, %c0_9] : memref<64x512xf32, #tpu.memory_space<vmem>>, vector<64x512xf32>
    tpu.vector_store %arg10[%c0_8, %c0_9], %16 {strides = array<i32>} : memref<64x512xf32, #tpu.memory_space<vmem>>, vector<64x512xf32>,
    %c0_10 = arith.constant 0 : index
    %c0_11 = arith.constant 0 : index
    %18 = vector.load %arg2[%c0_10, %c0_11] : memref<8x1xi32, #tpu.memory_space<vmem>>, vector<8x1xi32>
    %c0_12 = arith.constant 0 : index
    %c0_13 = arith.constant 0 : index
    %19 = vector.load %arg5[%c0_12, %c0_13] : memref<128x512xf32, #tpu.memory_space<vmem>>, vector<128x512xf32>
    %cst_14 = arith.constant 0.000000e+00 : f32
    %20 = vector.broadcast %cst_14 : f32 to vector<8x128xf32>
    %cst_15 = arith.constant 0.000000e+00 : f32
    %21 = vector.broadcast %cst_15 : f32 to vector<8x128xf32>
    %c0_16 = arith.constant 0 : index
    %c0_17 = arith.constant 0 : index
    %22 = vector.load %arg10[%c0_16, %c0_17] : memref<64x512xf32, #tpu.memory_space<vmem>>, vector<8x512xf32>
    %cst_18 = arith.constant dense<0.000000e+00> : vector<8x512xf32>
    %23 = tpu.matmul %20, %19, %cst_18 {dimension_numbers = #tpu.dot_dimension_numbers<[1], [0], [0], [1], [0, 0, 1, 1], [], []>} : vector<8x128xf32>, vector<128x512xf32>, vector<8x512xf32> -> vector<8x512xf32>
    %24 = arith.addf %22, %23 : vector<8x512xf32>
    %25 = arith.negf %24 : vector<8x512xf32>
    %26 = math.exp %25 : vector<8x512xf32>
    %cst_19 = arith.constant 1.000000e+00 : f32
    %27 = vector.broadcast %cst_19 : f32 to vector<8x512xf32>
    %28 = arith.addf %27, %26 : vector<8x512xf32>
    %29 = arith.divf %27, %28 : vector<8x512xf32>
    %30 = vector.extract_strided_slice %29 {offsets = [0, 0], sizes = [8, 128], strides = [1, 1]} : vector<8x512xf32> to vector<8x128xf32>
    %31 = vector.extract_strided_slice %29 {offsets = [0, 128], sizes = [8, 128], strides = [1, 1]} : vector<8x512xf32> to vector<8x128xf32>
    %32 = vector.extract_strided_slice %24 {offsets = [0, 256], sizes = [8, 128], strides = [1, 1]} : vector<8x512xf32> to vector<8x128xf32>
    %33 = math.tanh %32 : vector<8x128xf32>
    %34 = vector.extract_strided_slice %29 {offsets = [0, 384], sizes = [8, 128], strides = [1, 1]} : vector<8x512xf32> to vector<8x128xf32>
    %35 = arith.mulf %31, %21 : vector<8x128xf32>
    %36 = arith.mulf %30, %33 : vector<8x128xf32>
    %37 = arith.addf %35, %36 : vector<8x128xf32>
    %38 = math.tanh %37 : vector<8x128xf32>
    %39 = arith.mulf %34, %38 : vector<8x128xf32>
    %c0_i32 = arith.constant 0 : i32
    %40 = vector.broadcast %c0_i32 : i32 to vector<8x1xi32>
    %41 = arith.cmpi sgt, %18, %40 : vector<8x1xi32>
    %42 = vector.shape_cast %41 : vector<8x1xi1> to vector<8x1xi1>
    %43 = vector.broadcast %42 : vector<8x1xi1> to vector<8x128xi1>
    %44 = arith.select %43, %39, %20 : vector<8x128xi1>, vector<8x128xf32>
    %45 = vector.shape_cast %41 : vector<8x1xi1> to vector<8x1xi1>
    %46 = vector.broadcast %45 : vector<8x1xi1> to vector<8x128xi1>
    %47 = arith.select %46, %37, %21 : vector<8x128xi1>, vector<8x128xf32>
    %c8 = arith.constant 8 : index
    %c0_20 = arith.constant 0 : index
    %48 = vector.load %arg10[%c8, %c0_20] : memref<64x512xf32, #tpu.memory_space<vmem>>, vector<8x512xf32>
    %cst_21 = arith.constant dense<0.000000e+00> : vector<8x512xf32>
    %49 = tpu.matmul %44, %19, %cst_21 {dimension_numbers = #tpu.dot_dimension_numbers<[1], [0], [0], [1], [0, 0, 1, 1], [], []>} : vector<8x128xf32>, vector<128x512xf32>, vector<8x512xf32> -> vector<8x512xf32>
    %50 = arith.addf %48, %49 : vector<8x512xf32>
    %51 = arith.negf %50 : vector<8x512xf32>
    %52 = math.exp %51 : vector<8x512xf32>
    %cst_22 = arith.constant 1.000000e+00 : f32
    %53 = vector.broadcast %cst_22 : f32 to vector<8x512xf32>
    %54 = arith.addf %53, %52 : vector<8x512xf32>
    %55 = arith.divf %53, %54 : vector<8x512xf32>
    %56 = vector.extract_strided_slice %55 {offsets = [0, 0], sizes = [8, 128], strides = [1, 1]} : vector<8x512xf32> to vector<8x128xf32>
    %57 = vector.extract_strided_slice %55 {offsets = [0, 128], sizes = [8, 128], strides = [1, 1]} : vector<8x512xf32> to vector<8x128xf32>
    %58 = vector.extract_strided_slice %50 {offsets = [0, 256], sizes = [8, 128], strides = [1, 1]} : vector<8x512xf32> to vector<8x128xf32>
    %59 = math.tanh %58 : vector<8x128xf32>
    %60 = vector.extract_strided_slice %55 {offsets = [0, 384], sizes = [8, 128], strides = [1, 1]} : vector<8x512xf32> to vector<8x128xf32>
    %61 = arith.mulf %57, %47 : vector<8x128xf32>
    %62 = arith.mulf %56, %59 : vector<8x128xf32>
    %63 = arith.addf %61, %62 : vector<8x128xf32>
    %64 = math.tanh %63 : vector<8x128xf32>
    %65 = arith.mulf %60, %64 : vector<8x128xf32>
    %c1_i32 = arith.constant 1 : i32
    %66 = vector.broadcast %c1_i32 : i32 to vector<8x1xi32>
    %67 = arith.cmpi sgt, %18, %66 : vector<8x1xi32>
    %68 = vector.shape_cast %67 : vector<8x1xi1> to vector<8x1xi1>
    %69 = vector.broadcast %68 : vector<8x1xi1> to vector<8x128xi1>
    %70 = arith.select %69, %65, %44 : vector<8x128xi1>, vector<8x128xf32>
    %71 = vector.shape_cast %67 : vector<8x1xi1> to vector<8x1xi1>
    %72 = vector.broadcast %71 : vector<8x1xi1> to vector<8x128xi1>
    %73 = arith.select %72, %63, %47 : vector<8x128xi1>, vector<8x128xf32>
    %c16 = arith.constant 16 : index
    %c0_23 = arith.constant 0 : index
    %74 = vector.load %arg10[%c16, %c0_23] : memref<64x512xf32, #tpu.memory_space<vmem>>, vector<8x512xf32>
    %cst_24 = arith.constant dense<0.000000e+00> : vector<8x512xf32>
    %75 = tpu.matmul %70, %19, %cst_24 {dimension_numbers = #tpu.dot_dimension_numbers<[1], [0], [0], [1], [0, 0, 1, 1], [], []>} : vector<8x128xf32>, vector<128x512xf32>, vector<8x512xf32> -> vector<8x512xf32>
    %76 = arith.addf %74, %75 : vector<8x512xf32>
    %77 = arith.negf %76 : vector<8x512xf32>
    %78 = math.exp %77 : vector<8x512xf32>
    %cst_25 = arith.constant 1.000000e+00 : f32
    %79 = vector.broadcast %cst_25 : f32 to vector<8x512xf32>
    %80 = arith.addf %79, %78 : vector<8x512xf32>
    %81 = arith.divf %79, %80 : vector<8x512xf32>
    %82 = vector.extract_strided_slice %81 {offsets = [0, 0], sizes = [8, 128], strides = [1, 1]} : vector<8x512xf32> to vector<8x128xf32>
    %83 = vector.extract_strided_slice %81 {offsets = [0, 128], sizes = [8, 128], strides = [1, 1]} : vector<8x512xf32> to vector<8x128xf32>
    %84 = vector.extract_strided_slice %76 {offsets = [0, 256], sizes = [8, 128], strides = [1, 1]} : vector<8x512xf32> to vector<8x128xf32>
    %85 = math.tanh %84 : vector<8x128xf32>
    %86 = vector.extract_strided_slice %81 {offsets = [0, 384], sizes = [8, 128], strides = [1, 1]} : vector<8x512xf32> to vector<8x128xf32>
    %87 = arith.mulf %83, %73 : vector<8x128xf32>
    %88 = arith.mulf %82, %85 : vector<8x128xf32>
    %89 = arith.addf %87, %88 : vector<8x128xf32>
    %90 = math.tanh %89 : vector<8x128xf32>
    %91 = arith.mulf %86, %90 : vector<8x128xf32>
    %c2_i32 = arith.constant 2 : i32
    %92 = vector.broadcast %c2_i32 : i32 to vector<8x1xi32>
    %93 = arith.cmpi sgt, %18, %92 : vector<8x1xi32>
    %94 = vector.shape_cast %93 : vector<8x1xi1> to vector<8x1xi1>
    %95 = vector.broadcast %94 : vector<8x1xi1> to vector<8x128xi1>
    %96 = arith.select %95, %91, %70 : vector<8x128xi1>, vector<8x128xf32>
    %97 = vector.shape_cast %93 : vector<8x1xi1> to vector<8x1xi1>
    %98 = vector.broadcast %97 : vector<8x1xi1> to vector<8x128xi1>
    %99 = arith.select %98, %89, %73 : vector<8x128xi1>, vector<8x128xf32>
    %c24 = arith.constant 24 : index
    %c0_26 = arith.constant 0 : index
    %100 = vector.load %arg10[%c24, %c0_26] : memref<64x512xf32, #tpu.memory_space<vmem>>, vector<8x512xf32>
    %cst_27 = arith.constant dense<0.000000e+00> : vector<8x512xf32>
    %101 = tpu.matmul %96, %19, %cst_27 {dimension_numbers = #tpu.dot_dimension_numbers<[1], [0], [0], [1], [0, 0, 1, 1], [], []>} : vector<8x128xf32>, vector<128x512xf32>, vector<8x512xf32> -> vector<8x512xf32>
    %102 = arith.addf %100, %101 : vector<8x512xf32>
    %103 = arith.negf %102 : vector<8x512xf32>
    %104 = math.exp %103 : vector<8x512xf32>
    %cst_28 = arith.constant 1.000000e+00 : f32
    %105 = vector.broadcast %cst_28 : f32 to vector<8x512xf32>
    %106 = arith.addf %105, %104 : vector<8x512xf32>
    %107 = arith.divf %105, %106 : vector<8x512xf32>
    %108 = vector.extract_strided_slice %107 {offsets = [0, 0], sizes = [8, 128], strides = [1, 1]} : vector<8x512xf32> to vector<8x128xf32>
    %109 = vector.extract_strided_slice %107 {offsets = [0, 128], sizes = [8, 128], strides = [1, 1]} : vector<8x512xf32> to vector<8x128xf32>
    %110 = vector.extract_strided_slice %102 {offsets = [0, 256], sizes = [8, 128], strides = [1, 1]} : vector<8x512xf32> to vector<8x128xf32>
    %111 = math.tanh %110 : vector<8x128xf32>
    %112 = vector.extract_strided_slice %107 {offsets = [0, 384], sizes = [8, 128], strides = [1, 1]} : vector<8x512xf32> to vector<8x128xf32>
    %113 = arith.mulf %109, %99 : vector<8x128xf32>
    %114 = arith.mulf %108, %111 : vector<8x128xf32>
    %115 = arith.addf %113, %114 : vector<8x128xf32>
    %116 = math.tanh %115 : vector<8x128xf32>
    %117 = arith.mulf %112, %116 : vector<8x128xf32>
    %c3_i32 = arith.constant 3 : i32
    %118 = vector.broadcast %c3_i32 : i32 to vector<8x1xi32>
    %119 = arith.cmpi sgt, %18, %118 : vector<8x1xi32>
    %120 = vector.shape_cast %119 : vector<8x1xi1> to vector<8x1xi1>
    %121 = vector.broadcast %120 : vector<8x1xi1> to vector<8x128xi1>
    %122 = arith.select %121, %117, %96 : vector<8x128xi1>, vector<8x128xf32>
    %123 = vector.shape_cast %119 : vector<8x1xi1> to vector<8x1xi1>
    %124 = vector.broadcast %123 : vector<8x1xi1> to vector<8x128xi1>
    %125 = arith.select %124, %115, %99 : vector<8x128xi1>, vector<8x128xf32>
    %c32 = arith.constant 32 : index
    %c0_29 = arith.constant 0 : index
    %126 = vector.load %arg10[%c32, %c0_29] : memref<64x512xf32, #tpu.memory_space<vmem>>, vector<8x512xf32>
    %cst_30 = arith.constant dense<0.000000e+00> : vector<8x512xf32>
    %127 = tpu.matmul %122, %19, %cst_30 {dimension_numbers = #tpu.dot_dimension_numbers<[1], [0], [0], [1], [0, 0, 1, 1], [], []>} : vector<8x128xf32>, vector<128x512xf32>, vector<8x512xf32> -> vector<8x512xf32>
    %128 = arith.addf %126, %127 : vector<8x512xf32>
    %129 = arith.negf %128 : vector<8x512xf32>
    %130 = math.exp %129 : vector<8x512xf32>
    %cst_31 = arith.constant 1.000000e+00 : f32
    %131 = vector.broadcast %cst_31 : f32 to vector<8x512xf32>
    %132 = arith.addf %131, %130 : vector<8x512xf32>
    %133 = arith.divf %131, %132 : vector<8x512xf32>
    %134 = vector.extract_strided_slice %133 {offsets = [0, 0], sizes = [8, 128], strides = [1, 1]} : vector<8x512xf32> to vector<8x128xf32>
    %135 = vector.extract_strided_slice %133 {offsets = [0, 128], sizes = [8, 128], strides = [1, 1]} : vector<8x512xf32> to vector<8x128xf32>
    %136 = vector.extract_strided_slice %128 {offsets = [0, 256], sizes = [8, 128], strides = [1, 1]} : vector<8x512xf32> to vector<8x128xf32>
    %137 = math.tanh %136 : vector<8x128xf32>
    %138 = vector.extract_strided_slice %133 {offsets = [0, 384], sizes = [8, 128], strides = [1, 1]} : vector<8x512xf32> to vector<8x128xf32>
    %139 = arith.mulf %135, %125 : vector<8x128xf32>
    %140 = arith.mulf %134, %137 : vector<8x128xf32>
    %141 = arith.addf %139, %140 : vector<8x128xf32>
    %142 = math.tanh %141 : vector<8x128xf32>
    %143 = arith.mulf %138, %142 : vector<8x128xf32>
    %c4_i32 = arith.constant 4 : i32
    %144 = vector.broadcast %c4_i32 : i32 to vector<8x1xi32>
    %145 = arith.cmpi sgt, %18, %144 : vector<8x1xi32>
    %146 = vector.shape_cast %145 : vector<8x1xi1> to vector<8x1xi1>
    %147 = vector.broadcast %146 : vector<8x1xi1> to vector<8x128xi1>
    %148 = arith.select %147, %143, %122 : vector<8x128xi1>, vector<8x128xf32>
    %149 = vector.shape_cast %145 : vector<8x1xi1> to vector<8x1xi1>
    %150 = vector.broadcast %149 : vector<8x1xi1> to vector<8x128xi1>
    %151 = arith.select %150, %141, %125 : vector<8x128xi1>, vector<8x128xf32>
    %c40 = arith.constant 40 : index
    %c0_32 = arith.constant 0 : index
    %152 = vector.load %arg10[%c40, %c0_32] : memref<64x512xf32, #tpu.memory_space<vmem>>, vector<8x512xf32>
    %cst_33 = arith.constant dense<0.000000e+00> : vector<8x512xf32>
    %153 = tpu.matmul %148, %19, %cst_33 {dimension_numbers = #tpu.dot_dimension_numbers<[1], [0], [0], [1], [0, 0, 1, 1], [], []>} : vector<8x128xf32>, vector<128x512xf32>, vector<8x512xf32> -> vector<8x512xf32>
    %154 = arith.addf %152, %153 : vector<8x512xf32>
    %155 = arith.negf %154 : vector<8x512xf32>
    %156 = math.exp %155 : vector<8x512xf32>
    %cst_34 = arith.constant 1.000000e+00 : f32
    %157 = vector.broadcast %cst_34 : f32 to vector<8x512xf32>
    %158 = arith.addf %157, %156 : vector<8x512xf32>
    %159 = arith.divf %157, %158 : vector<8x512xf32>
    %160 = vector.extract_strided_slice %159 {offsets = [0, 0], sizes = [8, 128], strides = [1, 1]} : vector<8x512xf32> to vector<8x128xf32>
    %161 = vector.extract_strided_slice %159 {offsets = [0, 128], sizes = [8, 128], strides = [1, 1]} : vector<8x512xf32> to vector<8x128xf32>
    %162 = vector.extract_strided_slice %154 {offsets = [0, 256], sizes = [8, 128], strides = [1, 1]} : vector<8x512xf32> to vector<8x128xf32>
    %163 = math.tanh %162 : vector<8x128xf32>
    %164 = vector.extract_strided_slice %159 {offsets = [0, 384], sizes = [8, 128], strides = [1, 1]} : vector<8x512xf32> to vector<8x128xf32>
    %165 = arith.mulf %161, %151 : vector<8x128xf32>
    %166 = arith.mulf %160, %163 : vector<8x128xf32>
    %167 = arith.addf %165, %166 : vector<8x128xf32>
    %168 = math.tanh %167 : vector<8x128xf32>
    %169 = arith.mulf %164, %168 : vector<8x128xf32>
    %c5_i32 = arith.constant 5 : i32
    %170 = vector.broadcast %c5_i32 : i32 to vector<8x1xi32>
    %171 = arith.cmpi sgt, %18, %170 : vector<8x1xi32>
    %172 = vector.shape_cast %171 : vector<8x1xi1> to vector<8x1xi1>
    %173 = vector.broadcast %172 : vector<8x1xi1> to vector<8x128xi1>
    %174 = arith.select %173, %169, %148 : vector<8x128xi1>, vector<8x128xf32>
    %175 = vector.shape_cast %171 : vector<8x1xi1> to vector<8x1xi1>
    %176 = vector.broadcast %175 : vector<8x1xi1> to vector<8x128xi1>
    %177 = arith.select %176, %167, %151 : vector<8x128xi1>, vector<8x128xf32>
    %c48 = arith.constant 48 : index
    %c0_35 = arith.constant 0 : index
    %178 = vector.load %arg10[%c48, %c0_35] : memref<64x512xf32, #tpu.memory_space<vmem>>, vector<8x512xf32>
    %cst_36 = arith.constant dense<0.000000e+00> : vector<8x512xf32>
    %179 = tpu.matmul %174, %19, %cst_36 {dimension_numbers = #tpu.dot_dimension_numbers<[1], [0], [0], [1], [0, 0, 1, 1], [], []>} : vector<8x128xf32>, vector<128x512xf32>, vector<8x512xf32> -> vector<8x512xf32>
    %180 = arith.addf %178, %179 : vector<8x512xf32>
    %181 = arith.negf %180 : vector<8x512xf32>
    %182 = math.exp %181 : vector<8x512xf32>
    %cst_37 = arith.constant 1.000000e+00 : f32
    %183 = vector.broadcast %cst_37 : f32 to vector<8x512xf32>
    %184 = arith.addf %183, %182 : vector<8x512xf32>
    %185 = arith.divf %183, %184 : vector<8x512xf32>
    %186 = vector.extract_strided_slice %185 {offsets = [0, 0], sizes = [8, 128], strides = [1, 1]} : vector<8x512xf32> to vector<8x128xf32>
    %187 = vector.extract_strided_slice %185 {offsets = [0, 128], sizes = [8, 128], strides = [1, 1]} : vector<8x512xf32> to vector<8x128xf32>
    %188 = vector.extract_strided_slice %180 {offsets = [0, 256], sizes = [8, 128], strides = [1, 1]} : vector<8x512xf32> to vector<8x128xf32>
    %189 = math.tanh %188 : vector<8x128xf32>
    %190 = vector.extract_strided_slice %185 {offsets = [0, 384], sizes = [8, 128], strides = [1, 1]} : vector<8x512xf32> to vector<8x128xf32>
    %191 = arith.mulf %187, %177 : vector<8x128xf32>
    %192 = arith.mulf %186, %189 : vector<8x128xf32>
    %193 = arith.addf %191, %192 : vector<8x128xf32>
    %194 = math.tanh %193 : vector<8x128xf32>
    %195 = arith.mulf %190, %194 : vector<8x128xf32>
    %c6_i32 = arith.constant 6 : i32
    %196 = vector.broadcast %c6_i32 : i32 to vector<8x1xi32>
    %197 = arith.cmpi sgt, %18, %196 : vector<8x1xi32>
    %198 = vector.shape_cast %197 : vector<8x1xi1> to vector<8x1xi1>
    %199 = vector.broadcast %198 : vector<8x1xi1> to vector<8x128xi1>
    %200 = arith.select %199, %195, %174 : vector<8x128xi1>, vector<8x128xf32>
    %201 = vector.shape_cast %197 : vector<8x1xi1> to vector<8x1xi1>
    %202 = vector.broadcast %201 : vector<8x1xi1> to vector<8x128xi1>
    %203 = arith.select %202, %193, %177 : vector<8x128xi1>, vector<8x128xf32>
    %c56 = arith.constant 56 : index
    %c0_38 = arith.constant 0 : index
    %204 = vector.load %arg10[%c56, %c0_38] : memref<64x512xf32, #tpu.memory_space<vmem>>, vector<8x512xf32>
    %cst_39 = arith.constant dense<0.000000e+00> : vector<8x512xf32>
    %205 = tpu.matmul %200, %19, %cst_39 {dimension_numbers = #tpu.dot_dimension_numbers<[1], [0], [0], [1], [0, 0, 1, 1], [], []>} : vector<8x128xf32>, vector<128x512xf32>, vector<8x512xf32> -> vector<8x512xf32>
    %206 = arith.addf %204, %205 : vector<8x512xf32>
    %207 = arith.negf %206 : vector<8x512xf32>
    %208 = math.exp %207 : vector<8x512xf32>
    %cst_40 = arith.constant 1.000000e+00 : f32
    %209 = vector.broadcast %cst_40 : f32 to vector<8x512xf32>
    %210 = arith.addf %209, %208 : vector<8x512xf32>
    %211 = arith.divf %209, %210 : vector<8x512xf32>
    %212 = vector.extract_strided_slice %211 {offsets = [0, 0], sizes = [8, 128], strides = [1, 1]} : vector<8x512xf32> to vector<8x128xf32>
    %213 = vector.extract_strided_slice %211 {offsets = [0, 128], sizes = [8, 128], strides = [1, 1]} : vector<8x512xf32> to vector<8x128xf32>
    %214 = vector.extract_strided_slice %206 {offsets = [0, 256], sizes = [8, 128], strides = [1, 1]} : vector<8x512xf32> to vector<8x128xf32>
    %215 = math.tanh %214 : vector<8x128xf32>
    %216 = vector.extract_strided_slice %211 {offsets = [0, 384], sizes = [8, 128], strides = [1, 1]} : vector<8x512xf32> to vector<8x128xf32>
    %217 = arith.mulf %213, %203 : vector<8x128xf32>
    %218 = arith.mulf %212, %215 : vector<8x128xf32>
    %219 = arith.addf %217, %218 : vector<8x128xf32>
    %220 = math.tanh %219 : vector<8x128xf32>
    %221 = arith.mulf %216, %220 : vector<8x128xf32>
    %c7_i32 = arith.constant 7 : i32
    %222 = vector.broadcast %c7_i32 : i32 to vector<8x1xi32>
    %223 = arith.cmpi sgt, %18, %222 : vector<8x1xi32>
    %224 = vector.shape_cast %223 : vector<8x1xi1> to vector<8x1xi1>
    %225 = vector.broadcast %224 : vector<8x1xi1> to vector<8x128xi1>
    %226 = arith.select %225, %221, %200 : vector<8x128xi1>, vector<8x128xf32>
    %c0_41 = arith.constant 0 : index
    %c0_42 = arith.constant 0 : index
    %227 = vector.load %arg6[%c0_41, %c0_42] : memref<128x256xf32, #tpu.memory_space<vmem>>, vector<128x256xf32>
    %cst_43 = arith.constant dense<0.000000e+00> : vector<8x256xf32>
    %228 = tpu.matmul %226, %227, %cst_43 {dimension_numbers = #tpu.dot_dimension_numbers<[1], [0], [0], [1], [0, 0, 1, 1], [], []>} : vector<8x128xf32>, vector<128x256xf32>, vector<8x256xf32> -> vector<8x256xf32>
    %c0_44 = arith.constant 0 : index
    %c0_45 = arith.constant 0 : index
    %229 = vector.load %arg7[%c0_44, %c0_45] : memref<1x256xf32, #tpu.memory_space<vmem>>, vector<1x256xf32>
    %230 = vector.broadcast %229 : vector<1x256xf32> to vector<8x256xf32>
    %231 = arith.addf %228, %230 : vector<8x256xf32>
    %232 = vector.extract_strided_slice %231 {offsets = [0, 0], sizes = [8, 64], strides = [1, 1]} : vector<8x256xf32> to vector<8x64xf32>
    %c0_46 = arith.constant 0 : index
    %c0_47 = arith.constant 0 : index
    %233 = vector.load %arg8[%c0_46, %c0_47] : memref<8x64xf32, #tpu.memory_space<vmem>>, vector<8x64xf32>
    tpu.vector_store %arg8[%c0_46, %c0_47], %232 {strides = array<i32>} : memref<8x64xf32, #tpu.memory_space<vmem>>, vector<8x64xf32>,
    %234 = vector.extract_strided_slice %231 {offsets = [0, 128], sizes = [8, 16], strides = [1, 1]} : vector<8x256xf32> to vector<8x16xf32>
    %c0_48 = arith.constant 0 : index
    %c0_49 = arith.constant 0 : index
    %235 = vector.load %arg9[%c0_48, %c0_49] : memref<8x16xf32, #tpu.memory_space<vmem>>, vector<8x16xf32>
    tpu.vector_store %arg9[%c0_48, %c0_49], %234 {strides = array<i32>} : memref<8x16xf32, #tpu.memory_space<vmem>>, vector<8x16xf32>,
    return
  }
}

</mosaic_0001>

<bundles_post_ra>
// kernel: _rnn_forward.1
= control target key start
LH: loop header
LB: loop body
LE: loop exit
PB: predicated region body
PF: predicated region fallthrough
CT: control target
= control target key end

     0   :  { %15 = vsyncpa [#allocation4], 0  ;;  %s4083_s0 = inlined_call_operand.vmem [shape: s32[64,1], index: 0, kind: input, shape index: {}]   ;;  %s4084_s1 = inlined_call_operand.vmem [shape: s32[64,1], index: 1, kind: input, shape index: {}]   ;;  %s4085_s2 = inlined_call_operand.vmem [shape: s32[8,1], index: 2, kind: input, shape index: {}]   ;;  %s4086_s3 = inlined_call_operand.hbm [shape: f32[128,512], index: 3, kind: input, shape index: {}]   ;;  %s4087_s4 = inlined_call_operand.hbm [shape: f32[128,512], index: 4, kind: input, shape index: {}]   ;;  %s4088_s5 = inlined_call_operand.hbm [shape: f32[128,512], index: 5, kind: input, shape index: {}]   ;;  %s4089_s6 = inlined_call_operand.hbm [shape: f32[128,256], index: 6, kind: input, shape index: {}]   ;;  %s4090_s7 = inlined_call_operand.vmem [shape: f32[1,256], index: 7, kind: input, shape index: {}]   ;;  %s4091_s8 = inlined_call_operand.hbm [shape: f32[8,64], index: 8, kind: output, shape index: {0}]   ;;  %s4092_s9 = inlined_call_operand.hbm [shape: f32[8,16], index: 9, kind: output, shape index: {1}]  }
   0x1   :  { %16 = vsyncpa [#allocation7], 0 }
   0x2   :  { %17 = vsyncpa [#allocation10], 0 }
   0x3   :  { %18 = vsyncpa [#allocation5], 0 }
   0x4   :  { %19 = vsyncpa [#allocation13], 0  ;;  %s2895_s30 = smov [#allocation6]   ;;  %s2896_s11 = smov [#allocation3]  }
   0x5   :  { %s43_s10 = sshll.u32 %s2895_s30, 4  ;;  %s31_s12 = sshll.u32 %s2896_s11, 4  ;;  %s44_s10 = int_to_ptr.vmem [resolvable:$true] %s43_s10  ;;  %s32_s12 = int_to_ptr.vmem [resolvable:$true] %s31_s12 }
   0x6   :  { %s2773_s13 = scalar_lea.vmem %s44_s10, 8192  ;;  %p2778_p1 = scmp.lt.s32.totalorder %s44_s10, %s44_s10 }
   0x7   :  { %p2774_p0 = scmp.ne.s32.totalorder %s44_s10, %s2773_s13  ;;  %p2779_p2 = scmp.lt.s32.totalorder %s2773_s13, %s2773_s13 }
   0x9   :  { %p2780_p3 = por %p2779_p2, %p2778_p1 }
   0xb   :  { %p2781_p4 = pnand %p2780_p3, %p2774_p0 }
   0xd   :  { %2784 = shalt.err (!%p2781_p4)
}
   0xe   :  { %s2897_s14 = smov 512   ;;  %s2898_s15 = smov 32  }
   0xf   :  { %49 = dma.hbm_to_vmem [thread:$0]  %s4087_s4, 8192, %s44_s10, [#allocation7], %s2897_s14, %s2897_s14, %s2898_s15  }
  0x10   :  { %s2793_s18 = scalar_lea.vmem %s32_s12, 8192  ;;  %p2798_p6 = scmp.lt.s32.totalorder %s32_s12, %s32_s12 }
  0x11   :  { %p2794_p5 = scmp.ne.s32.totalorder %s32_s12, %s2793_s18  ;;  %p2799_p7 = scmp.lt.s32.totalorder %s2793_s18, %s2793_s18 }
  0x13   :  { %p2800_p8 = por %p2799_p7, %p2798_p6 }
  0x15   :  { %p2801_p9 = pnand %p2800_p8, %p2794_p5 }
  0x17   :  { %2804 = shalt.err (!%p2801_p9)
}
  0x18   :  { %37 = dma.hbm_to_vmem [thread:$0]  %s4086_s3, 8192, %s32_s12, [#allocation4], %s2897_s14, %s2897_s14, %s2898_s15  }
  0x19   :  { %s2899_s21 = smov [#allocation8]   ;;  %s2900_s23 = smov [#allocation9]  }
  0x1a   :  { %s55_s22 = sshll.u32 %s2899_s21, 4  ;;  %s67_s24 = sshll.u32 %s2900_s23, 4  ;;  %s56_s22 = int_to_ptr.vmem [resolvable:$true] %s55_s22  ;;  %s68_s24 = int_to_ptr.vmem [resolvable:$true] %s67_s24 }
  0x1b   :  { %s2813_s25 = scalar_lea.vmem %s56_s22, 8192  ;;  %p2818_p11 = scmp.lt.s32.totalorder %s56_s22, %s56_s22 }
  0x1c   :  { %p2814_p10 = scmp.ne.s32.totalorder %s56_s22, %s2813_s25  ;;  %p2819_p12 = scmp.lt.s32.totalorder %s2813_s25, %s2813_s25 }
  0x1e   :  { %p2820_p13 = por %p2819_p12, %p2818_p11 }
  0x20   :  { %p2821_p0 = pnand %p2820_p13, %p2814_p10 }
  0x22   :  { %2824 = shalt.err (!%p2821_p0)
}
  0x23   :  { %61 = dma.hbm_to_vmem [thread:$0]  %s4088_s5, 8192, %s56_s22, [#allocation7], %s2897_s14, %s2897_s14, %s2898_s15  }
  0x24   :  { %s2833_s27 = scalar_lea.vmem %s68_s24, 4096  ;;  %p2838_p2 = scmp.lt.s32.totalorder %s68_s24, %s68_s24 }
  0x25   :  { %p2834_p1 = scmp.ne.s32.totalorder %s68_s24, %s2833_s27  ;;  %p2839_p3 = scmp.lt.s32.totalorder %s2833_s27, %s2833_s27 }
  0x27   :  { %p2840_p4 = por %p2839_p3, %p2838_p2 }
  0x29   :  { %p2841_p5 = pnand %p2840_p4, %p2834_p1 }
  0x2b   :  { %2844 = shalt.err (!%p2841_p5)
}
  0x2c   :  { %s2901_s3 = smov 256   ;;  %s2902_s28 = smov 16  }
  0x2d   :  { %73 = dma.hbm_to_vmem [thread:$0]  %s4089_s6, 4096, %s68_s24, [#allocation10], %s2901_s3, %s2901_s3, %s2902_s28  }
  0x2e   :  { %2885 = dma.done.wait [#allocation4], 8192  }
  0x2f   :  { %2886 = vsyncadd [#allocation4], 4294959104 }
  0x30   :  { %2887 = dma.done.wait [#allocation7], 16384  }
  0x31   :  { %2888 = vsyncadd [#allocation7], 4294950912 }
  0x32   :  { %2889 = dma.done.wait [#allocation10], 4096  }
  0x33   :  { %2890 = vsyncadd [#allocation10], 4294963200  ;;  %v2903_v0 = vmov 0   ;;  %v4098_v1 = vmov 0.0   ;;  %v148_v2 = vld [vmem:[%s4084_s1 + $0x10] sm:$0xff]  ;;  %v146_v3 = vld [vmem:[%s4084_s1] sm:$0xff] }
  0x34   :  { %2572 = vset.pattern.permute.xlu1 %v2903_v0  ;;  %2571 = vset.pattern.permute.xlu0 %v2903_v0  ;;  %v149_v4 = vld [vmem:[%s4084_s1 + $0x18] sm:$0xff]  ;;  %v147_v5 = vld [vmem:[%s4084_s1 + $0x8] sm:$0xff]  ;;  %v150_v8 = vld [vmem:[%s4084_s1 + $0x20] sm:$0xff]  ;;  %s2906_s16 = smov [#allocation11]   ;;  %s2907_s18 = smov [#allocation12]  }
  0x35   :  { %394 = vmatprep.mubr.f32.mxu0 %v4098_v1  ;;  %507 = vmatprep.mubr.f32.mxu1 %v4098_v1  ;;  %v151_v6 = vld [vmem:[%s4084_s1 + $0x28] sm:$0xff]  ;;  %v326_v9 = vld [vmem:[#allocation6 + $0x1e0] sm:$0xff]  ;;  %v329_v10 = vld [vmem:[#allocation6 + $0x1f8] sm:$0xff]  ;;  %s2459_s17 = sshll.u32 %s2906_s16, 4  ;;  %s2469_s19 = sshll.u32 %s2907_s18, 4  ;;  %s2460_s17 = int_to_ptr.vmem [resolvable:$true] %s2459_s17  ;;  %s2470_s19 = int_to_ptr.vmem [resolvable:$true] %s2469_s19 }
  0x36   :  { %161 = vperm.xlu1 %2572, %v148_v2   ;;  %155 = vperm.xlu0 %2571, %v146_v3   ;;  %v327_v7 = vld [vmem:[#allocation6 + $0x1e8] sm:$0xff]  ;;  %v328_v12 = vld [vmem:[#allocation6 + $0x1f0] sm:$0xff]  ;;  %v322_v13 = vld [vmem:[#allocation6 + $0x1c0] sm:$0xff]  ;;  %s2845_s20 = scalar_lea.vmem %s2460_s17, 128  ;;  %p2850_p7 = scmp.lt.s32.totalorder %s2460_s17, %s2460_s17 }
  0x37   :  { %330 = vmatprep.subr.mxu0 %v327_v7  ;;  %443 = vmatprep.subr.mxu1 %v329_v10  ;;  %v323_v11 = vld [vmem:[#allocation6 + $0x1c8] sm:$0xff]  ;;  %v325_v14 = vld [vmem:[#allocation6 + $0x1d8] sm:$0xff]  ;;  %v324_v17 = vld [vmem:[#allocation6 + $0x1d0] sm:$0xff]  ;;  %p2846_p6 = scmp.ne.s32.totalorder %s2460_s17, %s2845_s20  ;;  %p2851_p8 = scmp.lt.s32.totalorder %s2845_s20, %s2845_s20 }
  0x38   :  { %331 = vmatpush1.msra.mxu0 %v326_v9  ;;  %444 = vmatpush1.msra.mxu1 %v328_v12  ;;  %v153_v15 = vld [vmem:[%s4084_s1 + $0x38] sm:$0xff]  ;;  %v319_v16 = vld [vmem:[#allocation6 + $0x1a8] sm:$0xff]  ;;  %v152_v18 = vld [vmem:[%s4084_s1 + $0x30] sm:$0xff] }
  0x39   :  { %332 = vmatprep.subr.mxu0 %v323_v11  ;;  %445 = vmatprep.subr.mxu1 %v325_v14  ;;  %v318_v19 = vld [vmem:[#allocation6 + $0x1a0] sm:$0xff]  ;;  %v321_v20 = vld [vmem:[#allocation6 + $0x1b8] sm:$0xff]  ;;  %v315_v21 = vld [vmem:[#allocation6 + $0x188] sm:$0xff]  ;;  %p2852_p9 = por %p2851_p8, %p2850_p7 }
  0x3a   :  { %164 = vperm.xlu1 %2572, %v149_v4   ;;  %158 = vperm.xlu0 %2571, %v147_v5   ;;  %v320_v22 = vld [vmem:[#allocation6 + $0x1b0] sm:$0xff]  ;;  %v314_v23 = vld [vmem:[#allocation6 + $0x180] sm:$0xff]  ;;  %v317_v24 = vld [vmem:[#allocation6 + $0x198] sm:$0xff] }
  0x3b   :  { %333 = vmatpush1.msra.mxu0 %v322_v13  ;;  %446 = vmatpush1.msra.mxu1 %v324_v17  ;;  %v311_v25 = vld [vmem:[#allocation6 + $0x168] sm:$0xff]  ;;  %v316_v26 = vld [vmem:[#allocation6 + $0x190] sm:$0xff]  ;;  %v88_v28 = vld [vmem:[%s4083_s0] sm:$0xff]  ;;  %p2853_p10 = pnand %p2852_p9, %p2846_p6 }
  0x3c   :  { %334 = vmatprep.subr.mxu0 %v319_v16  ;;  %447 = vmatprep.subr.mxu1 %v321_v20  ;;  %v89_v27 = vld [vmem:[%s4083_s0 + $0x8] sm:$0xff]  ;;  %v310_v29 = vld [vmem:[#allocation6 + $0x160] sm:$0xff]  ;;  %v313_v30 = vld [vmem:[#allocation6 + $0x178] sm:$0xff] }
  0x3d   :  { %335 = vmatpush1.msra.mxu0 %v318_v19  ;;  %448 = vmatpush1.msra.mxu1 %v320_v22  ;;  %v307_v31 = vld [vmem:[#allocation6 + $0x148] sm:$0xff]  ;;  %v312_v32 = vld [vmem:[#allocation6 + $0x170] sm:$0xff]  ;;  %v306_v33 = vld [vmem:[#allocation6 + $0x140] sm:$0xff] }
  0x3e   :  { %170 = vperm.xlu1 %2572, %v151_v6   ;;  %167 = vperm.xlu0 %2571, %v150_v8   ;;  %v309_v34 = vld [vmem:[#allocation6 + $0x158] sm:$0xff]  ;;  %v90_v36 = vld [vmem:[%s4083_s0 + $0x10] sm:$0xff]  ;;  %v303_v37 = vld [vmem:[#allocation6 + $0x128] sm:$0xff] }
  0x3f   :  { %336 = vmatprep.subr.mxu0 %v315_v21  ;;  %449 = vmatprep.subr.mxu1 %v317_v24  ;;  %v91_v35 = vld [vmem:[%s4083_s0 + $0x18] sm:$0xff]  ;;  %v308_v38 = vld [vmem:[#allocation6 + $0x150] sm:$0xff]  ;;  %v302_v39 = vld [vmem:[#allocation6 + $0x120] sm:$0xff] }
  0x40   :  { %337 = vmatpush1.msra.mxu0 %v314_v23  ;;  %450 = vmatpush1.msra.mxu1 %v316_v26  ;;  %v305_v40 = vld [vmem:[#allocation6 + $0x138] sm:$0xff]  ;;  %v299_v41 = vld [vmem:[#allocation6 + $0x108] sm:$0xff]  ;;  %v304_v42 = vld [vmem:[#allocation6 + $0x130] sm:$0xff] }
  0x41   :  { %338 = vmatprep.subr.mxu0 %v311_v25  ;;  %451 = vmatprep.subr.mxu1 %v313_v30  ;;  %v93_v43 = vld [vmem:[%s4083_s0 + $0x28] sm:$0xff]  ;;  %v92_v44 = vld [vmem:[%s4083_s0 + $0x20] sm:$0xff]  ;;  %v301_v46 = vld [vmem:[#allocation6 + $0x118] sm:$0xff] }
  0x42   :  { %176 = vperm.xlu1 %2572, %v153_v15   ;;  %173 = vperm.xlu0 %2571, %v152_v18   ;;  %v298_v45 = vld [vmem:[#allocation6 + $0x100] sm:$0xff]  ;;  %v295_v48 = vld [vmem:[#allocation6 + $0xe8] sm:$0xff]  ;;  %v300_v49 = vld [vmem:[#allocation6 + $0x110] sm:$0xff] }
  0x43   :  { %339 = vmatpush1.msra.mxu0 %v310_v29  ;;  %452 = vmatpush1.msra.mxu1 %v312_v32  ;;  %v3019_v47 = vld [vmem:[%s4085_s2] sm:$0xff]  ;;  %v297_v51 = vld [vmem:[#allocation6 + $0xf8] sm:$0xff]  ;;  %v94_v53 = vld [vmem:[%s4083_s0 + $0x30] sm:$0xff] }
  0x44   :  { %340 = vmatprep.subr.mxu0 %v307_v31  ;;  %453 = vmatprep.subr.mxu1 %v309_v34  ;;  %v294_v50 = vld [vmem:[#allocation6 + $0xe0] sm:$0xff]  ;;  %v95_v52 = vld [vmem:[%s4083_s0 + $0x38] sm:$0xff]  ;;  %vm1235_vm0 = vcmp.gt.s32.totalorder %v3019_v47, 1  ;;  %vm1053_vm1 = vcmp.gt.s32.totalorder %v3019_v47, 0  ;;  %v291_v54 = vld [vmem:[#allocation6 + $0xc8] sm:$0xff]  ;;  %vm1599_vm2 = vcmp.gt.s32.totalorder %v3019_v47, 3 }
  0x45   :  { %341 = vmatpush1.msra.mxu0 %v306_v33  ;;  %454 = vmatpush1.msra.mxu1 %v308_v38  ;;  %v296_v55 = vld [vmem:[#allocation6 + $0xf0] sm:$0xff]  ;;  %v290_v56 = vld [vmem:[#allocation6 + $0xc0] sm:$0xff]  ;;  %v293_v57 = vld [vmem:[#allocation6 + $0xd8] sm:$0xff]  ;;  %v1236_v60 = vsel %vm1235_vm0, 1, %v2903_v0  ;;  %v1054_v61 = vsel %vm1053_vm1, 1, %v2903_v0  ;;  %vm1417_vm3 = vcmp.gt.s32.totalorder %v3019_v47, 2 }
  0x46   :  { %102 = vperm.xlu1 %2572, %v89_v27   ;;  %99 = vperm.xlu0 %2571, %v88_v28   ;;  %v287_v58 = vld [vmem:[#allocation6 + $0xa8] sm:$0xff]  ;;  %v292_v59 = vld [vmem:[#allocation6 + $0xd0] sm:$0xff]  ;;  %v286_v62 = vld [vmem:[#allocation6 + $0xa0] sm:$0xff]  ;;  %v1600_v6 = vsel %vm1599_vm2, 1, %v2903_v0  ;;  %v1418_v7 = vsel %vm1417_vm3, 1, %v2903_v0  ;;  %vm1963_vm4 = vcmp.gt.s32.totalorder %v3019_v47, 5 }
  0x47   :  { %342 = vmatprep.subr.mxu0 %v303_v37  ;;  %455 = vmatprep.subr.mxu1 %v305_v40  ;;  %v289_v63 = vld [vmem:[#allocation6 + $0xb8] sm:$0xff]  ;;  %v283_v2 = vld [vmem:[#allocation6 + $0x88] sm:$0xff]  ;;  %v288_v3 = vld [vmem:[#allocation6 + $0xb0] sm:$0xff]  ;;  %vm1781_vm5 = vcmp.gt.s32.totalorder %v3019_v47, 4  ;;  %v1964_v14 = vsel %vm1963_vm4, 1, %v2903_v0  ;;  %vm2327_vm6 = vcmp.gt.s32.totalorder %v3019_v47, 7 }
  0x48   :  { %343 = vmatpush1.msra.mxu0 %v302_v39  ;;  %456 = vmatpush1.msra.mxu1 %v304_v42  ;;  %v282_v4 = vld [vmem:[#allocation6 + $0x80] sm:$0xff]  ;;  %v285_v5 = vld [vmem:[#allocation6 + $0x98] sm:$0xff]  ;;  %v279_v8 = vld [vmem:[#allocation6 + $0x68] sm:$0xff]  ;;  %v1782_v15 = vsel %vm1781_vm5, 1, %v2903_v0  ;;  %vm2145_vm7 = vcmp.gt.s32.totalorder %v3019_v47, 6  ;;  %v2328_v22 = vsel %vm2327_vm6, 1, %v2903_v0 }
  0x49   :  { %344 = vmatprep.subr.mxu0 %v299_v41  ;;  %457 = vmatprep.subr.mxu1 %v301_v46  ;;  %v284_v9 = vld [vmem:[#allocation6 + $0x90] sm:$0xff]  ;;  %v278_v10 = vld [vmem:[#allocation6 + $0x60] sm:$0xff]  ;;  %v281_v11 = vld [vmem:[#allocation6 + $0x78] sm:$0xff]  ;;  %v2146_v23 = vsel %vm2145_vm7, 1, %v2903_v0  ;;  %v4093_v0 = vlaneseq  ;;  %v2905_v37 = vmov 1.0  }
  0x4a   :  { %108 = vperm.xlu1 %2572, %v91_v35   ;;  %105 = vperm.xlu0 %2571, %v90_v36   ;;  %v275_v12 = vld [vmem:[#allocation6 + $0x48] sm:$0xff]  ;;  %v280_v13 = vld [vmem:[#allocation6 + $0x70] sm:$0xff]  ;;  %v274_v16 = vld [vmem:[#allocation6 + $0x40] sm:$0xff] }
  0x4b   :  { %345 = vmatpush1.msra.mxu0 %v298_v45  ;;  %458 = vmatpush1.msra.mxu1 %v300_v49  ;;  %v277_v17 = vld [vmem:[#allocation6 + $0x58] sm:$0xff]  ;;  %v271_v18 = vld [vmem:[#allocation6 + $0x28] sm:$0xff]  ;;  %v276_v19 = vld [vmem:[#allocation6 + $0x50] sm:$0xff]  ;;  %v3044_v31 = vand.u32 127, %v4093_v0 }
  0x4c   :  { %346 = vmatprep.subr.mxu0 %v295_v48  ;;  %459 = vmatprep.subr.mxu1 %v297_v51  ;;  %v270_v20 = vld [vmem:[#allocation6 + $0x20] sm:$0xff]  ;;  %v273_v21 = vld [vmem:[#allocation6 + $0x38] sm:$0xff]  ;;  %v267_v24 = vld [vmem:[#allocation6 + $0x8] sm:$0xff] }
  0x4d   :  { %347 = vmatpush1.msra.mxu0 %v294_v50  ;;  %460 = vmatpush1.msra.mxu1 %v296_v55  ;;  %v272_v25 = vld [vmem:[#allocation6 + $0x30] sm:$0xff]  ;;  %v266_v26 = vld [vmem:[#allocation6] sm:$0xff]  ;;  %v269_v27 = vld [vmem:[#allocation6 + $0x18] sm:$0xff] }
  0x4e   :  { %114 = vperm.xlu1 %2572, %v93_v43   ;;  %111 = vperm.xlu0 %2571, %v92_v44   ;;  %v268_v28 = vld [vmem:[#allocation6 + $0x10] sm:$0xff]  ;;  %v263_v29 = vld [vmem:[#allocation3 + $0x1e8] sm:$0xff]  ;;  %v265_v30 = vld [vmem:[#allocation3 + $0x1f8] sm:$0xff] }
  0x4f   :  { %348 = vmatprep.subr.mxu0 %v291_v54  ;;  %461 = vmatprep.subr.mxu1 %v293_v57  ;;  %v262_v33 = vld [vmem:[#allocation3 + $0x1e0] sm:$0xff]  ;;  %v264_v34 = vld [vmem:[#allocation3 + $0x1f0] sm:$0xff]  ;;  %v259_v35 = vld [vmem:[#allocation3 + $0x1c8] sm:$0xff] }
  0x50   :  { %349 = vmatpush1.msra.mxu0 %v290_v56  ;;  %462 = vmatpush1.msra.mxu1 %v292_v59  ;;  %v261_v36 = vld [vmem:[#allocation3 + $0x1d8] sm:$0xff]  ;;  %v258_v38 = vld [vmem:[#allocation3 + $0x1c0] sm:$0xff]  ;;  %v255_v39 = vld [vmem:[#allocation3 + $0x1a8] sm:$0xff] }
  0x51   :  { %350 = vmatprep.subr.mxu0 %v287_v58  ;;  %463 = vmatprep.subr.mxu1 %v289_v63  ;;  %v260_v41 = vld [vmem:[#allocation3 + $0x1d0] sm:$0xff]  ;;  %v254_v42 = vld [vmem:[#allocation3 + $0x1a0] sm:$0xff]  ;;  %v257_v43 = vld [vmem:[#allocation3 + $0x1b8] sm:$0xff] }
  0x52   :  { %120 = vperm.xlu1 %2572, %v95_v52   ;;  %117 = vperm.xlu0 %2571, %v94_v53   ;;  %v251_v44 = vld [vmem:[#allocation3 + $0x188] sm:$0xff]  ;;  %v256_v45 = vld [vmem:[#allocation3 + $0x1b0] sm:$0xff]  ;;  %v250_v46 = vld [vmem:[#allocation3 + $0x180] sm:$0xff] }
  0x53   :  { %351 = vmatpush1.msra.mxu0 %v286_v62  ;;  %464 = vmatpush1.msra.mxu1 %v288_v3  ;;  %v253_v47 = vld [vmem:[#allocation3 + $0x198] sm:$0xff]  ;;  %v247_v49 = vld [vmem:[#allocation3 + $0x168] sm:$0xff]  ;;  %v252_v50 = vld [vmem:[#allocation3 + $0x190] sm:$0xff] }
  0x54   :  { %352 = vmatprep.subr.mxu0 %v283_v2  ;;  %465 = vmatprep.subr.mxu1 %v285_v5  ;;  %v246_v51 = vld [vmem:[#allocation3 + $0x160] sm:$0xff]  ;;  %v249_v52 = vld [vmem:[#allocation3 + $0x178] sm:$0xff]  ;;  %v243_v53 = vld [vmem:[#allocation3 + $0x148] sm:$0xff] }
  0x55   :  { %353 = vmatpush1.msra.mxu0 %v282_v4  ;;  %466 = vmatpush1.msra.mxu1 %v284_v9  ;;  %v248_v54 = vld [vmem:[#allocation3 + $0x170] sm:$0xff]  ;;  %v242_v55 = vld [vmem:[#allocation3 + $0x140] sm:$0xff]  ;;  %v245_v56 = vld [vmem:[#allocation3 + $0x158] sm:$0xff] }
  0x56   :  { %1238 = vperm.xlu1 %2572, %v1236_v60   ;;  %1056 = vperm.xlu0 %2571, %v1054_v61   ;;  %v239_v57 = vld [vmem:[#allocation3 + $0x128] sm:$0xff]  ;;  %v244_v58 = vld [vmem:[#allocation3 + $0x150] sm:$0xff]  ;;  %v238_v60 = vld [vmem:[#allocation3 + $0x120] sm:$0xff] }
  0x57   :  { %354 = vmatprep.subr.mxu0 %v279_v8  ;;  %467 = vmatprep.subr.mxu1 %v281_v11  ;;  %v241_v61 = vld [vmem:[#allocation3 + $0x138] sm:$0xff]  ;;  %v235_v62 = vld [vmem:[#allocation3 + $0x108] sm:$0xff]  ;;  %v240_v63 = vld [vmem:[#allocation3 + $0x130] sm:$0xff] }
  0x58   :  { %355 = vmatpush1.msra.mxu0 %v278_v10  ;;  %468 = vmatpush1.msra.mxu1 %v280_v13  ;;  %v234_v2 = vld [vmem:[#allocation3 + $0x100] sm:$0xff]  ;;  %v237_v3 = vld [vmem:[#allocation3 + $0x118] sm:$0xff]  ;;  %v231_v5 = vld [vmem:[#allocation3 + $0xe8] sm:$0xff] }
  0x59   :  { %356 = vmatprep.subr.mxu0 %v275_v12  ;;  %469 = vmatprep.subr.mxu1 %v277_v17  ;;  %v233_v8 = vld [vmem:[#allocation3 + $0xf8] sm:$0xff]  ;;  %v227_v9 = vld [vmem:[#allocation3 + $0xc8] sm:$0xff]  ;;  %v232_v10 = vld [vmem:[#allocation3 + $0xf0] sm:$0xff] }
  0x5a   :  { %1602 = vperm.xlu1 %2572, %v1600_v6   ;;  %1420 = vperm.xlu0 %2571, %v1418_v7   ;;  %v236_v6 = vld [vmem:[#allocation3 + $0x110] sm:$0xff]  ;;  %v230_v7 = vld [vmem:[#allocation3 + $0xe0] sm:$0xff]  ;;  %v229_v12 = vld [vmem:[#allocation3 + $0xd8] sm:$0xff] }
  0x5b   :  { %357 = vmatpush1.msra.mxu0 %v274_v16  ;;  %470 = vmatpush1.msra.mxu1 %v276_v19  ;;  %v226_v11 = vld [vmem:[#allocation3 + $0xc0] sm:$0xff]  ;;  %v225_v17 = vld [vmem:[#allocation3 + $0xb8] sm:$0xff]  ;;  %v224_v19 = vld [vmem:[#allocation3 + $0xb0] sm:$0xff] }
  0x5c   :  { %358 = vmatprep.subr.mxu0 %v271_v18  ;;  %471 = vmatprep.subr.mxu1 %v273_v21  ;;  %v222_v16 = vld [vmem:[#allocation3 + $0xa0] sm:$0xff]  ;;  %v219_v18 = vld [vmem:[#allocation3 + $0x88] sm:$0xff]  ;;  %v221_v21 = vld [vmem:[#allocation3 + $0x98] sm:$0xff] }
  0x5d   :  { %359 = vmatpush1.msra.mxu0 %v270_v20  ;;  %472 = vmatpush1.msra.mxu1 %v272_v25  ;;  %v218_v20 = vld [vmem:[#allocation3 + $0x80] sm:$0xff]  ;;  %v3296_v0 = vld [vmem:[#allocation8 + $0x8] sm:$0xff] }
  0x5e   :  { %1966 = vperm.xlu1 %2572, %v1964_v14   ;;  %1784 = vperm.xlu0 %2571, %v1782_v15   ;;  %v223_v14 = vld [vmem:[#allocation3 + $0xa8] sm:$0xff]  ;;  %v228_v15 = vld [vmem:[#allocation3 + $0xd0] sm:$0xff]  ;;  %v214_v25 = vld [vmem:[#allocation3 + $0x60] sm:$0xff]  ;;  %4289 = vst [vmem:[#allocation64_spill] sm:$0xff] %v3296_v0 }
  0x5f   :  { %360 = vmatprep.subr.mxu0 %v267_v24  ;;  %473 = vmatprep.subr.mxu1 %v269_v27  ;;  %v220_v24 = vld [vmem:[#allocation3 + $0x90] sm:$0xff]  ;;  %v211_v27 = vld [vmem:[#allocation3 + $0x48] sm:$0xff] }
  0x60   :  { %361 = vmatpush1.msra.mxu0 %v266_v26  ;;  %474 = vmatpush1.msra.mxu1 %v268_v28  ;;  %v217_v26 = vld [vmem:[#allocation3 + $0x78] sm:$0xff]  ;;  %v216_v28 = vld [vmem:[#allocation3 + $0x70] sm:$0xff] }
  0x61   :  { %556 = vmatprep.subr.mxu0 %v263_v29  ;;  %669 = vmatprep.subr.mxu1 %v265_v30  ;;  %v210_v29 = vld [vmem:[#allocation3 + $0x40] sm:$0xff]  ;;  %v213_v30 = vld [vmem:[#allocation3 + $0x58] sm:$0xff] }
  0x62   :  { %2330 = vperm.xlu1 %2572, %v2328_v22   ;;  %2148 = vperm.xlu0 %2571, %v2146_v23   ;;  %v215_v23 = vld [vmem:[#allocation3 + $0x68] sm:$0xff] }
  0xb1   :  { %v156_v32 = vpop.permute.xlu0 %155  ;;  %v162_v48 = vpop.permute.xlu1 %161 }
  0xb2   :  { %vm178_vm8 = vcmp.eq.s32.totalorder %v156_v32, %v3044_v31  ;;  %vm180_vm10 = vcmp.eq.s32.totalorder %v162_v48, %v3044_v31  ;;  %v3097_v48 = vld [vmem:[#allocation8 + $0x1f0] sm:$0xff] }
  0xb3   :  { %2500 = vmatmul.mubr.msk.f32.vlgmr.msra.gmra.mxu0 %vm178_vm8, %v2905_v37  ;;  %2508 = vmatmul.mubr.msk.f32.vlgmr.msra.gmra.mxu1 %vm178_vm8, %v2905_v37 }
  0xb4   :  { %557 = vmatpush1.msra.mxu0 %v262_v33  ;;  %670 = vmatpush1.msra.mxu1 %v264_v34  ;;  %v207_v33 = vld [vmem:[#allocation3 + $0x28] sm:$0xff]  ;;  %v212_v34 = vld [vmem:[#allocation3 + $0x50] sm:$0xff] }
  0xb5   :  { %558 = vmatprep.subr.mxu0 %v259_v35  ;;  %671 = vmatprep.subr.mxu1 %v261_v36  ;;  %v159_v40 = vpop.permute.xlu0 %158  ;;  %v165_v59 = vpop.permute.xlu1 %164  ;;  %v206_v35 = vld [vmem:[#allocation3 + $0x20] sm:$0xff]  ;;  %v209_v36 = vld [vmem:[#allocation3 + $0x38] sm:$0xff] }
  0xb6   :  { %559 = vmatpush1.msra.mxu0 %v258_v38  ;;  %vm179_vm9 = vcmp.eq.s32.totalorder %v159_v40, %v3044_v31  ;;  %400 = vmatprep.mubr.f32.mxu0 %v4098_v1  ;;  %vm181_vm11 = vcmp.eq.s32.totalorder %v165_v59, %v3044_v31  ;;  %v203_v38 = vld [vmem:[#allocation3 + $0x8] sm:$0xff]  ;;  %v202_v40 = vld [vmem:[#allocation3] sm:$0xff]  ;;  %v3132_v59 = vld [vmem:[#allocation8 + $0x198] sm:$0xff] }
  0xb7   :  { %513 = vmatprep.mubr.f32.mxu1 %v4098_v1  ;;  %560 = vmatprep.subr.mxu0 %v255_v39  ;;  %v208_v39 = vld [vmem:[#allocation3 + $0x30] sm:$0xff] }
  0xb8   :  { %672 = vmatpush1.msra.mxu1 %v260_v41  ;;  %2501 = vmatmul.mubr.msk.f32.gmra.mxu0 %vm179_vm9, %v2905_v37  ;;  %v205_v41 = vld [vmem:[#allocation3 + $0x18] sm:$0xff] }
  0xb9   :  { %2509 = vmatmul.mubr.msk.f32.gmra.mxu1 %vm179_vm9, %v2905_v37  ;;  %561 = vmatpush1.msra.mxu0 %v254_v42  ;;  %v168_v4 = vpop.permute.xlu0 %167  ;;  %v171_v13 = vpop.permute.xlu1 %170 }
  0xba   :  { %673 = vmatprep.subr.mxu1 %v257_v43  ;;  %562 = vmatprep.subr.mxu0 %v251_v44  ;;  %vm182_vm12 = vcmp.eq.s32.totalorder %v168_v4, %v3044_v31  ;;  %vm183_vm13 = vcmp.eq.s32.totalorder %v171_v13, %v3044_v31  ;;  %v204_v43 = vld [vmem:[#allocation3 + $0x10] sm:$0xff]  ;;  %v3084_v44 = vld [vmem:[#allocation8 + $0x1e8] sm:$0xff] }
  0xbb   :  { %674 = vmatpush1.msra.mxu1 %v256_v45  ;;  %563 = vmatpush1.msra.mxu0 %v250_v46  ;;  %4244 = vst [vmem:[#allocation19_spill] sm:$0xff] %v3084_v44  ;;  %v3087_v45 = vld [vmem:[#allocation8 + $0x1e0] sm:$0xff]  ;;  %v3091_v46 = vld [vmem:[#allocation8 + $0x1f8] sm:$0xff]  ;;  %v3155_v4 = vld [vmem:[#allocation8 + $0x170] sm:$0xff] }
  0xbc   :  { %675 = vmatprep.subr.mxu1 %v253_v47  ;;  %406 = vmatprep.mubr.f32.mxu0 %v4098_v1  ;;  %4245 = vst [vmem:[#allocation20_spill] sm:$0xff] %v3091_v46  ;;  %v3093_v47 = vld [vmem:[#allocation8 + $0x1c8] sm:$0xff]  ;;  %4250 = vst [vmem:[#allocation25_spill] sm:$0xff] %v3155_v4  ;;  %v3184_v13 = vld [vmem:[#allocation8 + $0x130] sm:$0xff] }
  0xbd   :  { %519 = vmatprep.mubr.f32.mxu1 %v4098_v1  ;;  %564 = vmatprep.subr.mxu0 %v247_v49  ;;  %v174_v22 = vpop.permute.xlu0 %173  ;;  %v177_v32 = vpop.permute.xlu1 %176  ;;  %v3099_v49 = vld [vmem:[#allocation8 + $0x1c0] sm:$0xff]  ;;  %4258 = vst [vmem:[#allocation33_spill] sm:$0xff] %v3184_v13 }
  0xbe   :  { %676 = vmatpush1.msra.mxu1 %v252_v50  ;;  %2502 = vmatmul.mubr.msk.f32.gmra.mxu0 %vm180_vm10, %v2905_v37  ;;  %vm184_vm14 = vcmp.eq.s32.totalorder %v174_v22, %v3044_v31  ;;  %vm185_vm15 = vcmp.eq.s32.totalorder %v177_v32, %v3044_v31  ;;  %v3103_v50 = vld [vmem:[#allocation8 + $0x1d8] sm:$0xff]  ;;  %v3213_v22 = vld [vmem:[#allocation8 + $0xf0] sm:$0xff] }
  0xbf   :  { %2510 = vmatmul.mubr.msk.f32.gmra.mxu1 %vm180_vm10, %v2905_v37  ;;  %565 = vmatpush1.msra.mxu0 %v246_v51  ;;  %4266 = vst [vmem:[#allocation41_spill] sm:$0xff] %v3213_v22  ;;  %v3242_v32 = vld [vmem:[#allocation8 + $0xb0] sm:$0xff] }
  0xc0   :  { %677 = vmatprep.subr.mxu1 %v249_v52  ;;  %566 = vmatprep.subr.mxu0 %v243_v53  ;;  %v3107_v52 = vld [vmem:[#allocation8 + $0x1a8] sm:$0xff]  ;;  %v3111_v53 = vld [vmem:[#allocation8 + $0x1d0] sm:$0xff]  ;;  %4274 = vst [vmem:[#allocation49_spill] sm:$0xff] %v3242_v32 }
  0xc1   :  { %678 = vmatpush1.msra.mxu1 %v248_v54  ;;  %567 = vmatpush1.msra.mxu0 %v242_v55  ;;  %v100_v42 = vpop.permute.xlu0 %99  ;;  %v103_v51 = vpop.permute.xlu1 %102  ;;  %v3115_v54 = vld [vmem:[#allocation8 + $0x1a0] sm:$0xff]  ;;  %v3120_v55 = vld [vmem:[#allocation8 + $0x1b8] sm:$0xff] }
  0xc2   :  { %679 = vmatprep.subr.mxu1 %v245_v56  ;;  %412 = vmatprep.mubr.f32.mxu0 %v4098_v1  ;;  %vm122_vm0 = vcmp.eq.s32.totalorder %v100_v42, %v3044_v31  ;;  %vm123_vm1 = vcmp.eq.s32.totalorder %v103_v51, %v3044_v31  ;;  %v3122_v56 = vld [vmem:[#allocation8 + $0x188] sm:$0xff]  ;;  %v3271_v42 = vld [vmem:[#allocation8 + $0x70] sm:$0xff]  ;;  %v3277_v51 = vld [vmem:[#allocation8 + $0x58] sm:$0xff] }
  0xc3   :  { %525 = vmatprep.mubr.f32.mxu1 %v4098_v1  ;;  %568 = vmatprep.subr.mxu0 %v239_v57  ;;  %v3126_v57 = vld [vmem:[#allocation8 + $0x1b0] sm:$0xff]  ;;  %4282 = vst [vmem:[#allocation57_spill] sm:$0xff] %v3271_v42  ;;  %4284 = vst [vmem:[#allocation59_spill] sm:$0xff] %v3277_v51 }
  0xc4   :  { %680 = vmatpush1.msra.mxu1 %v244_v58  ;;  %2503 = vmatmul.mubr.msk.f32.gmra.mxu0 %vm181_vm11, %v2905_v37  ;;  %v3128_v58 = vld [vmem:[#allocation8 + $0x180] sm:$0xff] }
  0xc5   :  { %2511 = vmatmul.mubr.msk.f32.gmra.mxu1 %vm181_vm11, %v2905_v37  ;;  %569 = vmatpush1.msra.mxu0 %v238_v60  ;;  %v106_v60 = vpop.permute.xlu0 %105 }
  0xc6   :  { %681 = vmatprep.subr.mxu1 %v241_v61  ;;  %570 = vmatprep.subr.mxu0 %v235_v62  ;;  %v3136_v61 = vld [vmem:[#allocation8 + $0x168] sm:$0xff]  ;;  %v3140_v62 = vld [vmem:[#allocation8 + $0x190] sm:$0xff]  ;;  %vm124_vm2 = vcmp.eq.s32.totalorder %v106_v60, %v3044_v31 }
  0xc7   :  { %682 = vmatpush1.msra.mxu1 %v240_v63  ;;  %571 = vmatpush1.msra.mxu0 %v234_v2  ;;  %4246 = vst [vmem:[#allocation21_spill] sm:$0xff] %v3136_v61  ;;  %v3144_v63 = vld [vmem:[#allocation8 + $0x160] sm:$0xff]  ;;  %v3149_v2 = vld [vmem:[#allocation8 + $0x178] sm:$0xff] }
  0xc8   :  { %683 = vmatprep.subr.mxu1 %v237_v3  ;;  %418 = vmatprep.mubr.f32.mxu0 %v4098_v1  ;;  %4247 = vst [vmem:[#allocation22_spill] sm:$0xff] %v3144_v63  ;;  %4248 = vst [vmem:[#allocation23_spill] sm:$0xff] %v3149_v2  ;;  %v3151_v3 = vld [vmem:[#allocation8 + $0x148] sm:$0xff] }
  0xc9   :  { %531 = vmatprep.mubr.f32.mxu1 %v4098_v1  ;;  %572 = vmatprep.subr.mxu0 %v231_v5  ;;  %4249 = vst [vmem:[#allocation24_spill] sm:$0xff] %v3151_v3  ;;  %v3157_v5 = vld [vmem:[#allocation8 + $0x140] sm:$0xff] }
  0xca   :  { %684 = vmatpush1.msra.mxu1 %v236_v6  ;;  %2504 = vmatmul.mubr.msk.f32.gmra.mxu0 %vm182_vm12, %v2905_v37  ;;  %4251 = vst [vmem:[#allocation26_spill] sm:$0xff] %v3157_v5  ;;  %v3161_v6 = vld [vmem:[#allocation8 + $0x158] sm:$0xff] }
  0xcb   :  { %2512 = vmatmul.mubr.msk.f32.gmra.mxu1 %vm182_vm12, %v2905_v37  ;;  %573 = vmatpush1.msra.mxu0 %v230_v7  ;;  %4252 = vst [vmem:[#allocation27_spill] sm:$0xff] %v3161_v6  ;;  %v109_v7 = vpop.permute.xlu1 %108 }
  0xcc   :  { %685 = vmatprep.subr.mxu1 %v233_v8  ;;  %574 = vmatprep.subr.mxu0 %v227_v9  ;;  %v3165_v8 = vld [vmem:[#allocation8 + $0x128] sm:$0xff]  ;;  %v3169_v9 = vld [vmem:[#allocation8 + $0x150] sm:$0xff]  ;;  %vm125_vm3 = vcmp.eq.s32.totalorder %v109_v7, %v3044_v31 }
  0xcd   :  { %686 = vmatpush1.msra.mxu1 %v232_v10  ;;  %575 = vmatpush1.msra.mxu0 %v226_v11  ;;  %4253 = vst [vmem:[#allocation28_spill] sm:$0xff] %v3165_v8  ;;  %4254 = vst [vmem:[#allocation29_spill] sm:$0xff] %v3169_v9  ;;  %v3173_v10 = vld [vmem:[#allocation8 + $0x120] sm:$0xff]  ;;  %v3178_v11 = vld [vmem:[#allocation8 + $0x138] sm:$0xff] }
  0xce   :  { %687 = vmatprep.subr.mxu1 %v229_v12  ;;  %424 = vmatprep.mubr.f32.mxu0 %v4098_v1  ;;  %4255 = vst [vmem:[#allocation30_spill] sm:$0xff] %v3173_v10  ;;  %4256 = vst [vmem:[#allocation31_spill] sm:$0xff] %v3178_v11  ;;  %v3180_v12 = vld [vmem:[#allocation8 + $0x108] sm:$0xff] }
  0xcf   :  { %537 = vmatprep.mubr.f32.mxu1 %v4098_v1  ;;  %576 = vmatprep.subr.mxu0 %v223_v14  ;;  %4257 = vst [vmem:[#allocation32_spill] sm:$0xff] %v3180_v12  ;;  %v3186_v14 = vld [vmem:[#allocation8 + $0x100] sm:$0xff]  ;;  %v3281_v7 = vld [vmem:[#allocation8 + $0x28] sm:$0xff] }
  0xd0   :  { %688 = vmatpush1.msra.mxu1 %v228_v15  ;;  %2505 = vmatmul.mubr.msk.f32.gmra.mxu0 %vm183_vm13, %v2905_v37  ;;  %4259 = vst [vmem:[#allocation34_spill] sm:$0xff] %v3186_v14  ;;  %v3190_v15 = vld [vmem:[#allocation8 + $0x118] sm:$0xff]  ;;  %4285 = vst [vmem:[#allocation60_spill] sm:$0xff] %v3281_v7 }
  0xd1   :  { %2513 = vmatmul.mubr.msk.f32.gmra.mxu1 %vm183_vm13, %v2905_v37  ;;  %577 = vmatpush1.msra.mxu0 %v222_v16  ;;  %4260 = vst [vmem:[#allocation35_spill] sm:$0xff] %v3190_v15  ;;  %v112_v16 = vpop.permute.xlu0 %111 }
  0xd2   :  { %689 = vmatprep.subr.mxu1 %v225_v17  ;;  %578 = vmatprep.subr.mxu0 %v219_v18  ;;  %v3194_v17 = vld [vmem:[#allocation8 + $0xe8] sm:$0xff]  ;;  %v3198_v18 = vld [vmem:[#allocation8 + $0x110] sm:$0xff]  ;;  %vm126_vm4 = vcmp.eq.s32.totalorder %v112_v16, %v3044_v31 }
  0xd3   :  { %690 = vmatpush1.msra.mxu1 %v224_v19  ;;  %579 = vmatpush1.msra.mxu0 %v218_v20  ;;  %4261 = vst [vmem:[#allocation36_spill] sm:$0xff] %v3194_v17  ;;  %4262 = vst [vmem:[#allocation37_spill] sm:$0xff] %v3198_v18  ;;  %v3202_v19 = vld [vmem:[#allocation8 + $0xe0] sm:$0xff]  ;;  %v3207_v20 = vld [vmem:[#allocation8 + $0xf8] sm:$0xff] }
  0xd4   :  { %691 = vmatprep.subr.mxu1 %v221_v21  ;;  %430 = vmatprep.mubr.f32.mxu0 %v4098_v1  ;;  %4263 = vst [vmem:[#allocation38_spill] sm:$0xff] %v3202_v19  ;;  %4264 = vst [vmem:[#allocation39_spill] sm:$0xff] %v3207_v20  ;;  %v3209_v21 = vld [vmem:[#allocation8 + $0xc8] sm:$0xff]  ;;  %v3285_v16 = vld [vmem:[#allocation8 + $0x50] sm:$0xff] }
  0xd5   :  { %543 = vmatprep.mubr.f32.mxu1 %v4098_v1  ;;  %580 = vmatprep.subr.mxu0 %v215_v23  ;;  %4265 = vst [vmem:[#allocation40_spill] sm:$0xff] %v3209_v21  ;;  %v3215_v23 = vld [vmem:[#allocation8 + $0xc0] sm:$0xff]  ;;  %4286 = vst [vmem:[#allocation61_spill] sm:$0xff] %v3285_v16 }
  0xd6   :  { %692 = vmatpush1.msra.mxu1 %v220_v24  ;;  %2506 = vmatmul.mubr.msk.f32.gmra.mxu0 %vm184_vm14, %v2905_v37  ;;  %4267 = vst [vmem:[#allocation42_spill] sm:$0xff] %v3215_v23  ;;  %v3219_v24 = vld [vmem:[#allocation8 + $0xd8] sm:$0xff] }
  0xd7   :  { %2514 = vmatmul.mubr.msk.f32.gmra.mxu1 %vm184_vm14, %v2905_v37  ;;  %581 = vmatpush1.msra.mxu0 %v214_v25  ;;  %4268 = vst [vmem:[#allocation43_spill] sm:$0xff] %v3219_v24  ;;  %v115_v25 = vpop.permute.xlu1 %114 }
  0xd8   :  { %693 = vmatprep.subr.mxu1 %v217_v26  ;;  %582 = vmatprep.subr.mxu0 %v211_v27  ;;  %v3223_v26 = vld [vmem:[#allocation8 + $0xa8] sm:$0xff]  ;;  %v3227_v27 = vld [vmem:[#allocation8 + $0xd0] sm:$0xff]  ;;  %vm127_vm5 = vcmp.eq.s32.totalorder %v115_v25, %v3044_v31  ;;  %v3289_v25 = vld [vmem:[#allocation8 + $0x20] sm:$0xff] }
  0xd9   :  { %694 = vmatpush1.msra.mxu1 %v216_v28  ;;  %583 = vmatpush1.msra.mxu0 %v210_v29  ;;  %4269 = vst [vmem:[#allocation44_spill] sm:$0xff] %v3223_v26  ;;  %4270 = vst [vmem:[#allocation45_spill] sm:$0xff] %v3227_v27  ;;  %v3231_v28 = vld [vmem:[#allocation8 + $0xa0] sm:$0xff]  ;;  %v3236_v29 = vld [vmem:[#allocation8 + $0xb8] sm:$0xff] }
  0xda   :  { %695 = vmatprep.subr.mxu1 %v213_v30  ;;  %436 = vmatprep.mubr.f32.mxu0 %v4098_v1  ;;  %4271 = vst [vmem:[#allocation46_spill] sm:$0xff] %v3231_v28  ;;  %4272 = vst [vmem:[#allocation47_spill] sm:$0xff] %v3236_v29  ;;  %v3238_v30 = vld [vmem:[#allocation8 + $0x88] sm:$0xff] }
  0xdb   :  { %549 = vmatprep.mubr.f32.mxu1 %v4098_v1  ;;  %584 = vmatprep.subr.mxu0 %v207_v33  ;;  %4273 = vst [vmem:[#allocation48_spill] sm:$0xff] %v3238_v30  ;;  %v3244_v33 = vld [vmem:[#allocation8 + $0x80] sm:$0xff]  ;;  %v121_v60 = vpop.permute.xlu1 %120  ;;  %4287 = vst [vmem:[#allocation62_spill] sm:$0xff] %v3289_v25 }
  0xdc   :  { %696 = vmatpush1.msra.mxu1 %v212_v34  ;;  %2507 = vmatmul.mubr.msk.f32.gmra.mxu0 %vm185_vm15, %v2905_v37  ;;  %4275 = vst [vmem:[#allocation50_spill] sm:$0xff] %v3244_v33  ;;  %v3248_v34 = vld [vmem:[#allocation8 + $0x98] sm:$0xff]  ;;  %vm129_vm7 = vcmp.eq.s32.totalorder %v121_v60, %v3044_v31  ;;  %v3310_v60 = vld [vmem:[#allocation8 + $0x10] sm:$0xff] }
  0xdd   :  { %2515 = vmatmul.mubr.msk.f32.gmra.mxu1 %vm185_vm15, %v2905_v37  ;;  %585 = vmatpush1.msra.mxu0 %v206_v35  ;;  %4276 = vst [vmem:[#allocation51_spill] sm:$0xff] %v3248_v34  ;;  %v118_v35 = vpop.permute.xlu0 %117  ;;  %4293 = vst [vmem:[#allocation68_spill] sm:$0xff] %v3310_v60 }
  0xde   :  { %697 = vmatprep.subr.mxu1 %v209_v36  ;;  %586 = vmatprep.subr.mxu0 %v203_v38  ;;  %v3252_v36 = vld [vmem:[#allocation8 + $0x68] sm:$0xff]  ;;  %v3256_v38 = vld [vmem:[#allocation8 + $0x90] sm:$0xff]  ;;  %vm128_vm6 = vcmp.eq.s32.totalorder %v118_v35, %v3044_v31  ;;  %v3294_v35 = vld [vmem:[#allocation8 + $0x38] sm:$0xff] }
  0xdf   :  { %698 = vmatpush1.msra.mxu1 %v208_v39  ;;  %587 = vmatpush1.msra.mxu0 %v202_v40  ;;  %4277 = vst [vmem:[#allocation52_spill] sm:$0xff] %v3252_v36  ;;  %4278 = vst [vmem:[#allocation53_spill] sm:$0xff] %v3256_v38  ;;  %v3260_v39 = vld [vmem:[#allocation8 + $0x60] sm:$0xff]  ;;  %v3265_v40 = vld [vmem:[#allocation8 + $0x78] sm:$0xff] }
  0xe0   :  { %699 = vmatprep.subr.mxu1 %v205_v41  ;;  %620 = vmatprep.mubr.f32.mxu0 %v4098_v1  ;;  %4279 = vst [vmem:[#allocation54_spill] sm:$0xff] %v3260_v39  ;;  %4280 = vst [vmem:[#allocation55_spill] sm:$0xff] %v3265_v40  ;;  %v3267_v41 = vld [vmem:[#allocation8 + $0x48] sm:$0xff]  ;;  %v3306_v31 = vld [vmem:[#allocation8 + $0x18] sm:$0xff] }
  0xe1   :  { %700 = vmatpush1.msra.mxu1 %v204_v43  ;;  %733 = vmatprep.mubr.f32.mxu1 %v4098_v1  ;;  %4281 = vst [vmem:[#allocation56_spill] sm:$0xff] %v3267_v41  ;;  %v3273_v43 = vld [vmem:[#allocation8 + $0x40] sm:$0xff]  ;;  %4288 = vst [vmem:[#allocation63_spill] sm:$0xff] %v3294_v35 }
  0xe2   :  { %883 = vmatprep.subr.mxu0 %v3084_v44  ;;  %2516 = vmatmul.mubr.msk.f32.vlgmr.msra.gmra.mxu0 %vm122_vm0, %v2905_v37  ;;  %4283 = vst [vmem:[#allocation58_spill] sm:$0xff] %v3273_v43  ;;  %4292 = vst [vmem:[#allocation67_spill] sm:$0xff] %v3306_v31 }
  0xe3   :  { %2524 = vmatmul.mubr.msk.f32.vlgmr.msra.gmra.mxu1 %vm122_vm0, %v2905_v37  ;;  %884 = vmatpush1.msra.mxu0 %v3087_v45  ;;  %vm2449_vm0 = vcmask 523264  }
  0xe4   :  { %954 = vmatprep.subr.mxu1 %v3091_v46  ;;  %885 = vmatprep.subr.mxu0 %v3093_v47 }
  0xe5   :  { %955 = vmatpush1.msra.mxu1 %v3097_v48  ;;  %886 = vmatpush1.msra.mxu0 %v3099_v49 }
  0xe6   :  { %956 = vmatprep.subr.mxu1 %v3103_v50  ;;  %626 = vmatprep.mubr.f32.mxu0 %v4098_v1 }
  0xe7   :  { %739 = vmatprep.mubr.f32.mxu1 %v4098_v1  ;;  %887 = vmatprep.subr.mxu0 %v3107_v52 }
  0xe8   :  { %957 = vmatpush1.msra.mxu1 %v3111_v53  ;;  %2517 = vmatmul.mubr.msk.f32.gmra.mxu0 %vm123_vm1, %v2905_v37 }
  0xe9   :  { %2525 = vmatmul.mubr.msk.f32.gmra.mxu1 %vm123_vm1, %v2905_v37  ;;  %888 = vmatpush1.msra.mxu0 %v3115_v54  ;;  %vm2451_vm1 = vcmask 130048  }
  0xea   :  { %958 = vmatprep.subr.mxu1 %v3120_v55  ;;  %889 = vmatprep.subr.mxu0 %v3122_v56 }
  0xeb   :  { %959 = vmatpush1.msra.mxu1 %v3126_v57  ;;  %890 = vmatpush1.msra.mxu0 %v3128_v58 }
  0xec   :  { %960 = vmatprep.subr.mxu1 %v3132_v59  ;;  %632 = vmatprep.mubr.f32.mxu0 %v4098_v1 }
  0xed   :  { %745 = vmatprep.mubr.f32.mxu1 %v4098_v1  ;;  %891 = vmatprep.subr.mxu0 %v3136_v61 }
  0xee   :  { %961 = vmatpush1.msra.mxu1 %v3140_v62  ;;  %2518 = vmatmul.mubr.msk.f32.gmra.mxu0 %vm124_vm2, %v2905_v37 }
  0xef   :  { %2526 = vmatmul.mubr.msk.f32.gmra.mxu1 %vm124_vm2, %v2905_v37  ;;  %892 = vmatpush1.msra.mxu0 %v3144_v63 }
  0xf0   :  { %962 = vmatprep.subr.mxu1 %v3149_v2  ;;  %893 = vmatprep.subr.mxu0 %v3151_v3 }
  0xf1   :  { %963 = vmatpush1.msra.mxu1 %v3155_v4  ;;  %894 = vmatpush1.msra.mxu0 %v3157_v5 }
  0xf2   :  { %964 = vmatprep.subr.mxu1 %v3161_v6  ;;  %638 = vmatprep.mubr.f32.mxu0 %v4098_v1 }
  0xf3   :  { %751 = vmatprep.mubr.f32.mxu1 %v4098_v1  ;;  %895 = vmatprep.subr.mxu0 %v3165_v8 }
  0xf4   :  { %965 = vmatpush1.msra.mxu1 %v3169_v9  ;;  %2519 = vmatmul.mubr.msk.f32.gmra.mxu0 %vm125_vm3, %v2905_v37 }
  0xf5   :  { %2527 = vmatmul.mubr.msk.f32.gmra.mxu1 %vm125_vm3, %v2905_v37  ;;  %896 = vmatpush1.msra.mxu0 %v3173_v10 }
  0xf6   :  { %966 = vmatprep.subr.mxu1 %v3178_v11  ;;  %897 = vmatprep.subr.mxu0 %v3180_v12 }
  0xf7   :  { %967 = vmatpush1.msra.mxu1 %v3184_v13  ;;  %898 = vmatpush1.msra.mxu0 %v3186_v14 }
  0xf8   :  { %968 = vmatprep.subr.mxu1 %v3190_v15  ;;  %644 = vmatprep.mubr.f32.mxu0 %v4098_v1 }
  0xf9   :  { %757 = vmatprep.mubr.f32.mxu1 %v4098_v1  ;;  %899 = vmatprep.subr.mxu0 %v3194_v17 }
  0xfa   :  { %969 = vmatpush1.msra.mxu1 %v3198_v18  ;;  %2520 = vmatmul.mubr.msk.f32.gmra.mxu0 %vm126_vm4, %v2905_v37 }
  0xfb   :  { %2528 = vmatmul.mubr.msk.f32.gmra.mxu1 %vm126_vm4, %v2905_v37  ;;  %900 = vmatpush1.msra.mxu0 %v3202_v19 }
  0xfc   :  { %970 = vmatprep.subr.mxu1 %v3207_v20  ;;  %901 = vmatprep.subr.mxu0 %v3209_v21 }
  0xfd   :  { %971 = vmatpush1.msra.mxu1 %v3213_v22  ;;  %902 = vmatpush1.msra.mxu0 %v3215_v23 }
  0xfe   :  { %972 = vmatprep.subr.mxu1 %v3219_v24  ;;  %650 = vmatprep.mubr.f32.mxu0 %v4098_v1 }
  0xff   :  { %763 = vmatprep.mubr.f32.mxu1 %v4098_v1  ;;  %903 = vmatprep.subr.mxu0 %v3223_v26 }
 0x100   :  { %973 = vmatpush1.msra.mxu1 %v3227_v27  ;;  %2521 = vmatmul.mubr.msk.f32.gmra.mxu0 %vm127_vm5, %v2905_v37 }
 0x101   :  { %2529 = vmatmul.mubr.msk.f32.gmra.mxu1 %vm127_vm5, %v2905_v37  ;;  %904 = vmatpush1.msra.mxu0 %v3231_v28 }
 0x102   :  { %974 = vmatprep.subr.mxu1 %v3236_v29  ;;  %905 = vmatprep.subr.mxu0 %v3238_v30 }
 0x103   :  { %975 = vmatpush1.msra.mxu1 %v3242_v32  ;;  %906 = vmatpush1.msra.mxu0 %v3244_v33 }
 0x104   :  { %976 = vmatprep.subr.mxu1 %v3248_v34  ;;  %656 = vmatprep.mubr.f32.mxu0 %v4098_v1 }
 0x105   :  { %769 = vmatprep.mubr.f32.mxu1 %v4098_v1  ;;  %907 = vmatprep.subr.mxu0 %v3252_v36 }
 0x106   :  { %977 = vmatpush1.msra.mxu1 %v3256_v38  ;;  %2522 = vmatmul.mubr.msk.f32.gmra.mxu0 %vm128_vm6, %v2905_v37 }
 0x107   :  { %2530 = vmatmul.mubr.msk.f32.gmra.mxu1 %vm128_vm6, %v2905_v37  ;;  %908 = vmatpush1.msra.mxu0 %v3260_v39 }
 0x108   :  { %978 = vmatprep.subr.mxu1 %v3265_v40  ;;  %909 = vmatprep.subr.mxu0 %v3267_v41 }
 0x109   :  { %979 = vmatpush1.msra.mxu1 %v3271_v42  ;;  %910 = vmatpush1.msra.mxu0 %v3273_v43  ;;  %v3300_v43 = vld [vmem:[#allocation8 + $0x30] sm:$0xff] }
 0x10a   :  { %980 = vmatprep.subr.mxu1 %v3277_v51  ;;  %662 = vmatprep.mubr.f32.mxu0 %v4098_v1  ;;  %4290 = vst [vmem:[#allocation65_spill] sm:$0xff] %v3300_v43  ;;  %v3302_v51 = vld [vmem:[#allocation8] sm:$0xff] }
 0x10b   :  { %775 = vmatprep.mubr.f32.mxu1 %v4098_v1  ;;  %911 = vmatprep.subr.mxu0 %v3281_v7  ;;  %4291 = vst [vmem:[#allocation66_spill] sm:$0xff] %v3302_v51 }
 0x10c   :  { %981 = vmatpush1.msra.mxu1 %v3285_v16  ;;  %2523 = vmatmul.mubr.msk.f32.gmra.mxu0 %vm129_vm7, %v2905_v37 }
 0x10d   :  { %2531 = vmatmul.mubr.msk.f32.gmra.mxu1 %vm129_vm7, %v2905_v37  ;;  %912 = vmatpush1.msra.mxu0 %v3289_v25  ;;  %v4294_v37 = vld [vmem:[#allocation59_spill] sm:$0xff] }
 0x10e   :  { %982 = vmatprep.subr.mxu1 %v3294_v35  ;;  %913 = vmatprep.subr.mxu0 %v3296_v0 }
 0x10f   :  { %983 = vmatpush1.msra.mxu1 %v3300_v43  ;;  %914 = vmatpush1.msra.mxu0 %v3302_v51 }
 0x110   :  { %984 = vmatprep.subr.mxu1 %v3306_v31  ;;  %947 = vmatprep.mubr.f32.mxu0 %v4098_v1 }
 0x111   :  { %985 = vmatpush1.msra.mxu1 %v3310_v60  ;;  %1018 = vmatprep.mubr.f32.mxu1 %v4098_v1 }
 0x112   :  { %948 = vmatmul.mubr.f32.vlgmr.msra.gmra.mxu0 %v4098_v1  ;;  %1019 = vmatmul.mubr.f32.vlgmr.msra.gmra.mxu1 %v4098_v1  ;;  %v4295_v1 = vld [vmem:[#allocation58_spill] sm:$0xff] }
 0x113   :  { %1065 = vmatprep.subr.mxu0 %v3084_v44  ;;  %1136 = vmatprep.subr.mxu1 %v3091_v46 }
 0x114   :  { %1066 = vmatpush1.msra.mxu0 %v3087_v45  ;;  %1137 = vmatpush1.msra.mxu1 %v3097_v48 }
 0x115   :  { %1067 = vmatprep.subr.mxu0 %v3093_v47  ;;  %1138 = vmatprep.subr.mxu1 %v3103_v50 }
 0x116   :  { %1068 = vmatpush1.msra.mxu0 %v3099_v49  ;;  %1139 = vmatpush1.msra.mxu1 %v3111_v53 }
 0x117   :  { %1069 = vmatprep.subr.mxu0 %v3107_v52  ;;  %1140 = vmatprep.subr.mxu1 %v3120_v55 }
 0x118   :  { %1070 = vmatpush1.msra.mxu0 %v3115_v54  ;;  %1141 = vmatpush1.msra.mxu1 %v3126_v57 }
 0x119   :  { %1071 = vmatprep.subr.mxu0 %v3122_v56  ;;  %1142 = vmatprep.subr.mxu1 %v3132_v59 }
 0x11a   :  { %1072 = vmatpush1.msra.mxu0 %v3128_v58  ;;  %1143 = vmatpush1.msra.mxu1 %v3140_v62 }
 0x11b   :  { %1073 = vmatprep.subr.mxu0 %v3136_v61  ;;  %1144 = vmatprep.subr.mxu1 %v3149_v2 }
 0x11c   :  { %1074 = vmatpush1.msra.mxu0 %v3144_v63  ;;  %1145 = vmatpush1.msra.mxu1 %v3155_v4 }
 0x11d   :  { %1075 = vmatprep.subr.mxu0 %v3151_v3  ;;  %1146 = vmatprep.subr.mxu1 %v3161_v6 }
 0x11e   :  { %1076 = vmatpush1.msra.mxu0 %v3157_v5  ;;  %1147 = vmatpush1.msra.mxu1 %v3169_v9 }
 0x11f   :  { %1077 = vmatprep.subr.mxu0 %v3165_v8  ;;  %1148 = vmatprep.subr.mxu1 %v3178_v11 }
 0x120   :  { %1078 = vmatpush1.msra.mxu0 %v3173_v10  ;;  %1149 = vmatpush1.msra.mxu1 %v3184_v13 }
 0x121   :  { %1079 = vmatprep.subr.mxu0 %v3180_v12  ;;  %1150 = vmatprep.subr.mxu1 %v3190_v15 }
 0x122   :  { %1080 = vmatpush1.msra.mxu0 %v3186_v14  ;;  %1151 = vmatpush1.msra.mxu1 %v3198_v18 }
 0x123   :  { %1081 = vmatprep.subr.mxu0 %v3194_v17  ;;  %1152 = vmatprep.subr.mxu1 %v3207_v20 }
 0x124   :  { %1082 = vmatpush1.msra.mxu0 %v3202_v19  ;;  %1153 = vmatpush1.msra.mxu1 %v3213_v22 }
 0x125   :  { %1083 = vmatprep.subr.mxu0 %v3209_v21  ;;  %1154 = vmatprep.subr.mxu1 %v3219_v24 }
 0x126   :  { %1084 = vmatpush1.msra.mxu0 %v3215_v23  ;;  %1155 = vmatpush1.msra.mxu1 %v3227_v27 }
 0x127   :  { %1085 = vmatprep.subr.mxu0 %v3223_v26  ;;  %1156 = vmatprep.subr.mxu1 %v3236_v29 }
 0x128   :  { %1086 = vmatpush1.msra.mxu0 %v3231_v28  ;;  %1157 = vmatpush1.msra.mxu1 %v3242_v32 }
 0x129   :  { %1087 = vmatprep.subr.mxu0 %v3238_v30  ;;  %1158 = vmatprep.subr.mxu1 %v3248_v34 }
 0x12a   :  { %1088 = vmatpush1.msra.mxu0 %v3244_v33  ;;  %1159 = vmatpush1.msra.mxu1 %v3256_v38 }
 0x12b   :  { %1089 = vmatprep.subr.mxu0 %v3252_v36  ;;  %1160 = vmatprep.subr.mxu1 %v3265_v40 }
 0x12c   :  { %1090 = vmatpush1.msra.mxu0 %v3260_v39  ;;  %1161 = vmatpush1.msra.mxu1 %v3271_v42 }
 0x12d   :  { %1091 = vmatprep.subr.mxu0 %v3267_v41  ;;  %1162 = vmatprep.subr.mxu1 %v4294_v37  ;;  %v4296_v41 = vmov 0.0  }
 0x12e   :  { %1092 = vmatpush1.msra.mxu0 %v4295_v1  ;;  %1163 = vmatpush1.msra.mxu1 %v3285_v16 }
 0x12f   :  { %1093 = vmatprep.subr.mxu0 %v3281_v7  ;;  %1164 = vmatprep.subr.mxu1 %v3294_v35 }
 0x130   :  { %1094 = vmatpush1.msra.mxu0 %v3289_v25  ;;  %1165 = vmatpush1.msra.mxu1 %v3300_v43 }
 0x131   :  { %1095 = vmatprep.subr.mxu0 %v3296_v0  ;;  %1166 = vmatprep.subr.mxu1 %v3306_v31 }
 0x132   :  { %1096 = vmatpush1.msra.mxu0 %v3302_v51  ;;  %1129 = vmatprep.mubr.f32.mxu0 %v4296_v41 }
 0x133   :  { %1167 = vmatpush1.msra.mxu1 %v3310_v60  ;;  %1200 = vmatprep.mubr.f32.mxu1 %v4296_v41 }
 0x134   :  { %1247 = vmatprep.subr.mxu0 %v3084_v44  ;;  %1318 = vmatprep.subr.mxu1 %v3091_v46 }
 0x173   :  { %v3388_v35 = vpop.f32.mrf.mxu0  ;;  %v3390_v25 = vpop.f32.mrf.mxu1 }
 0x175   :  { %v3392_v43 = vpop.f32.mrf.mxu0  ;;  %v3394_v0 = vpop.f32.mrf.mxu1 }
 0x178   :  { %v402_v31 = vpop.f32.mrf.mxu0 }
 0x179   :  { %v515_v51 = vpop.f32.mrf.mxu1 }
 0x17a   :  { %v404_v7 = vpop.f32.mrf.mxu0 }
 0x17b   :  { %v517_v16 = vpop.f32.mrf.mxu1 }
 0x17e   :  { %v408_v1 = vpop.f32.mrf.mxu0 }
 0x17f   :  { %v521_v60 = vpop.f32.mrf.mxu1 }
 0x180   :  { %v410_v37 = vpop.f32.mrf.mxu0 }
 0x181   :  { %v523_v41 = vpop.f32.mrf.mxu1 }
 0x184   :  { %v414_v42 = vpop.f32.mrf.mxu0 }
 0x185   :  { %v527_v44 = vpop.f32.mrf.mxu1 }
 0x186   :  { %v416_v39 = vpop.f32.mrf.mxu0 }
 0x187   :  { %v529_v46 = vpop.f32.mrf.mxu1 }
 0x18a   :  { %v420_v40 = vpop.f32.mrf.mxu0 }
 0x18b   :  { %v533_v36 = vpop.f32.mrf.mxu1 }
 0x18c   :  { %v422_v38 = vpop.f32.mrf.mxu0 }
 0x18d   :  { %v535_v33 = vpop.f32.mrf.mxu1 }
 0x190   :  { %v426_v34 = vpop.f32.mrf.mxu0 }
 0x191   :  { %v539_v30 = vpop.f32.mrf.mxu1 }
 0x192   :  { %v428_v32 = vpop.f32.mrf.mxu0 }
 0x193   :  { %v541_v28 = vpop.f32.mrf.mxu1 }
 0x196   :  { %v432_v29 = vpop.f32.mrf.mxu0 }
 0x197   :  { %v545_v26 = vpop.f32.mrf.mxu1 }
 0x198   :  { %v434_v27 = vpop.f32.mrf.mxu0 }
 0x199   :  { %v547_v23 = vpop.f32.mrf.mxu1 }
 0x19c   :  { %v438_v24 = vpop.f32.mrf.mxu0 }
 0x19d   :  { %v551_v21 = vpop.f32.mrf.mxu1 }
 0x19e   :  { %v440_v22 = vpop.f32.mrf.mxu0 }
 0x19f   :  { %v553_v19 = vpop.f32.mrf.mxu1 }
 0x1a2   :  { %v622_v20 = vpop.f32.mrf.mxu0 }
 0x1a3   :  { %v3396_v17 = vpop.f32.mrf.mxu1 }
 0x1a4   :  { %v624_v18 = vpop.f32.mrf.mxu0 }
 0x1a5   :  { %v3398_v14 = vpop.f32.mrf.mxu1 }
 0x1a8   :  { %v628_v15 = vpop.f32.mrf.mxu0 }
 0x1a9   :  { %v3400_v12 = vadd.f32 %v628_v15, %v402_v31  ;;  %v741_v13 = vpop.f32.mrf.mxu1 }
 0x1aa   :  { %v3402_v10 = vadd.f32 %v741_v13, %v515_v51  ;;  %v630_v11 = vpop.f32.mrf.mxu0 }
 0x1ab   :  { %v3404_v8 = vadd.f32 %v630_v11, %v404_v7  ;;  %v743_v9 = vpop.f32.mrf.mxu1 }
 0x1ac   :  { %v3406_v5 = vadd.f32 %v743_v9, %v517_v16 }
 0x1ae   :  { %v634_v6 = vpop.f32.mrf.mxu0 }
 0x1af   :  { %v3408_v3 = vadd.f32 %v634_v6, %v408_v1  ;;  %v747_v4 = vpop.f32.mrf.mxu1 }
 0x1b0   :  { %v3410_v63 = vadd.f32 %v747_v4, %v521_v60  ;;  %v636_v2 = vpop.f32.mrf.mxu0 }
 0x1b1   :  { %4297 = vst [vmem:[#allocation69_spill] sm:$0xff] %v3408_v3  ;;  %v3412_v61 = vadd.f32 %v636_v2, %v410_v37  ;;  %v749_v15 = vpop.f32.mrf.mxu1  ;;  %v4364_v3 = vld [vmem:[#allocation65_spill] sm:$0xff] }
 0x1b2   :  { %4298 = vst [vmem:[#allocation70_spill] sm:$0xff] %v3410_v63  ;;  %v3414_v31 = vadd.f32 %v749_v15, %v523_v41  ;;  %v4361_v63 = vld [vmem:[#allocation60_spill] sm:$0xff] }
 0x1b3   :  { %4299 = vst [vmem:[#allocation71_spill] sm:$0xff] %v3412_v61  ;;  %v4363_v61 = vld [vmem:[#allocation62_spill] sm:$0xff] }
 0x1b4   :  { %4300 = vst [vmem:[#allocation72_spill] sm:$0xff] %v3414_v31  ;;  %v640_v13 = vpop.f32.mrf.mxu0  ;;  %v4362_v31 = vld [vmem:[#allocation63_spill] sm:$0xff] }
 0x1b5   :  { %v3416_v51 = vadd.f32 %v640_v13, %v414_v42  ;;  %v753_v11 = vpop.f32.mrf.mxu1 }
 0x1b6   :  { %v3418_v7 = vadd.f32 %v753_v11, %v527_v44  ;;  %v642_v9 = vpop.f32.mrf.mxu0 }
 0x1b7   :  { %4301 = vst [vmem:[#allocation73_spill] sm:$0xff] %v3416_v51  ;;  %v3420_v16 = vadd.f32 %v642_v9, %v416_v39  ;;  %v755_v1 = vpop.f32.mrf.mxu1  ;;  %v4360_v51 = vld [vmem:[#allocation61_spill] sm:$0xff] }
 0x1b8   :  { %4302 = vst [vmem:[#allocation74_spill] sm:$0xff] %v3418_v7  ;;  %v3422_v6 = vadd.f32 %v755_v1, %v529_v46  ;;  %v4357_v7 = vld [vmem:[#allocation56_spill] sm:$0xff] }
 0x1b9   :  { %4303 = vst [vmem:[#allocation75_spill] sm:$0xff] %v3420_v16  ;;  %v4359_v16 = vld [vmem:[#allocation58_spill] sm:$0xff] }
 0x1ba   :  { %4304 = vst [vmem:[#allocation76_spill] sm:$0xff] %v3422_v6  ;;  %v646_v4 = vpop.f32.mrf.mxu0  ;;  %v4358_v6 = vld [vmem:[#allocation59_spill] sm:$0xff] }
 0x1bb   :  { %v3424_v60 = vadd.f32 %v646_v4, %v420_v40  ;;  %v759_v2 = vpop.f32.mrf.mxu1 }
 0x1bc   :  { %v3426_v37 = vadd.f32 %v759_v2, %v533_v36  ;;  %v648_v41 = vpop.f32.mrf.mxu0 }
 0x1bd   :  { %4305 = vst [vmem:[#allocation77_spill] sm:$0xff] %v3424_v60  ;;  %v3428_v15 = vadd.f32 %v648_v41, %v422_v38  ;;  %v761_v42 = vpop.f32.mrf.mxu1  ;;  %v4356_v60 = vld [vmem:[#allocation57_spill] sm:$0xff] }
 0x1be   :  { %4306 = vst [vmem:[#allocation78_spill] sm:$0xff] %v3426_v37  ;;  %v3430_v13 = vadd.f32 %v761_v42, %v535_v33  ;;  %v4353_v37 = vld [vmem:[#allocation52_spill] sm:$0xff] }
 0x1bf   :  { %4307 = vst [vmem:[#allocation79_spill] sm:$0xff] %v3428_v15  ;;  %v4355_v15 = vld [vmem:[#allocation54_spill] sm:$0xff] }
 0x1c0   :  { %4308 = vst [vmem:[#allocation80_spill] sm:$0xff] %v3430_v13  ;;  %v652_v44 = vpop.f32.mrf.mxu0  ;;  %v4354_v13 = vld [vmem:[#allocation55_spill] sm:$0xff] }
 0x1c1   :  { %v3432_v11 = vadd.f32 %v652_v44, %v426_v34  ;;  %v765_v39 = vpop.f32.mrf.mxu1 }
 0x1c2   :  { %v3434_v9 = vadd.f32 %v765_v39, %v539_v30  ;;  %v654_v46 = vpop.f32.mrf.mxu0 }
 0x1c3   :  { %4309 = vst [vmem:[#allocation81_spill] sm:$0xff] %v3432_v11  ;;  %v3436_v1 = vadd.f32 %v654_v46, %v428_v32  ;;  %v767_v40 = vpop.f32.mrf.mxu1  ;;  %v4352_v11 = vld [vmem:[#allocation53_spill] sm:$0xff] }
 0x1c4   :  { %4310 = vst [vmem:[#allocation82_spill] sm:$0xff] %v3434_v9  ;;  %v3438_v4 = vadd.f32 %v767_v40, %v541_v28  ;;  %v4349_v9 = vld [vmem:[#allocation48_spill] sm:$0xff] }
 0x1c5   :  { %4311 = vst [vmem:[#allocation83_spill] sm:$0xff] %v3436_v1  ;;  %v4351_v1 = vld [vmem:[#allocation50_spill] sm:$0xff] }
 0x1c6   :  { %4312 = vst [vmem:[#allocation84_spill] sm:$0xff] %v3438_v4  ;;  %v658_v36 = vpop.f32.mrf.mxu0  ;;  %v4350_v4 = vld [vmem:[#allocation51_spill] sm:$0xff] }
 0x1c7   :  { %v3440_v2 = vadd.f32 %v658_v36, %v432_v29  ;;  %v771_v38 = vpop.f32.mrf.mxu1 }
 0x1c8   :  { %v3442_v41 = vadd.f32 %v771_v38, %v545_v26  ;;  %v660_v33 = vpop.f32.mrf.mxu0  ;;  %v623_v26 = vadd.f32 %v622_v20, %v3388_v35 }
 0x1c9   :  { %4313 = vst [vmem:[#allocation85_spill] sm:$0xff] %v3440_v2  ;;  %v3444_v42 = vadd.f32 %v660_v33, %v434_v27  ;;  %v773_v34 = vpop.f32.mrf.mxu1  ;;  %v625_v27 = vadd.f32 %v624_v18, %v3392_v43  ;;  %v4348_v2 = vld [vmem:[#allocation49_spill] sm:$0xff] }
 0x1ca   :  { %4314 = vst [vmem:[#allocation86_spill] sm:$0xff] %v3442_v41  ;;  %v3446_v44 = vadd.f32 %v773_v34, %v547_v23 }
 0x1cb   :  { %4315 = vst [vmem:[#allocation87_spill] sm:$0xff] %v3444_v42  ;;  %v4347_v42 = vld [vmem:[#allocation46_spill] sm:$0xff] }
 0x1cc   :  { %4316 = vst [vmem:[#allocation88_spill] sm:$0xff] %v3446_v44  ;;  %v664_v30 = vpop.f32.mrf.mxu0  ;;  %v4346_v44 = vld [vmem:[#allocation47_spill] sm:$0xff] }
 0x1cd   :  { %v3448_v39 = vadd.f32 %v664_v30, %v438_v24  ;;  %v777_v32 = vpop.f32.mrf.mxu1 }
 0x1ce   :  { %v3450_v46 = vadd.f32 %v777_v32, %v551_v21  ;;  %v666_v28 = vpop.f32.mrf.mxu0 }
 0x1cf   :  { %4317 = vst [vmem:[#allocation89_spill] sm:$0xff] %v3448_v39  ;;  %v3452_v40 = vadd.f32 %v666_v28, %v440_v22  ;;  %v779_v29 = vpop.f32.mrf.mxu1  ;;  %v738_v22 = vadd.f32 %v3398_v14, %v3394_v0  ;;  %v1057_v14 = vpop.permute.xlu0 %1056  ;;  %v4345_v39 = vld [vmem:[#allocation44_spill] sm:$0xff] }
 0x1d0   :  { %4318 = vst [vmem:[#allocation90_spill] sm:$0xff] %v3450_v46  ;;  %v3454_v36 = vadd.f32 %v779_v29, %v553_v19  ;;  %v736_v19 = vadd.f32 %v3396_v17, %v3390_v25  ;;  %vm1058_vm8 = vcmp.eq.s32.totalorder %v1057_v14, 1  ;;  %v4336_v14 = vld [vmem:[#allocation37_spill] sm:$0xff]  ;;  %v4342_v46 = vld [vmem:[#allocation43_spill] sm:$0xff] }
 0x1d1   :  { %4319 = vst [vmem:[#allocation91_spill] sm:$0xff] %v3452_v40  ;;  %v4344_v40 = vld [vmem:[#allocation45_spill] sm:$0xff] }
 0x1d2   :  { %4320 = vst [vmem:[#allocation92_spill] sm:$0xff] %v3454_v36  ;;  %v949_v38 = vpop.f32.mrf.mxu0  ;;  %v1020_v24 = vpop.f32.mrf.mxu1  ;;  %v4343_v36 = vld [vmem:[#allocation42_spill] sm:$0xff] }
 0x1d3   :  { %v1025_v33 = vadd.f32 %v949_v38, %v623_v26  ;;  %v1027_v20 = vadd.f32 %v1020_v24, %v736_v19  ;;  %v4323_v19 = vld [vmem:[#allocation22_spill] sm:$0xff] }
 0x1d4   :  { %v951_v23 = vpop.f32.mrf.mxu0  ;;  %v1022_v21 = vpop.f32.mrf.mxu1 }
 0x1d5   :  { %v2532_v34 = vmul.f32 -1.442695, %v1025_v33  ;;  %v1026_v41 = vadd.f32 %v951_v23, %v625_v27  ;;  %v1028_v32 = vadd.f32 %v1022_v21, %v738_v22  ;;  %v4321_v22 = vld [vmem:[#allocation21_spill] sm:$0xff] }
 0x1d7   :  { %2573 = vpow2.f32 %v2532_v34  ;;  %v2533_v30 = vmul.f32 -1.442695, %v1026_v41  ;;  %v2534_v35 = vmul.f32 -1.442695, %v1028_v32  ;;  %v4322_v32 = vld [vmem:[#allocation23_spill] sm:$0xff] }
 0x1d9   :  { %2575 = vpow2.f32 %v2533_v30 }
 0x1da   :  { %2577 = vtanh.f32 %v1027_v20  ;;  %v4324_v20 = vld [vmem:[#allocation25_spill] sm:$0xff] }
 0x1db   :  { %2579 = vpow2.f32 %v2534_v35  ;;  %v4325_v35 = vld [vmem:[#allocation24_spill] sm:$0xff] }
 0x1e4   :  { %v2574_v28 = vpop.eup %2573 }
 0x1e5   :  { %v1038_v18 = vadd.f32 1.0, %v2574_v28  ;;  %v4326_v28 = vld [vmem:[#allocation27_spill] sm:$0xff] }
 0x1e6   :  { %v2576_v43 = vpop.eup %2575 }
 0x1e7   :  { %2581 = vrcp.f32 %v1038_v18  ;;  %v1039_v29 = vadd.f32 1.0, %v2576_v43  ;;  %v2578_v41 = vpop.eup %2577  ;;  %v4327_v18 = vld [vmem:[#allocation26_spill] sm:$0xff]  ;;  %v4328_v43 = vld [vmem:[#allocation29_spill] sm:$0xff] }
 0x1e8   :  { %v2580_v26 = vpop.eup %2579 }
 0x1e9   :  { %2583 = vrcp.f32 %v1039_v29  ;;  %v1040_v0 = vadd.f32 1.0, %v2580_v26  ;;  %v4329_v29 = vld [vmem:[#allocation28_spill] sm:$0xff]  ;;  %v4331_v26 = vld [vmem:[#allocation30_spill] sm:$0xff] }
 0x1eb   :  { %2585 = vrcp.f32 %v1040_v0  ;;  %v4335_v0 = vld [vmem:[#allocation34_spill] sm:$0xff] }
 0x1f4   :  { %v2582_v38 = vpop.eup %2581 }
 0x1f5   :  { %v1049_v27 = vmul.f32 %v2582_v38, %v2578_v41  ;;  %v4330_v41 = vld [vmem:[#allocation31_spill] sm:$0xff]  ;;  %v4332_v38 = vld [vmem:[#allocation33_spill] sm:$0xff] }
 0x1f6   :  { %v2584_v33 = vpop.eup %2583 }
 0x1f7   :  { %v1048_v23 = vmul.f32 0.0, %v2584_v33  ;;  %v4334_v33 = vld [vmem:[#allocation35_spill] sm:$0xff] }
 0x1f8   :  { %v2586_v25 = vpop.eup %2585 }
 0x1f9   :  { %v1050_v34 = vadd.f32 %v1049_v27, %v1048_v23  ;;  %v4333_v27 = vld [vmem:[#allocation32_spill] sm:$0xff] }
 0x1fa   :  { %v4337_v23 = vld [vmem:[#allocation36_spill] sm:$0xff] }
 0x1fb   :  { %2587 = vtanh.f32 %v1050_v34  ;;  %v3462_v17 = vsel %vm1058_vm8, %v1050_v34, 0.0  ;;  %v4338_v34 = vld [vmem:[#allocation39_spill] sm:$0xff] }
 0x208   :  { %v2588_v24 = vpop.eup %2587 }
 0x209   :  { %v1052_v30 = vmul.f32 %v2588_v24, %v2586_v25  ;;  %v4339_v25 = vld [vmem:[#allocation38_spill] sm:$0xff]  ;;  %v4340_v24 = vld [vmem:[#allocation41_spill] sm:$0xff] }
 0x20b   :  { %2535 = vmatmul.mubr.msk.f32.vlgmr.msra.gmra.mxu0 %vm1058_vm8, %v1052_v30  ;;  %2536 = vmatmul.mubr.msk.f32.vlgmr.msra.gmra.mxu1 %vm1058_vm8, %v1052_v30  ;;  %v3464_v21 = vsel %vm1058_vm8, %v1052_v30, 0.0  ;;  %v4341_v30 = vld [vmem:[#allocation40_spill] sm:$0xff] }
 0x20c   :  { %1248 = vmatpush1.msra.mxu0 %v3087_v45  ;;  %1319 = vmatpush1.msra.mxu1 %v3097_v48 }
 0x20d   :  { %1249 = vmatprep.subr.mxu0 %v3093_v47  ;;  %1320 = vmatprep.subr.mxu1 %v3103_v50 }
 0x20e   :  { %1250 = vmatpush1.msra.mxu0 %v3099_v49  ;;  %1321 = vmatpush1.msra.mxu1 %v3111_v53 }
 0x20f   :  { %1251 = vmatprep.subr.mxu0 %v3107_v52  ;;  %1322 = vmatprep.subr.mxu1 %v3120_v55 }
 0x210   :  { %1252 = vmatpush1.msra.mxu0 %v3115_v54  ;;  %1323 = vmatpush1.msra.mxu1 %v3126_v57 }
 0x211   :  { %1253 = vmatprep.subr.mxu0 %v3122_v56  ;;  %1324 = vmatprep.subr.mxu1 %v3132_v59 }
 0x212   :  { %1254 = vmatpush1.msra.mxu0 %v3128_v58  ;;  %1325 = vmatpush1.msra.mxu1 %v3140_v62 }
 0x213   :  { %1255 = vmatprep.subr.mxu0 %v4321_v22  ;;  %1326 = vmatprep.subr.mxu1 %v4322_v32 }
 0x214   :  { %1256 = vmatpush1.msra.mxu0 %v4323_v19  ;;  %1327 = vmatpush1.msra.mxu1 %v4324_v20 }
 0x215   :  { %1257 = vmatprep.subr.mxu0 %v4325_v35  ;;  %1328 = vmatprep.subr.mxu1 %v4326_v28 }
 0x216   :  { %1258 = vmatpush1.msra.mxu0 %v4327_v18  ;;  %1329 = vmatpush1.msra.mxu1 %v4328_v43 }
 0x217   :  { %1259 = vmatprep.subr.mxu0 %v4329_v29  ;;  %1330 = vmatprep.subr.mxu1 %v4330_v41 }
 0x218   :  { %1260 = vmatpush1.msra.mxu0 %v4331_v26  ;;  %1331 = vmatpush1.msra.mxu1 %v4332_v38 }
 0x219   :  { %1261 = vmatprep.subr.mxu0 %v4333_v27  ;;  %1332 = vmatprep.subr.mxu1 %v4334_v33 }
 0x21a   :  { %1262 = vmatpush1.msra.mxu0 %v4335_v0  ;;  %1333 = vmatpush1.msra.mxu1 %v4336_v14 }
 0x21b   :  { %1263 = vmatprep.subr.mxu0 %v4337_v23  ;;  %1334 = vmatprep.subr.mxu1 %v4338_v34 }
 0x21c   :  { %1264 = vmatpush1.msra.mxu0 %v4339_v25  ;;  %1335 = vmatpush1.msra.mxu1 %v4340_v24 }
 0x21d   :  { %1265 = vmatprep.subr.mxu0 %v4341_v30  ;;  %1336 = vmatprep.subr.mxu1 %v4342_v46 }
 0x21e   :  { %1266 = vmatpush1.msra.mxu0 %v4343_v36  ;;  %1337 = vmatpush1.msra.mxu1 %v4344_v40 }
 0x21f   :  { %1267 = vmatprep.subr.mxu0 %v4345_v39  ;;  %1338 = vmatprep.subr.mxu1 %v4346_v44 }
 0x220   :  { %1268 = vmatpush1.msra.mxu0 %v4347_v42  ;;  %1339 = vmatpush1.msra.mxu1 %v4348_v2 }
 0x221   :  { %1269 = vmatprep.subr.mxu0 %v4349_v9  ;;  %1340 = vmatprep.subr.mxu1 %v4350_v4 }
 0x222   :  { %1270 = vmatpush1.msra.mxu0 %v4351_v1  ;;  %1341 = vmatpush1.msra.mxu1 %v4352_v11 }
 0x223   :  { %1271 = vmatprep.subr.mxu0 %v4353_v37  ;;  %1342 = vmatprep.subr.mxu1 %v4354_v13  ;;  %v4365_v13 = vld [vmem:[#allocation64_spill] sm:$0xff] }
 0x224   :  { %1272 = vmatpush1.msra.mxu0 %v4355_v15  ;;  %1343 = vmatpush1.msra.mxu1 %v4356_v60  ;;  %v4366_v15 = vld [vmem:[#allocation67_spill] sm:$0xff]  ;;  %v4367_v60 = vld [vmem:[#allocation66_spill] sm:$0xff] }
 0x225   :  { %1273 = vmatprep.subr.mxu0 %v4357_v7  ;;  %1344 = vmatprep.subr.mxu1 %v4358_v6  ;;  %v4368_v7 = vmov 0.0   ;;  %v4369_v6 = vld [vmem:[#allocation68_spill] sm:$0xff] }
 0x226   :  { %1274 = vmatpush1.msra.mxu0 %v4359_v16  ;;  %1345 = vmatpush1.msra.mxu1 %v4360_v51  ;;  %v4370_v51 = vld [vmem:[#allocation19_spill] sm:$0xff] }
 0x227   :  { %1275 = vmatprep.subr.mxu0 %v4361_v63  ;;  %1346 = vmatprep.subr.mxu1 %v4362_v31  ;;  %v4371_v63 = vld [vmem:[#allocation20_spill] sm:$0xff] }
 0x228   :  { %1276 = vmatpush1.msra.mxu0 %v4363_v61  ;;  %1347 = vmatpush1.msra.mxu1 %v4364_v3 }
 0x229   :  { %1277 = vmatprep.subr.mxu0 %v4365_v13  ;;  %1348 = vmatprep.subr.mxu1 %v4366_v15 }
 0x22a   :  { %1278 = vmatpush1.msra.mxu0 %v4367_v60  ;;  %1311 = vmatprep.mubr.f32.mxu0 %v4368_v7 }
 0x22b   :  { %1349 = vmatpush1.msra.mxu1 %v4369_v6  ;;  %1382 = vmatprep.mubr.f32.mxu1 %v4368_v7 }
 0x22c   :  { %1429 = vmatprep.subr.mxu0 %v4370_v51  ;;  %1500 = vmatprep.subr.mxu1 %v4371_v63 }
 0x2cb   :  { %v1131_v31 = vpop.f32.mrf.mxu0  ;;  %v1202_v15 = vpop.f32.mrf.mxu1 }
 0x2cc   :  { %v1207_v61 = vadd.f32 %v1131_v31, %v3400_v12  ;;  %v1209_v7 = vadd.f32 %v1202_v15, %v3402_v10 }
 0x2cd   :  { %v1133_v3 = vpop.f32.mrf.mxu0  ;;  %v1204_v37 = vpop.f32.mrf.mxu1 }
 0x2ce   :  { %v2537_v16 = vmul.f32 -1.442695, %v1207_v61  ;;  %v1208_v13 = vadd.f32 %v1133_v3, %v3404_v8  ;;  %v1210_v6 = vadd.f32 %v1204_v37, %v3406_v5 }
 0x2d0   :  { %2589 = vpow2.f32 %v2537_v16  ;;  %v2538_v60 = vmul.f32 -1.442695, %v1208_v13  ;;  %v2539_v11 = vmul.f32 -1.442695, %v1210_v6  ;;  %v1239_v13 = vpop.permute.xlu1 %1238 }
 0x2d1   :  { %vm1240_vm9 = vcmp.eq.s32.totalorder %v1239_v13, 1  ;;  %v3634_v13 = vld [vmem:[#allocation8 + $0x1c8] sm:$0xff] }
 0x2d2   :  { %2591 = vpow2.f32 %v2538_v60 }
 0x2d3   :  { %2593 = vtanh.f32 %v1209_v7 }
 0x2d4   :  { %2595 = vpow2.f32 %v2539_v11 }
 0x2dd   :  { %v2590_v51 = vpop.eup %2589 }
 0x2de   :  { %v1220_v1 = vadd.f32 1.0, %v2590_v51 }
 0x2df   :  { %v2592_v63 = vpop.eup %2591 }
 0x2e0   :  { %2597 = vrcp.f32 %v1220_v1  ;;  %v1221_v12 = vadd.f32 1.0, %v2592_v63  ;;  %v2594_v61 = vpop.eup %2593  ;;  %v4387_v1 = vld [vmem:[#allocation67_spill] sm:$0xff] }
 0x2e1   :  { %v2596_v3 = vpop.eup %2595 }
 0x2e2   :  { %2599 = vrcp.f32 %v1221_v12  ;;  %v1222_v60 = vadd.f32 1.0, %v2596_v3 }
 0x2e4   :  { %2601 = vrcp.f32 %v1222_v60  ;;  %v3631_v60 = vld [vmem:[#allocation8 + $0x1f0] sm:$0xff] }
 0x2ed   :  { %v2598_v8 = vpop.eup %2597 }
 0x2ee   :  { %v1231_v31 = vmul.f32 %v2598_v8, %v2594_v61 }
 0x2ef   :  { %v2600_v16 = vpop.eup %2599 }
 0x2f0   :  { %v1230_v5 = vmul.f32 %v2600_v16, %v3462_v17  ;;  %v3628_v16 = vld [vmem:[#allocation8 + $0x1e0] sm:$0xff] }
 0x2f1   :  { %v2602_v7 = vpop.eup %2601 }
 0x2f2   :  { %v1232_v37 = vadd.f32 %v1231_v31, %v1230_v5  ;;  %v3637_v5 = vld [vmem:[#allocation8 + $0x1d8] sm:$0xff] }
 0x2f4   :  { %2603 = vtanh.f32 %v1232_v37  ;;  %v3538_v10 = vsel %vm1240_vm9, %v1232_v37, %v3462_v17  ;;  %v3640_v37 = vld [vmem:[#allocation8 + $0x1c0] sm:$0xff] }
 0x301   :  { %v2604_v6 = vpop.eup %2603 }
 0x302   :  { %v1234_v15 = vmul.f32 %v2604_v6, %v2602_v7  ;;  %v3646_v7 = vld [vmem:[#allocation8 + $0x1a8] sm:$0xff]  ;;  %v3649_v6 = vld [vmem:[#allocation8 + $0x1b8] sm:$0xff] }
 0x304   :  { %v3541_v11 = vsel %vm1240_vm9, %v1234_v15, %v3464_v21  ;;  %v3652_v15 = vld [vmem:[#allocation8 + $0x1a0] sm:$0xff] }
 0x305   :  { %1312 = vmatmul.mubr.f32.vlgmr.msra.gmra.mxu0 %v3541_v11  ;;  %1383 = vmatmul.mubr.f32.vlgmr.msra.gmra.mxu1 %v3541_v11 }
 0x306   :  { %1430 = vmatpush1.msra.mxu0 %v3087_v45  ;;  %1501 = vmatpush1.msra.mxu1 %v3097_v48  ;;  %v4372_v45 = vld [vmem:[#allocation50_spill] sm:$0xff]  ;;  %v4374_v48 = vld [vmem:[#allocation52_spill] sm:$0xff] }
 0x307   :  { %1431 = vmatprep.subr.mxu0 %v3093_v47  ;;  %1502 = vmatprep.subr.mxu1 %v3103_v50  ;;  %v4373_v47 = vld [vmem:[#allocation53_spill] sm:$0xff]  ;;  %v4376_v50 = vld [vmem:[#allocation54_spill] sm:$0xff] }
 0x308   :  { %1432 = vmatpush1.msra.mxu0 %v3099_v49  ;;  %1503 = vmatpush1.msra.mxu1 %v3111_v53  ;;  %v4375_v49 = vld [vmem:[#allocation55_spill] sm:$0xff]  ;;  %v4378_v53 = vld [vmem:[#allocation56_spill] sm:$0xff] }
 0x309   :  { %1433 = vmatprep.subr.mxu0 %v3107_v52  ;;  %1504 = vmatprep.subr.mxu1 %v3120_v55  ;;  %v4377_v52 = vld [vmem:[#allocation57_spill] sm:$0xff]  ;;  %v4380_v55 = vld [vmem:[#allocation58_spill] sm:$0xff] }
 0x30a   :  { %1434 = vmatpush1.msra.mxu0 %v3115_v54  ;;  %1505 = vmatpush1.msra.mxu1 %v3126_v57  ;;  %v4379_v54 = vld [vmem:[#allocation59_spill] sm:$0xff]  ;;  %v4382_v57 = vld [vmem:[#allocation60_spill] sm:$0xff] }
 0x30b   :  { %1435 = vmatprep.subr.mxu0 %v3122_v56  ;;  %1506 = vmatprep.subr.mxu1 %v3132_v59  ;;  %v4381_v56 = vld [vmem:[#allocation61_spill] sm:$0xff]  ;;  %v4384_v59 = vld [vmem:[#allocation62_spill] sm:$0xff] }
 0x30c   :  { %1436 = vmatpush1.msra.mxu0 %v3128_v58  ;;  %1507 = vmatpush1.msra.mxu1 %v3140_v62  ;;  %v4383_v58 = vld [vmem:[#allocation63_spill] sm:$0xff]  ;;  %v4385_v62 = vld [vmem:[#allocation65_spill] sm:$0xff] }
 0x30d   :  { %1437 = vmatprep.subr.mxu0 %v4321_v22  ;;  %1508 = vmatprep.subr.mxu1 %v4322_v32  ;;  %v4394_v22 = vld [vmem:[#allocation71_spill] sm:$0xff] }
 0x30e   :  { %1438 = vmatpush1.msra.mxu0 %v4323_v19  ;;  %1509 = vmatpush1.msra.mxu1 %v4324_v20 }
 0x30f   :  { %1439 = vmatprep.subr.mxu0 %v4325_v35  ;;  %1510 = vmatprep.subr.mxu1 %v4326_v28  ;;  %v4395_v28 = vld [vmem:[#allocation72_spill] sm:$0xff] }
 0x310   :  { %1440 = vmatpush1.msra.mxu0 %v4327_v18  ;;  %1511 = vmatpush1.msra.mxu1 %v4328_v43  ;;  %v4396_v43 = vld [vmem:[#allocation70_spill] sm:$0xff] }
 0x311   :  { %1441 = vmatprep.subr.mxu0 %v4329_v29  ;;  %1512 = vmatprep.subr.mxu1 %v4330_v41 }
 0x312   :  { %1442 = vmatpush1.msra.mxu0 %v4331_v26  ;;  %1513 = vmatpush1.msra.mxu1 %v4332_v38 }
 0x313   :  { %1443 = vmatprep.subr.mxu0 %v4333_v27  ;;  %1514 = vmatprep.subr.mxu1 %v4334_v33 }
 0x314   :  { %1444 = vmatpush1.msra.mxu0 %v4335_v0  ;;  %1515 = vmatpush1.msra.mxu1 %v4336_v14 }
 0x315   :  { %1445 = vmatprep.subr.mxu0 %v4337_v23  ;;  %1516 = vmatprep.subr.mxu1 %v4338_v34 }
 0x316   :  { %1446 = vmatpush1.msra.mxu0 %v4339_v25  ;;  %1517 = vmatpush1.msra.mxu1 %v4340_v24 }
 0x317   :  { %1447 = vmatprep.subr.mxu0 %v4341_v30  ;;  %1518 = vmatprep.subr.mxu1 %v4342_v46  ;;  %v1421_v30 = vpop.permute.xlu0 %1420 }
 0x318   :  { %1448 = vmatpush1.msra.mxu0 %v4343_v36  ;;  %1519 = vmatpush1.msra.mxu1 %v4344_v40  ;;  %v4393_v40 = vld [vmem:[#allocation69_spill] sm:$0xff]  ;;  %vm1422_vm10 = vcmp.eq.s32.totalorder %v1421_v30, 1  ;;  %v3739_v30 = vld [vmem:[#allocation8 + $0xd0] sm:$0xff] }
 0x319   :  { %1449 = vmatprep.subr.mxu0 %v4345_v39  ;;  %1520 = vmatprep.subr.mxu1 %v4346_v44  ;;  %v3609_v44 = vld [vmem:[#allocation8 + $0x1e8] sm:$0xff]  ;;  %v3612_v39 = vld [vmem:[#allocation8 + $0x1f8] sm:$0xff]  ;;  %4397 = vst [vmem:[#allocation22_spill] sm:$0xff] %v3739_v30 }
 0x31a   :  { %1450 = vmatpush1.msra.mxu0 %v4347_v42  ;;  %1521 = vmatpush1.msra.mxu1 %v4348_v2  ;;  %v4389_v2 = vmov 0.0   ;;  %v4390_v42 = vld [vmem:[#allocation68_spill] sm:$0xff]  ;;  %4391 = vst [vmem:[#allocation21_spill] sm:$0xff] %v3609_v44  ;;  %4392 = vst [vmem:[#allocation23_spill] sm:$0xff] %v3612_v39 }
 0x31b   :  { %1451 = vmatprep.subr.mxu0 %v4349_v9  ;;  %1522 = vmatprep.subr.mxu1 %v4350_v4  ;;  %v4386_v9 = vld [vmem:[#allocation64_spill] sm:$0xff]  ;;  %v4388_v4 = vld [vmem:[#allocation66_spill] sm:$0xff] }
 0x31c   :  { %1452 = vmatpush1.msra.mxu0 %v4372_v45  ;;  %1523 = vmatpush1.msra.mxu1 %v4373_v47  ;;  %v3658_v45 = vld [vmem:[#allocation8 + $0x188] sm:$0xff] }
 0x31d   :  { %1453 = vmatprep.subr.mxu0 %v4374_v48  ;;  %1524 = vmatprep.subr.mxu1 %v4375_v49  ;;  %v3661_v48 = vld [vmem:[#allocation8 + $0x198] sm:$0xff] }
 0x31e   :  { %1454 = vmatpush1.msra.mxu0 %v4376_v50  ;;  %1525 = vmatpush1.msra.mxu1 %v4377_v52 }
 0x31f   :  { %1455 = vmatprep.subr.mxu0 %v4378_v53  ;;  %1526 = vmatprep.subr.mxu1 %v4379_v54 }
 0x320   :  { %1456 = vmatpush1.msra.mxu0 %v4380_v55  ;;  %1527 = vmatpush1.msra.mxu1 %v4381_v56 }
 0x321   :  { %1457 = vmatprep.subr.mxu0 %v4382_v57  ;;  %1528 = vmatprep.subr.mxu1 %v4383_v58 }
 0x322   :  { %1458 = vmatpush1.msra.mxu0 %v4384_v59  ;;  %1529 = vmatpush1.msra.mxu1 %v4385_v62 }
 0x323   :  { %1459 = vmatprep.subr.mxu0 %v4386_v9  ;;  %1530 = vmatprep.subr.mxu1 %v4387_v1 }
 0x324   :  { %1460 = vmatpush1.msra.mxu0 %v4388_v4  ;;  %1493 = vmatprep.mubr.f32.mxu0 %v4389_v2 }
 0x325   :  { %1531 = vmatpush1.msra.mxu1 %v4390_v42  ;;  %1564 = vmatprep.mubr.f32.mxu1 %v4389_v2 }
 0x326   :  { %1611 = vmatprep.subr.mxu0 %v3609_v44  ;;  %1682 = vmatprep.subr.mxu1 %v3612_v39 }
 0x3c5   :  { %v1313_v46 = vpop.f32.mrf.mxu0  ;;  %v1384_v19 = vpop.f32.mrf.mxu1 }
 0x3c6   :  { %v1389_v36 = vadd.f32 %v1313_v46, %v4393_v40  ;;  %v1391_v29 = vadd.f32 %v1384_v19, %v4396_v43  ;;  %v3664_v46 = vld [vmem:[#allocation8 + $0x180] sm:$0xff]  ;;  %v3667_v40 = vld [vmem:[#allocation8 + $0x190] sm:$0xff]  ;;  %v3685_v19 = vld [vmem:[#allocation8 + $0x158] sm:$0xff] }
 0x3c7   :  { %v1315_v17 = vpop.f32.mrf.mxu0  ;;  %v1386_v35 = vpop.f32.mrf.mxu1  ;;  %v3700_v43 = vld [vmem:[#allocation8 + $0x120] sm:$0xff] }
 0x3c8   :  { %v2540_v21 = vmul.f32 -1.442695, %v1389_v36  ;;  %v1390_v32 = vadd.f32 %v1315_v17, %v4394_v22  ;;  %v1392_v18 = vadd.f32 %v1386_v35, %v4395_v28  ;;  %v3670_v36 = vld [vmem:[#allocation8 + $0x168] sm:$0xff]  ;;  %v3673_v17 = vld [vmem:[#allocation8 + $0x178] sm:$0xff]  ;;  %v3679_v22 = vld [vmem:[#allocation8 + $0x170] sm:$0xff] }
 0x3c9   :  { %v3691_v35 = vld [vmem:[#allocation8 + $0x150] sm:$0xff]  ;;  %v3694_v28 = vld [vmem:[#allocation8 + $0x128] sm:$0xff] }
 0x3ca   :  { %2605 = vpow2.f32 %v2540_v21  ;;  %v2541_v20 = vmul.f32 -1.442695, %v1390_v32  ;;  %v2542_v41 = vmul.f32 -1.442695, %v1392_v18  ;;  %v3676_v21 = vld [vmem:[#allocation8 + $0x160] sm:$0xff]  ;;  %v3682_v32 = vld [vmem:[#allocation8 + $0x148] sm:$0xff] }
 0x3cb   :  { %v3697_v18 = vld [vmem:[#allocation8 + $0x138] sm:$0xff] }
 0x3cc   :  { %2607 = vpow2.f32 %v2541_v20  ;;  %v3688_v20 = vld [vmem:[#allocation8 + $0x140] sm:$0xff] }
 0x3cd   :  { %2609 = vtanh.f32 %v1391_v29  ;;  %v3703_v29 = vld [vmem:[#allocation8 + $0x130] sm:$0xff] }
 0x3ce   :  { %2611 = vpow2.f32 %v2542_v41  ;;  %v3706_v41 = vld [vmem:[#allocation8 + $0x108] sm:$0xff] }
 0x3d7   :  { %v2606_v26 = vpop.eup %2605 }
 0x3d8   :  { %v1402_v38 = vadd.f32 1.0, %v2606_v26  ;;  %v3709_v26 = vld [vmem:[#allocation8 + $0x118] sm:$0xff] }
 0x3d9   :  { %v2608_v27 = vpop.eup %2607 }
 0x3da   :  { %2613 = vrcp.f32 %v1402_v38  ;;  %v1403_v33 = vadd.f32 1.0, %v2608_v27  ;;  %v2610_v0 = vpop.eup %2609  ;;  %v3712_v38 = vld [vmem:[#allocation8 + $0x100] sm:$0xff]  ;;  %v3715_v27 = vld [vmem:[#allocation8 + $0x110] sm:$0xff] }
 0x3db   :  { %v2612_v14 = vpop.eup %2611 }
 0x3dc   :  { %2615 = vrcp.f32 %v1403_v33  ;;  %v1404_v24 = vadd.f32 1.0, %v2612_v14  ;;  %v3718_v33 = vld [vmem:[#allocation8 + $0xe8] sm:$0xff]  ;;  %v3724_v14 = vld [vmem:[#allocation8 + $0xe0] sm:$0xff] }
 0x3de   :  { %2617 = vrcp.f32 %v1404_v24  ;;  %v3736_v24 = vld [vmem:[#allocation8 + $0xc0] sm:$0xff] }
 0x3e7   :  { %v2614_v23 = vpop.eup %2613 }
 0x3e8   :  { %v1413_v34 = vmul.f32 %v2614_v23, %v2610_v0  ;;  %v3721_v0 = vld [vmem:[#allocation8 + $0xf8] sm:$0xff]  ;;  %v3727_v23 = vld [vmem:[#allocation8 + $0xf0] sm:$0xff] }
 0x3e9   :  { %v2616_v25 = vpop.eup %2615 }
 0x3ea   :  { %v1412_v51 = vmul.f32 %v2616_v25, %v3538_v10  ;;  %v3733_v25 = vld [vmem:[#allocation8 + $0xd8] sm:$0xff] }
 0x3eb   :  { %v2618_v61 = vpop.eup %2617 }
 0x3ec   :  { %v1414_v63 = vadd.f32 %v1413_v34, %v1412_v51  ;;  %v3730_v34 = vld [vmem:[#allocation8 + $0xc8] sm:$0xff] }
 0x3ed   :  { %v3742_v51 = vld [vmem:[#allocation8 + $0xa8] sm:$0xff] }
 0x3ee   :  { %2619 = vtanh.f32 %v1414_v63  ;;  %v3621_v12 = vsel %vm1422_vm10, %v1414_v63, %v3538_v10  ;;  %v3643_v10 = vld [vmem:[#allocation8 + $0x1d0] sm:$0xff]  ;;  %4398 = vst [vmem:[#allocation25_spill] sm:$0xff] %v3742_v51  ;;  %v3745_v63 = vld [vmem:[#allocation8 + $0xb8] sm:$0xff] }
 0x3ef   :  { %4399 = vst [vmem:[#allocation24_spill] sm:$0xff] %v3745_v63 }
 0x3fb   :  { %v2620_v3 = vpop.eup %2619 }
 0x3fc   :  { %v1416_v8 = vmul.f32 %v2620_v3, %v2618_v61  ;;  %v3748_v61 = vld [vmem:[#allocation8 + $0xa0] sm:$0xff]  ;;  %v3751_v3 = vld [vmem:[#allocation8 + $0xb0] sm:$0xff] }
 0x3fe   :  { %v3624_v31 = vsel %vm1422_vm10, %v1416_v8, %v3541_v11  ;;  %v3655_v11 = vld [vmem:[#allocation8 + $0x1b0] sm:$0xff]  ;;  %v3754_v8 = vld [vmem:[#allocation8 + $0x88] sm:$0xff] }
 0x3ff   :  { %1494 = vmatmul.mubr.f32.vlgmr.msra.gmra.mxu0 %v3624_v31  ;;  %1565 = vmatmul.mubr.f32.vlgmr.msra.gmra.mxu1 %v3624_v31 }
 0x400   :  { %1612 = vmatpush1.msra.mxu0 %v3628_v16  ;;  %1683 = vmatpush1.msra.mxu1 %v3631_v60 }
 0x401   :  { %1613 = vmatprep.subr.mxu0 %v3634_v13  ;;  %1684 = vmatprep.subr.mxu1 %v3637_v5 }
 0x402   :  { %1614 = vmatpush1.msra.mxu0 %v3640_v37  ;;  %1685 = vmatpush1.msra.mxu1 %v3643_v10 }
 0x403   :  { %1615 = vmatprep.subr.mxu0 %v3646_v7  ;;  %1686 = vmatprep.subr.mxu1 %v3649_v6 }
 0x404   :  { %1616 = vmatpush1.msra.mxu0 %v3652_v15  ;;  %1687 = vmatpush1.msra.mxu1 %v3655_v11 }
 0x405   :  { %1617 = vmatprep.subr.mxu0 %v3658_v45  ;;  %1688 = vmatprep.subr.mxu1 %v3661_v48 }
 0x406   :  { %1618 = vmatpush1.msra.mxu0 %v3664_v46  ;;  %1689 = vmatpush1.msra.mxu1 %v3667_v40 }
 0x407   :  { %1619 = vmatprep.subr.mxu0 %v3670_v36  ;;  %1690 = vmatprep.subr.mxu1 %v3673_v17 }
 0x408   :  { %1620 = vmatpush1.msra.mxu0 %v3676_v21  ;;  %1691 = vmatpush1.msra.mxu1 %v3679_v22 }
 0x409   :  { %1621 = vmatprep.subr.mxu0 %v3682_v32  ;;  %1692 = vmatprep.subr.mxu1 %v3685_v19 }
 0x40a   :  { %1622 = vmatpush1.msra.mxu0 %v3688_v20  ;;  %1693 = vmatpush1.msra.mxu1 %v3691_v35 }
 0x40b   :  { %1623 = vmatprep.subr.mxu0 %v3694_v28  ;;  %1694 = vmatprep.subr.mxu1 %v3697_v18 }
 0x40c   :  { %1624 = vmatpush1.msra.mxu0 %v3700_v43  ;;  %1695 = vmatpush1.msra.mxu1 %v3703_v29 }
 0x40d   :  { %1625 = vmatprep.subr.mxu0 %v3706_v41  ;;  %1696 = vmatprep.subr.mxu1 %v3709_v26 }
 0x40e   :  { %1626 = vmatpush1.msra.mxu0 %v3712_v38  ;;  %1697 = vmatpush1.msra.mxu1 %v3715_v27 }
 0x40f   :  { %1627 = vmatprep.subr.mxu0 %v3718_v33  ;;  %1698 = vmatprep.subr.mxu1 %v3721_v0 }
 0x410   :  { %1628 = vmatpush1.msra.mxu0 %v3724_v14  ;;  %1699 = vmatpush1.msra.mxu1 %v3727_v23 }
 0x411   :  { %1629 = vmatprep.subr.mxu0 %v3730_v34  ;;  %1700 = vmatprep.subr.mxu1 %v3733_v25 }
 0x412   :  { %1630 = vmatpush1.msra.mxu0 %v3736_v24  ;;  %1701 = vmatpush1.msra.mxu1 %v3739_v30  ;;  %v3757_v30 = vld [vmem:[#allocation8 + $0x98] sm:$0xff] }
 0x413   :  { %1631 = vmatprep.subr.mxu0 %v3742_v51  ;;  %1702 = vmatprep.subr.mxu1 %v3745_v63  ;;  %v3760_v51 = vld [vmem:[#allocation8 + $0x80] sm:$0xff]  ;;  %v3764_v63 = vld [vmem:[#allocation8 + $0x68] sm:$0xff] }
 0x414   :  { %1632 = vmatpush1.msra.mxu0 %v3748_v61  ;;  %1703 = vmatpush1.msra.mxu1 %v3751_v3  ;;  %4400 = vst [vmem:[#allocation27_spill] sm:$0xff] %v3760_v51  ;;  %4401 = vst [vmem:[#allocation26_spill] sm:$0xff] %v3764_v63 }
 0x415   :  { %1633 = vmatprep.subr.mxu0 %v3754_v8  ;;  %1704 = vmatprep.subr.mxu1 %v3757_v30 }
 0x416   :  { %1634 = vmatpush1.msra.mxu0 %v3760_v51  ;;  %1705 = vmatpush1.msra.mxu1 %v4373_v47 }
 0x417   :  { %1635 = vmatprep.subr.mxu0 %v3764_v63  ;;  %1706 = vmatprep.subr.mxu1 %v4375_v49  ;;  %v4402_v49 = vld [vmem:[#allocation73_spill] sm:$0xff] }
 0x418   :  { %1636 = vmatpush1.msra.mxu0 %v4376_v50  ;;  %1707 = vmatpush1.msra.mxu1 %v4377_v52 }
 0x419   :  { %1637 = vmatprep.subr.mxu0 %v4378_v53  ;;  %1708 = vmatprep.subr.mxu1 %v4379_v54  ;;  %v4403_v54 = vld [vmem:[#allocation75_spill] sm:$0xff] }
 0x41a   :  { %1638 = vmatpush1.msra.mxu0 %v4380_v55  ;;  %1709 = vmatpush1.msra.mxu1 %v4381_v56 }
 0x41b   :  { %1639 = vmatprep.subr.mxu0 %v4382_v57  ;;  %1710 = vmatprep.subr.mxu1 %v4383_v58 }
 0x41c   :  { %1640 = vmatpush1.msra.mxu0 %v4384_v59  ;;  %1711 = vmatpush1.msra.mxu1 %v4385_v62  ;;  %v4404_v59 = vld [vmem:[#allocation76_spill] sm:$0xff] }
 0x41d   :  { %1641 = vmatprep.subr.mxu0 %v4386_v9  ;;  %1712 = vmatprep.subr.mxu1 %v4387_v1  ;;  %v4405_v9 = vld [vmem:[#allocation74_spill] sm:$0xff] }
 0x41e   :  { %1642 = vmatpush1.msra.mxu0 %v4388_v4  ;;  %1675 = vmatprep.mubr.f32.mxu0 %v4389_v2 }
 0x41f   :  { %1713 = vmatpush1.msra.mxu1 %v4390_v42  ;;  %1746 = vmatprep.mubr.f32.mxu1 %v4389_v2 }
 0x420   :  { %1793 = vmatprep.subr.mxu0 %v3609_v44  ;;  %1864 = vmatprep.subr.mxu1 %v3612_v39 }
 0x4bf   :  { %v1495_v47 = vpop.f32.mrf.mxu0  ;;  %v1566_v56 = vpop.f32.mrf.mxu1 }
 0x4c0   :  { %v1571_v50 = vadd.f32 %v1495_v47, %v4402_v49  ;;  %v1573_v1 = vadd.f32 %v1566_v56, %v4405_v9 }
 0x4c1   :  { %v1497_v52 = vpop.f32.mrf.mxu0  ;;  %v1568_v58 = vpop.f32.mrf.mxu1 }
 0x4c2   :  { %v2543_v53 = vmul.f32 -1.442695, %v1571_v50  ;;  %v1572_v55 = vadd.f32 %v1497_v52, %v4403_v54  ;;  %v1574_v62 = vadd.f32 %v1568_v58, %v4404_v59 }
 0x4c4   :  { %2621 = vpow2.f32 %v2543_v53  ;;  %v2544_v57 = vmul.f32 -1.442695, %v1572_v55  ;;  %v2545_v4 = vmul.f32 -1.442695, %v1574_v62 }
 0x4c6   :  { %2623 = vpow2.f32 %v2544_v57  ;;  %v1603_v57 = vpop.permute.xlu1 %1602 }
 0x4c7   :  { %2625 = vtanh.f32 %v1573_v1  ;;  %vm1604_vm11 = vcmp.eq.s32.totalorder %v1603_v57, 1  ;;  %v4408_v1 = vld [vmem:[#allocation24_spill] sm:$0xff] }
 0x4c8   :  { %2627 = vpow2.f32 %v2545_v4  ;;  %v3844_v4 = vld [vmem:[#allocation8 + $0x90] sm:$0xff]  ;;  %v3872_v57 = vld [vmem:[#allocation8 + $0x38] sm:$0xff] }
 0x4c9   :  { %4409 = vst [vmem:[#allocation29_spill] sm:$0xff] %v3844_v4  ;;  %4418 = vst [vmem:[#allocation36_spill] sm:$0xff] %v3872_v57 }
 0x4d1   :  { %v2622_v42 = vpop.eup %2621 }
 0x4d2   :  { %v1584_v44 = vadd.f32 1.0, %v2622_v42  ;;  %v3848_v42 = vld [vmem:[#allocation8 + $0x78] sm:$0xff] }
 0x4d3   :  { %v2624_v39 = vpop.eup %2623  ;;  %4410 = vst [vmem:[#allocation28_spill] sm:$0xff] %v3848_v42 }
 0x4d4   :  { %2629 = vrcp.f32 %v1584_v44  ;;  %v1585_v47 = vadd.f32 1.0, %v2624_v39  ;;  %v2626_v49 = vpop.eup %2625 }
 0x4d5   :  { %v2628_v50 = vpop.eup %2627 }
 0x4d6   :  { %2631 = vrcp.f32 %v1585_v47  ;;  %v1586_v55 = vadd.f32 1.0, %v2628_v50  ;;  %v3851_v47 = vld [vmem:[#allocation8 + $0x60] sm:$0xff]  ;;  %v3857_v50 = vld [vmem:[#allocation8 + $0x48] sm:$0xff] }
 0x4d7   :  { %4411 = vst [vmem:[#allocation31_spill] sm:$0xff] %v3851_v47  ;;  %4413 = vst [vmem:[#allocation33_spill] sm:$0xff] %v3857_v50 }
 0x4d8   :  { %2633 = vrcp.f32 %v1586_v55  ;;  %v3869_v55 = vld [vmem:[#allocation8 + $0x28] sm:$0xff] }
 0x4d9   :  { %4417 = vst [vmem:[#allocation37_spill] sm:$0xff] %v3869_v55 }
 0x4e1   :  { %v2630_v52 = vpop.eup %2629 }
 0x4e2   :  { %v1595_v53 = vmul.f32 %v2630_v52, %v2626_v49  ;;  %v3854_v49 = vld [vmem:[#allocation8 + $0x70] sm:$0xff]  ;;  %v3860_v52 = vld [vmem:[#allocation8 + $0x58] sm:$0xff] }
 0x4e3   :  { %v2632_v54 = vpop.eup %2631  ;;  %4412 = vst [vmem:[#allocation30_spill] sm:$0xff] %v3854_v49  ;;  %4414 = vst [vmem:[#allocation32_spill] sm:$0xff] %v3860_v52 }
 0x4e4   :  { %v1594_v58 = vmul.f32 %v2632_v54, %v3621_v12  ;;  %v3866_v54 = vld [vmem:[#allocation8 + $0x50] sm:$0xff] }
 0x4e5   :  { %v2634_v62 = vpop.eup %2633  ;;  %4416 = vst [vmem:[#allocation34_spill] sm:$0xff] %v3866_v54 }
 0x4e6   :  { %v1596_v59 = vadd.f32 %v1595_v53, %v1594_v58  ;;  %v3863_v53 = vld [vmem:[#allocation8 + $0x40] sm:$0xff] }
 0x4e7   :  { %4415 = vst [vmem:[#allocation35_spill] sm:$0xff] %v3863_v53  ;;  %v3875_v58 = vld [vmem:[#allocation8 + $0x20] sm:$0xff] }
 0x4e8   :  { %2635 = vtanh.f32 %v1596_v59  ;;  %v3792_v56 = vsel %vm1604_vm11, %v1596_v59, %v3621_v12  ;;  %v4406_v12 = vld [vmem:[#allocation22_spill] sm:$0xff]  ;;  %4419 = vst [vmem:[#allocation39_spill] sm:$0xff] %v3875_v58  ;;  %v3878_v59 = vld [vmem:[#allocation8 + $0x30] sm:$0xff] }
 0x4e9   :  { %4420 = vst [vmem:[#allocation38_spill] sm:$0xff] %v3878_v59 }
 0x4f5   :  { %v2636_v44 = vpop.eup %2635 }
 0x4f6   :  { %v1598_v39 = vmul.f32 %v2636_v44, %v2634_v62  ;;  %v3881_v62 = vld [vmem:[#allocation8 + $0x8] sm:$0xff]  ;;  %v3884_v44 = vld [vmem:[#allocation8 + $0x18] sm:$0xff] }
 0x4f7   :  { %4421 = vst [vmem:[#allocation41_spill] sm:$0xff] %v3881_v62  ;;  %4422 = vst [vmem:[#allocation40_spill] sm:$0xff] %v3884_v44 }
 0x4f8   :  { %v3795_v9 = vsel %vm1604_vm11, %v1598_v39, %v3624_v31  ;;  %v4407_v31 = vld [vmem:[#allocation25_spill] sm:$0xff] }
 0x4f9   :  { %1676 = vmatmul.mubr.f32.vlgmr.msra.gmra.mxu0 %v3795_v9  ;;  %1747 = vmatmul.mubr.f32.vlgmr.msra.gmra.mxu1 %v3795_v9  ;;  %v3887_v39 = vld [vmem:[#allocation8] sm:$0xff] }
 0x4fa   :  { %1794 = vmatpush1.msra.mxu0 %v3628_v16  ;;  %1865 = vmatpush1.msra.mxu1 %v3631_v60  ;;  %4423 = vst [vmem:[#allocation43_spill] sm:$0xff] %v3887_v39 }
 0x4fb   :  { %1795 = vmatprep.subr.mxu0 %v3634_v13  ;;  %1866 = vmatprep.subr.mxu1 %v3637_v5 }
 0x4fc   :  { %1796 = vmatpush1.msra.mxu0 %v3640_v37  ;;  %1867 = vmatpush1.msra.mxu1 %v3643_v10 }
 0x4fd   :  { %1797 = vmatprep.subr.mxu0 %v3646_v7  ;;  %1868 = vmatprep.subr.mxu1 %v3649_v6 }
 0x4fe   :  { %1798 = vmatpush1.msra.mxu0 %v3652_v15  ;;  %1869 = vmatpush1.msra.mxu1 %v3655_v11 }
 0x4ff   :  { %1799 = vmatprep.subr.mxu0 %v3658_v45  ;;  %1870 = vmatprep.subr.mxu1 %v3661_v48 }
 0x500   :  { %1800 = vmatpush1.msra.mxu0 %v3664_v46  ;;  %1871 = vmatpush1.msra.mxu1 %v3667_v40 }
 0x501   :  { %1801 = vmatprep.subr.mxu0 %v3670_v36  ;;  %1872 = vmatprep.subr.mxu1 %v3673_v17 }
 0x502   :  { %1802 = vmatpush1.msra.mxu0 %v3676_v21  ;;  %1873 = vmatpush1.msra.mxu1 %v3679_v22 }
 0x503   :  { %1803 = vmatprep.subr.mxu0 %v3682_v32  ;;  %1874 = vmatprep.subr.mxu1 %v3685_v19 }
 0x504   :  { %1804 = vmatpush1.msra.mxu0 %v3688_v20  ;;  %1875 = vmatpush1.msra.mxu1 %v3691_v35 }
 0x505   :  { %1805 = vmatprep.subr.mxu0 %v3694_v28  ;;  %1876 = vmatprep.subr.mxu1 %v3697_v18 }
 0x506   :  { %1806 = vmatpush1.msra.mxu0 %v3700_v43  ;;  %1877 = vmatpush1.msra.mxu1 %v3703_v29 }
 0x507   :  { %1807 = vmatprep.subr.mxu0 %v3706_v41  ;;  %1878 = vmatprep.subr.mxu1 %v3709_v26 }
 0x508   :  { %1808 = vmatpush1.msra.mxu0 %v3712_v38  ;;  %1879 = vmatpush1.msra.mxu1 %v3715_v27 }
 0x509   :  { %1809 = vmatprep.subr.mxu0 %v3718_v33  ;;  %1880 = vmatprep.subr.mxu1 %v3721_v0 }
 0x50a   :  { %1810 = vmatpush1.msra.mxu0 %v3724_v14  ;;  %1881 = vmatpush1.msra.mxu1 %v3727_v23 }
 0x50b   :  { %1811 = vmatprep.subr.mxu0 %v3730_v34  ;;  %1882 = vmatprep.subr.mxu1 %v3733_v25 }
 0x50c   :  { %1812 = vmatpush1.msra.mxu0 %v3736_v24  ;;  %1883 = vmatpush1.msra.mxu1 %v4406_v12 }
 0x50d   :  { %1813 = vmatprep.subr.mxu0 %v4407_v31  ;;  %1884 = vmatprep.subr.mxu1 %v4408_v1 }
 0x50e   :  { %1814 = vmatpush1.msra.mxu0 %v3748_v61  ;;  %1885 = vmatpush1.msra.mxu1 %v3751_v3 }
 0x50f   :  { %1815 = vmatprep.subr.mxu0 %v3754_v8  ;;  %1886 = vmatprep.subr.mxu1 %v3757_v30 }
 0x510   :  { %1816 = vmatpush1.msra.mxu0 %v3760_v51  ;;  %1887 = vmatpush1.msra.mxu1 %v3844_v4 }
 0x511   :  { %1817 = vmatprep.subr.mxu0 %v3764_v63  ;;  %1888 = vmatprep.subr.mxu1 %v3848_v42  ;;  %v4429_v42 = vld [vmem:[#allocation80_spill] sm:$0xff]  ;;  %v4430_v63 = vld [vmem:[#allocation78_spill] sm:$0xff] }
 0x512   :  { %1818 = vmatpush1.msra.mxu0 %v3851_v47  ;;  %1889 = vmatpush1.msra.mxu1 %v3854_v49 }
 0x513   :  { %1819 = vmatprep.subr.mxu0 %v3857_v50  ;;  %1890 = vmatprep.subr.mxu1 %v3860_v52  ;;  %v4428_v52 = vld [vmem:[#allocation79_spill] sm:$0xff] }
 0x514   :  { %1820 = vmatpush1.msra.mxu0 %v3863_v53  ;;  %1891 = vmatpush1.msra.mxu1 %v3866_v54 }
 0x515   :  { %1821 = vmatprep.subr.mxu0 %v3869_v55  ;;  %1892 = vmatprep.subr.mxu1 %v3872_v57  ;;  %v3891_v57 = vld [vmem:[#allocation8 + $0x10] sm:$0xff]  ;;  %v4427_v55 = vld [vmem:[#allocation77_spill] sm:$0xff] }
 0x516   :  { %1822 = vmatpush1.msra.mxu0 %v3875_v58  ;;  %1893 = vmatpush1.msra.mxu1 %v3878_v59  ;;  %4424 = vst [vmem:[#allocation42_spill] sm:$0xff] %v3891_v57  ;;  %v4425_v59 = vld [vmem:[#allocation21_spill] sm:$0xff]  ;;  %v4426_v58 = vld [vmem:[#allocation23_spill] sm:$0xff] }
 0x517   :  { %1823 = vmatprep.subr.mxu0 %v3881_v62  ;;  %1894 = vmatprep.subr.mxu1 %v3884_v44 }
 0x518   :  { %1824 = vmatpush1.msra.mxu0 %v3887_v39  ;;  %1857 = vmatprep.mubr.f32.mxu0 %v4389_v2 }
 0x519   :  { %1895 = vmatpush1.msra.mxu1 %v3891_v57  ;;  %1928 = vmatprep.mubr.f32.mxu1 %v4389_v2 }
 0x51a   :  { %1975 = vmatprep.subr.mxu0 %v4425_v59  ;;  %2046 = vmatprep.subr.mxu1 %v4426_v58 }
 0x5b9   :  { %v1677_v62 = vpop.f32.mrf.mxu0  ;;  %v1748_v39 = vpop.f32.mrf.mxu1 }
 0x5ba   :  { %v1753_v54 = vadd.f32 %v1677_v62, %v4427_v55  ;;  %v1755_v2 = vadd.f32 %v1748_v39, %v4430_v63  ;;  %v4435_v39 = vld [vmem:[#allocation31_spill] sm:$0xff] }
 0x5bb   :  { %v1679_v44 = vpop.f32.mrf.mxu0  ;;  %v1750_v47 = vpop.f32.mrf.mxu1 }
 0x5bc   :  { %v2546_v53 = vmul.f32 -1.442695, %v1753_v54  ;;  %v1754_v50 = vadd.f32 %v1679_v44, %v4428_v52  ;;  %v1756_v57 = vadd.f32 %v1750_v47, %v4429_v42  ;;  %v1785_v44 = vpop.permute.xlu0 %1784 }
 0x5bd   :  { %vm1786_vm12 = vcmp.eq.s32.totalorder %v1785_v44, 1  ;;  %v4443_v44 = vld [vmem:[#allocation39_spill] sm:$0xff] }
 0x5be   :  { %2637 = vpow2.f32 %v2546_v53  ;;  %v2547_v49 = vmul.f32 -1.442695, %v1754_v50  ;;  %v2548_v4 = vmul.f32 -1.442695, %v1756_v57 }
 0x5c0   :  { %2639 = vpow2.f32 %v2547_v49 }
 0x5c1   :  { %2641 = vtanh.f32 %v1755_v2 }
 0x5c2   :  { %2643 = vpow2.f32 %v2548_v4 }
 0x5cb   :  { %v2638_v59 = vpop.eup %2637 }
 0x5cc   :  { %v1766_v51 = vadd.f32 1.0, %v2638_v59  ;;  %v4434_v59 = vld [vmem:[#allocation28_spill] sm:$0xff] }
 0x5cd   :  { %v2640_v58 = vpop.eup %2639 }
 0x5ce   :  { %2645 = vrcp.f32 %v1766_v51  ;;  %v1767_v55 = vadd.f32 1.0, %v2640_v58  ;;  %v2642_v54 = vpop.eup %2641  ;;  %v4433_v58 = vld [vmem:[#allocation26_spill] sm:$0xff] }
 0x5cf   :  { %v2644_v52 = vpop.eup %2643 }
 0x5d0   :  { %2647 = vrcp.f32 %v1767_v55  ;;  %v1768_v49 = vadd.f32 1.0, %v2644_v52  ;;  %v4436_v55 = vld [vmem:[#allocation30_spill] sm:$0xff]  ;;  %v4438_v52 = vld [vmem:[#allocation32_spill] sm:$0xff] }
 0x5d2   :  { %2649 = vrcp.f32 %v1768_v49  ;;  %v4442_v49 = vld [vmem:[#allocation36_spill] sm:$0xff] }
 0x5db   :  { %v2646_v53 = vpop.eup %2645 }
 0x5dc   :  { %v1777_v62 = vmul.f32 %v2646_v53, %v2642_v54  ;;  %v4437_v54 = vld [vmem:[#allocation33_spill] sm:$0xff]  ;;  %v4439_v53 = vld [vmem:[#allocation35_spill] sm:$0xff] }
 0x5dd   :  { %v2648_v50 = vpop.eup %2647 }
 0x5de   :  { %v1776_v42 = vmul.f32 %v2648_v50, %v3792_v56  ;;  %v4441_v50 = vld [vmem:[#allocation37_spill] sm:$0xff] }
 0x5df   :  { %v2650_v63 = vpop.eup %2649 }
 0x5e0   :  { %v1778_v47 = vadd.f32 %v1777_v62, %v1776_v42  ;;  %v4440_v62 = vld [vmem:[#allocation34_spill] sm:$0xff] }
 0x5e1   :  { %v4444_v42 = vld [vmem:[#allocation38_spill] sm:$0xff] }
 0x5e2   :  { %2651 = vtanh.f32 %v1778_v47  ;;  %v3903_v2 = vsel %vm1786_vm12, %v1778_v47, %v3792_v56  ;;  %v4431_v56 = vld [vmem:[#allocation27_spill] sm:$0xff]  ;;  %v4445_v47 = vld [vmem:[#allocation41_spill] sm:$0xff] }
 0x5ef   :  { %v2652_v51 = vpop.eup %2651 }
 0x5f0   :  { %v1780_v4 = vmul.f32 %v2652_v51, %v2650_v63  ;;  %v4446_v63 = vld [vmem:[#allocation40_spill] sm:$0xff]  ;;  %v4447_v51 = vld [vmem:[#allocation43_spill] sm:$0xff] }
 0x5f2   :  { %v3906_v57 = vsel %vm1786_vm12, %v1780_v4, %v3795_v9  ;;  %v4432_v9 = vld [vmem:[#allocation29_spill] sm:$0xff]  ;;  %v4448_v4 = vmov 0.0  }
 0x5f3   :  { %1858 = vmatmul.mubr.f32.vlgmr.msra.gmra.mxu0 %v3906_v57  ;;  %1929 = vmatmul.mubr.f32.vlgmr.msra.gmra.mxu1 %v3906_v57 }
 0x5f4   :  { %1976 = vmatpush1.msra.mxu0 %v3628_v16  ;;  %2047 = vmatpush1.msra.mxu1 %v3631_v60 }
 0x5f5   :  { %1977 = vmatprep.subr.mxu0 %v3634_v13  ;;  %2048 = vmatprep.subr.mxu1 %v3637_v5 }
 0x5f6   :  { %1978 = vmatpush1.msra.mxu0 %v3640_v37  ;;  %2049 = vmatpush1.msra.mxu1 %v3643_v10 }
 0x5f7   :  { %1979 = vmatprep.subr.mxu0 %v3646_v7  ;;  %2050 = vmatprep.subr.mxu1 %v3649_v6 }
 0x5f8   :  { %1980 = vmatpush1.msra.mxu0 %v3652_v15  ;;  %2051 = vmatpush1.msra.mxu1 %v3655_v11 }
 0x5f9   :  { %1981 = vmatprep.subr.mxu0 %v3658_v45  ;;  %2052 = vmatprep.subr.mxu1 %v3661_v48 }
 0x5fa   :  { %1982 = vmatpush1.msra.mxu0 %v3664_v46  ;;  %2053 = vmatpush1.msra.mxu1 %v3667_v40 }
 0x5fb   :  { %1983 = vmatprep.subr.mxu0 %v3670_v36  ;;  %2054 = vmatprep.subr.mxu1 %v3673_v17 }
 0x5fc   :  { %1984 = vmatpush1.msra.mxu0 %v3676_v21  ;;  %2055 = vmatpush1.msra.mxu1 %v3679_v22 }
 0x5fd   :  { %1985 = vmatprep.subr.mxu0 %v3682_v32  ;;  %2056 = vmatprep.subr.mxu1 %v3685_v19 }
 0x5fe   :  { %1986 = vmatpush1.msra.mxu0 %v3688_v20  ;;  %2057 = vmatpush1.msra.mxu1 %v3691_v35 }
 0x5ff   :  { %1987 = vmatprep.subr.mxu0 %v3694_v28  ;;  %2058 = vmatprep.subr.mxu1 %v3697_v18 }
 0x600   :  { %1988 = vmatpush1.msra.mxu0 %v3700_v43  ;;  %2059 = vmatpush1.msra.mxu1 %v3703_v29 }
 0x601   :  { %1989 = vmatprep.subr.mxu0 %v3706_v41  ;;  %2060 = vmatprep.subr.mxu1 %v3709_v26 }
 0x602   :  { %1990 = vmatpush1.msra.mxu0 %v3712_v38  ;;  %2061 = vmatpush1.msra.mxu1 %v3715_v27 }
 0x603   :  { %1991 = vmatprep.subr.mxu0 %v3718_v33  ;;  %2062 = vmatprep.subr.mxu1 %v3721_v0 }
 0x604   :  { %1992 = vmatpush1.msra.mxu0 %v3724_v14  ;;  %2063 = vmatpush1.msra.mxu1 %v3727_v23 }
 0x605   :  { %1993 = vmatprep.subr.mxu0 %v3730_v34  ;;  %2064 = vmatprep.subr.mxu1 %v3733_v25 }
 0x606   :  { %1994 = vmatpush1.msra.mxu0 %v3736_v24  ;;  %2065 = vmatpush1.msra.mxu1 %v4406_v12 }
 0x607   :  { %1995 = vmatprep.subr.mxu0 %v4407_v31  ;;  %2066 = vmatprep.subr.mxu1 %v4408_v1 }
 0x608   :  { %1996 = vmatpush1.msra.mxu0 %v3748_v61  ;;  %2067 = vmatpush1.msra.mxu1 %v3751_v3 }
 0x609   :  { %1997 = vmatprep.subr.mxu0 %v3754_v8  ;;  %2068 = vmatprep.subr.mxu1 %v3757_v30 }
 0x60a   :  { %1998 = vmatpush1.msra.mxu0 %v4431_v56  ;;  %2069 = vmatpush1.msra.mxu1 %v4432_v9 }
 0x60b   :  { %1999 = vmatprep.subr.mxu0 %v4433_v58  ;;  %2070 = vmatprep.subr.mxu1 %v4434_v59  ;;  %v4454_v59 = vld [vmem:[#allocation84_spill] sm:$0xff]  ;;  %v4455_v58 = vld [vmem:[#allocation82_spill] sm:$0xff] }
 0x60c   :  { %2000 = vmatpush1.msra.mxu0 %v4435_v39  ;;  %2071 = vmatpush1.msra.mxu1 %v4436_v55 }
 0x60d   :  { %2001 = vmatprep.subr.mxu0 %v4437_v54  ;;  %2072 = vmatprep.subr.mxu1 %v4438_v52  ;;  %v4449_v52 = vld [vmem:[#allocation42_spill] sm:$0xff] }
 0x60e   :  { %2002 = vmatpush1.msra.mxu0 %v4439_v53  ;;  %2073 = vmatpush1.msra.mxu1 %v4440_v62  ;;  %v4450_v62 = vld [vmem:[#allocation21_spill] sm:$0xff] }
 0x60f   :  { %2003 = vmatprep.subr.mxu0 %v4441_v50  ;;  %2074 = vmatprep.subr.mxu1 %v4442_v49  ;;  %v4451_v50 = vld [vmem:[#allocation23_spill] sm:$0xff] }
 0x610   :  { %2004 = vmatpush1.msra.mxu0 %v4443_v44  ;;  %2075 = vmatpush1.msra.mxu1 %v4444_v42  ;;  %v4452_v44 = vld [vmem:[#allocation81_spill] sm:$0xff] }
 0x611   :  { %2005 = vmatprep.subr.mxu0 %v4445_v47  ;;  %2076 = vmatprep.subr.mxu1 %v4446_v63  ;;  %v4453_v47 = vld [vmem:[#allocation83_spill] sm:$0xff] }
 0x612   :  { %2006 = vmatpush1.msra.mxu0 %v4447_v51  ;;  %2039 = vmatprep.mubr.f32.mxu0 %v4448_v4 }
 0x613   :  { %2077 = vmatpush1.msra.mxu1 %v4449_v52  ;;  %2110 = vmatprep.mubr.f32.mxu1 %v4448_v4 }
 0x614   :  { %2157 = vmatprep.subr.mxu0 %v4450_v62  ;;  %2228 = vmatprep.subr.mxu1 %v4451_v50 }
 0x6b3   :  { %v1859_v49 = vpop.f32.mrf.mxu0  ;;  %v1930_v63 = vpop.f32.mrf.mxu1 }
 0x6b4   :  { %v1935_v53 = vadd.f32 %v1859_v49, %v4452_v44  ;;  %v1937_v4 = vadd.f32 %v1930_v63, %v4455_v58 }
 0x6b5   :  { %v1861_v42 = vpop.f32.mrf.mxu0  ;;  %v1932_v39 = vpop.f32.mrf.mxu1 }
 0x6b6   :  { %v2549_v54 = vmul.f32 -1.442695, %v1935_v53  ;;  %v1936_v55 = vadd.f32 %v1861_v42, %v4453_v47  ;;  %v1938_v52 = vadd.f32 %v1932_v39, %v4454_v59 }
 0x6b8   :  { %2653 = vpow2.f32 %v2549_v54  ;;  %v2550_v51 = vmul.f32 -1.442695, %v1936_v55  ;;  %v2551_v9 = vmul.f32 -1.442695, %v1938_v52 }
 0x6ba   :  { %2655 = vpow2.f32 %v2550_v51  ;;  %v1967_v51 = vpop.permute.xlu1 %1966 }
 0x6bb   :  { %2657 = vtanh.f32 %v1937_v4  ;;  %vm1968_vm13 = vcmp.eq.s32.totalorder %v1967_v51, 1  ;;  %v2361_v51 = vld [vmem:[#allocation9 + $0xd8] sm:$0xff] }
 0x6bc   :  { %2659 = vpow2.f32 %v2551_v9 }
 0x6c5   :  { %v2654_v62 = vpop.eup %2653 }
 0x6c6   :  { %v1948_v56 = vadd.f32 1.0, %v2654_v62 }
 0x6c7   :  { %v2656_v50 = vpop.eup %2655 }
 0x6c8   :  { %2661 = vrcp.f32 %v1948_v56  ;;  %v1949_v49 = vadd.f32 1.0, %v2656_v50  ;;  %v2658_v53 = vpop.eup %2657 }
 0x6c9   :  { %v2660_v44 = vpop.eup %2659 }
 0x6ca   :  { %2663 = vrcp.f32 %v1949_v49  ;;  %v1950_v47 = vadd.f32 1.0, %v2660_v44 }
 0x6cc   :  { %2665 = vrcp.f32 %v1950_v47  ;;  %v2362_v47 = vld [vmem:[#allocation9 + $0xe0] sm:$0xff] }
 0x6d5   :  { %v2662_v54 = vpop.eup %2661 }
 0x6d6   :  { %v1959_v42 = vmul.f32 %v2662_v54, %v2658_v53  ;;  %v2365_v54 = vld [vmem:[#allocation9 + $0xf8] sm:$0xff] }
 0x6d7   :  { %v2664_v55 = vpop.eup %2663 }
 0x6d8   :  { %v1958_v59 = vmul.f32 %v2664_v55, %v3903_v2  ;;  %v2363_v55 = vld [vmem:[#allocation9 + $0xe8] sm:$0xff] }
 0x6d9   :  { %v2666_v9 = vpop.eup %2665 }
 0x6da   :  { %v1960_v39 = vadd.f32 %v1959_v42, %v1958_v59  ;;  %v2364_v42 = vld [vmem:[#allocation9 + $0xf0] sm:$0xff] }
 0x6db   :  { %v2360_v59 = vld [vmem:[#allocation9 + $0xd0] sm:$0xff] }
 0x6dc   :  { %2667 = vtanh.f32 %v1960_v39  ;;  %v3982_v58 = vsel %vm1968_vm13, %v1960_v39, %v3903_v2  ;;  %v2149_v2 = vpop.permute.xlu0 %2148  ;;  %v2359_v39 = vld [vmem:[#allocation9 + $0xc8] sm:$0xff] }
 0x6dd   :  { %vm2150_vm14 = vcmp.eq.s32.totalorder %v2149_v2, 1 }
 0x6e9   :  { %v2668_v56 = vpop.eup %2667 }
 0x6ea   :  { %v1962_v52 = vmul.f32 %v2668_v56, %v2666_v9  ;;  %v2357_v9 = vld [vmem:[#allocation9 + $0xb8] sm:$0xff]  ;;  %v2356_v56 = vld [vmem:[#allocation9 + $0xb0] sm:$0xff] }
 0x6ec   :  { %v3985_v63 = vsel %vm1968_vm13, %v1962_v52, %v3906_v57  ;;  %v2355_v52 = vld [vmem:[#allocation9 + $0xa8] sm:$0xff] }
 0x6ed   :  { %2040 = vmatmul.mubr.f32.vlgmr.msra.gmra.mxu0 %v3985_v63  ;;  %2111 = vmatmul.mubr.f32.vlgmr.msra.gmra.mxu1 %v3985_v63 }
 0x6ee   :  { %2158 = vmatpush1.msra.mxu0 %v3628_v16  ;;  %2229 = vmatpush1.msra.mxu1 %v3631_v60  ;;  %v4456_v16 = vld [vmem:[#allocation27_spill] sm:$0xff]  ;;  %v4457_v60 = vld [vmem:[#allocation29_spill] sm:$0xff] }
 0x6ef   :  { %2159 = vmatprep.subr.mxu0 %v3634_v13  ;;  %2230 = vmatprep.subr.mxu1 %v3637_v5  ;;  %v4458_v13 = vld [vmem:[#allocation26_spill] sm:$0xff]  ;;  %v4459_v5 = vld [vmem:[#allocation28_spill] sm:$0xff] }
 0x6f0   :  { %2160 = vmatpush1.msra.mxu0 %v3640_v37  ;;  %2231 = vmatpush1.msra.mxu1 %v3643_v10  ;;  %v4460_v37 = vld [vmem:[#allocation31_spill] sm:$0xff]  ;;  %v4461_v10 = vld [vmem:[#allocation30_spill] sm:$0xff] }
 0x6f1   :  { %2161 = vmatprep.subr.mxu0 %v3646_v7  ;;  %2232 = vmatprep.subr.mxu1 %v3649_v6  ;;  %v4462_v7 = vld [vmem:[#allocation33_spill] sm:$0xff]  ;;  %v4463_v6 = vld [vmem:[#allocation32_spill] sm:$0xff] }
 0x6f2   :  { %2162 = vmatpush1.msra.mxu0 %v3652_v15  ;;  %2233 = vmatpush1.msra.mxu1 %v3655_v11  ;;  %v4464_v15 = vld [vmem:[#allocation35_spill] sm:$0xff]  ;;  %v4465_v11 = vld [vmem:[#allocation34_spill] sm:$0xff] }
 0x6f3   :  { %2163 = vmatprep.subr.mxu0 %v3658_v45  ;;  %2234 = vmatprep.subr.mxu1 %v3661_v48  ;;  %v4466_v45 = vld [vmem:[#allocation37_spill] sm:$0xff]  ;;  %v4467_v48 = vld [vmem:[#allocation36_spill] sm:$0xff] }
 0x6f4   :  { %2164 = vmatpush1.msra.mxu0 %v3664_v46  ;;  %2235 = vmatpush1.msra.mxu1 %v3667_v40  ;;  %v4468_v46 = vld [vmem:[#allocation39_spill] sm:$0xff]  ;;  %v4469_v40 = vld [vmem:[#allocation38_spill] sm:$0xff] }
 0x6f5   :  { %2165 = vmatprep.subr.mxu0 %v3670_v36  ;;  %2236 = vmatprep.subr.mxu1 %v3673_v17  ;;  %v4470_v36 = vld [vmem:[#allocation41_spill] sm:$0xff]  ;;  %v4471_v17 = vld [vmem:[#allocation40_spill] sm:$0xff] }
 0x6f6   :  { %2166 = vmatpush1.msra.mxu0 %v3676_v21  ;;  %2237 = vmatpush1.msra.mxu1 %v3679_v22  ;;  %v4472_v21 = vld [vmem:[#allocation43_spill] sm:$0xff]  ;;  %v4473_v22 = vmov 0.0  }
 0x6f7   :  { %2167 = vmatprep.subr.mxu0 %v3682_v32  ;;  %2238 = vmatprep.subr.mxu1 %v3685_v19  ;;  %v4474_v32 = vld [vmem:[#allocation42_spill] sm:$0xff] }
 0x6f8   :  { %2168 = vmatpush1.msra.mxu0 %v3688_v20  ;;  %2239 = vmatpush1.msra.mxu1 %v3691_v35  ;;  %v4475_v20 = vld [vmem:[#allocation85_spill] sm:$0xff] }
 0x6f9   :  { %2169 = vmatprep.subr.mxu0 %v3694_v28  ;;  %2240 = vmatprep.subr.mxu1 %v3697_v18 }
 0x6fa   :  { %2170 = vmatpush1.msra.mxu0 %v3700_v43  ;;  %2241 = vmatpush1.msra.mxu1 %v3703_v29  ;;  %v4476_v43 = vld [vmem:[#allocation87_spill] sm:$0xff] }
 0x6fb   :  { %2171 = vmatprep.subr.mxu0 %v3706_v41  ;;  %2242 = vmatprep.subr.mxu1 %v3709_v26 }
 0x6fc   :  { %2172 = vmatpush1.msra.mxu0 %v3712_v38  ;;  %2243 = vmatpush1.msra.mxu1 %v3715_v27  ;;  %v4477_v27 = vld [vmem:[#allocation88_spill] sm:$0xff] }
 0x6fd   :  { %2173 = vmatprep.subr.mxu0 %v3718_v33  ;;  %2244 = vmatprep.subr.mxu1 %v3721_v0  ;;  %v4478_v0 = vld [vmem:[#allocation86_spill] sm:$0xff] }
 0x6fe   :  { %2174 = vmatpush1.msra.mxu0 %v3724_v14  ;;  %2245 = vmatpush1.msra.mxu1 %v3727_v23 }
 0x6ff   :  { %2175 = vmatprep.subr.mxu0 %v3730_v34  ;;  %2246 = vmatprep.subr.mxu1 %v3733_v25 }
 0x700   :  { %2176 = vmatpush1.msra.mxu0 %v3736_v24  ;;  %2247 = vmatpush1.msra.mxu1 %v4406_v12 }
 0x701   :  { %2177 = vmatprep.subr.mxu0 %v4407_v31  ;;  %2248 = vmatprep.subr.mxu1 %v4408_v1 }
 0x702   :  { %2178 = vmatpush1.msra.mxu0 %v3748_v61  ;;  %2249 = vmatpush1.msra.mxu1 %v3751_v3 }
 0x703   :  { %2179 = vmatprep.subr.mxu0 %v3754_v8  ;;  %2250 = vmatprep.subr.mxu1 %v3757_v30 }
 0x704   :  { %2180 = vmatpush1.msra.mxu0 %v4456_v16  ;;  %2251 = vmatpush1.msra.mxu1 %v4457_v60  ;;  %v2353_v16 = vld [vmem:[#allocation9 + $0x98] sm:$0xff]  ;;  %v2352_v60 = vld [vmem:[#allocation9 + $0x90] sm:$0xff] }
 0x705   :  { %2181 = vmatprep.subr.mxu0 %v4458_v13  ;;  %2252 = vmatprep.subr.mxu1 %v4459_v5  ;;  %v2351_v13 = vld [vmem:[#allocation9 + $0x88] sm:$0xff]  ;;  %v2350_v5 = vld [vmem:[#allocation9 + $0x80] sm:$0xff] }
 0x706   :  { %2182 = vmatpush1.msra.mxu0 %v4460_v37  ;;  %2253 = vmatpush1.msra.mxu1 %v4461_v10  ;;  %v2349_v37 = vld [vmem:[#allocation9 + $0x78] sm:$0xff]  ;;  %v2348_v10 = vld [vmem:[#allocation9 + $0x70] sm:$0xff] }
 0x707   :  { %2183 = vmatprep.subr.mxu0 %v4462_v7  ;;  %2254 = vmatprep.subr.mxu1 %v4463_v6  ;;  %v2347_v7 = vld [vmem:[#allocation9 + $0x68] sm:$0xff]  ;;  %v2346_v6 = vld [vmem:[#allocation9 + $0x60] sm:$0xff] }
 0x708   :  { %2184 = vmatpush1.msra.mxu0 %v4464_v15  ;;  %2255 = vmatpush1.msra.mxu1 %v4465_v11  ;;  %v2345_v15 = vld [vmem:[#allocation9 + $0x58] sm:$0xff]  ;;  %v2344_v11 = vld [vmem:[#allocation9 + $0x50] sm:$0xff] }
 0x709   :  { %2185 = vmatprep.subr.mxu0 %v4466_v45  ;;  %2256 = vmatprep.subr.mxu1 %v4467_v48  ;;  %v2343_v45 = vld [vmem:[#allocation9 + $0x48] sm:$0xff]  ;;  %v2342_v48 = vld [vmem:[#allocation9 + $0x40] sm:$0xff] }
 0x70a   :  { %2186 = vmatpush1.msra.mxu0 %v4468_v46  ;;  %2257 = vmatpush1.msra.mxu1 %v4469_v40  ;;  %v2341_v46 = vld [vmem:[#allocation9 + $0x38] sm:$0xff]  ;;  %v2340_v40 = vld [vmem:[#allocation9 + $0x30] sm:$0xff] }
 0x70b   :  { %2187 = vmatprep.subr.mxu0 %v4470_v36  ;;  %2258 = vmatprep.subr.mxu1 %v4471_v17  ;;  %v2339_v36 = vld [vmem:[#allocation9 + $0x28] sm:$0xff]  ;;  %v2338_v17 = vld [vmem:[#allocation9 + $0x20] sm:$0xff] }
 0x70c   :  { %2188 = vmatpush1.msra.mxu0 %v4472_v21  ;;  %2221 = vmatprep.mubr.f32.mxu0 %v4473_v22  ;;  %v2337_v21 = vld [vmem:[#allocation9 + $0x18] sm:$0xff] }
 0x70d   :  { %2259 = vmatpush1.msra.mxu1 %v4474_v32  ;;  %2292 = vmatprep.mubr.f32.mxu1 %v4473_v22  ;;  %v2335_v32 = vld [vmem:[#allocation9 + $0x8] sm:$0xff] }
 0x70e   :  { %2378 = vmatprep.subr.mxu0 %v2365_v54 }
 0x7ad   :  { %v2041_v19 = vpop.f32.mrf.mxu0  ;;  %v2112_v41 = vpop.f32.mrf.mxu1 }
 0x7ae   :  { %v2117_v35 = vadd.f32 %v2041_v19, %v4475_v20  ;;  %v2119_v14 = vadd.f32 %v2112_v41, %v4478_v0  ;;  %v2334_v19 = vld [vmem:[#allocation9] sm:$0xff] }
 0x7af   :  { %v2043_v28 = vpop.f32.mrf.mxu0  ;;  %v2114_v38 = vpop.f32.mrf.mxu1 }
 0x7b0   :  { %v2552_v18 = vmul.f32 -1.442695, %v2117_v35  ;;  %v2118_v29 = vadd.f32 %v2043_v28, %v4476_v43  ;;  %v2120_v33 = vadd.f32 %v2114_v38, %v4477_v27  ;;  %v4479_v35 = vld [vmem:[#allocation89_spill] sm:$0xff] }
 0x7b2   :  { %2669 = vpow2.f32 %v2552_v18  ;;  %v2553_v26 = vmul.f32 -1.442695, %v2118_v29  ;;  %v2554_v23 = vmul.f32 -1.442695, %v2120_v33  ;;  %v4480_v29 = vld [vmem:[#allocation91_spill] sm:$0xff]  ;;  %v4481_v33 = vld [vmem:[#allocation92_spill] sm:$0xff] }
 0x7b4   :  { %2671 = vpow2.f32 %v2553_v26 }
 0x7b5   :  { %2673 = vtanh.f32 %v2119_v14  ;;  %v4482_v14 = vld [vmem:[#allocation90_spill] sm:$0xff] }
 0x7b6   :  { %2675 = vpow2.f32 %v2554_v23 }
 0x7bf   :  { %v2670_v34 = vpop.eup %2669 }
 0x7c0   :  { %v2130_v25 = vadd.f32 1.0, %v2670_v34 }
 0x7c1   :  { %v2672_v24 = vpop.eup %2671 }
 0x7c2   :  { %2677 = vrcp.f32 %v2130_v25  ;;  %v2131_v30 = vadd.f32 1.0, %v2672_v24  ;;  %v2674_v61 = vpop.eup %2673 }
 0x7c3   :  { %v2676_v3 = vpop.eup %2675 }
 0x7c4   :  { %2679 = vrcp.f32 %v2131_v30  ;;  %v2132_v1 = vadd.f32 1.0, %v2676_v3 }
 0x7c6   :  { %2681 = vrcp.f32 %v2132_v1 }
 0x7cf   :  { %v2678_v8 = vpop.eup %2677 }
 0x7d0   :  { %v2141_v12 = vmul.f32 %v2678_v8, %v2674_v61 }
 0x7d1   :  { %v2680_v31 = vpop.eup %2679 }
 0x7d2   :  { %v2140_v57 = vmul.f32 %v2680_v31, %v3982_v58 }
 0x7d3   :  { %v2682_v50 = vpop.eup %2681 }
 0x7d4   :  { %v2142_v4 = vadd.f32 %v2141_v12, %v2140_v57 }
 0x7d6   :  { %2683 = vtanh.f32 %v2142_v4  ;;  %v4059_v62 = vsel %vm2150_vm14, %v2142_v4, %v3982_v58  ;;  %v2358_v58 = vld [vmem:[#allocation9 + $0xc0] sm:$0xff] }
 0x7e3   :  { %v2684_v49 = vpop.eup %2683 }
 0x7e4   :  { %v2144_v53 = vmul.f32 %v2684_v49, %v2682_v50  ;;  %v2331_v49 = vpop.permute.xlu1 %2330 }
 0x7e5   :  { %vm2332_vm15 = vcmp.eq.s32.totalorder %v2331_v49, 1 }
 0x7e6   :  { %v4062_v44 = vsel %vm2150_vm14, %v2144_v53, %v3985_v63  ;;  %v2354_v63 = vld [vmem:[#allocation9 + $0xa0] sm:$0xff] }
 0x7e7   :  { %2222 = vmatmul.mubr.f32.vlgmr.msra.gmra.mxu0 %v4062_v44  ;;  %2293 = vmatmul.mubr.f32.vlgmr.msra.gmra.mxu1 %v4062_v44 }
 0x7e8   :  { %2442 = vmatprep.mubr.f32.mxu0 %v4473_v22  ;;  %2379 = vmatpush1.msra.mxu0 %v2364_v42  ;;  %v2336_v22 = vld [vmem:[#allocation9 + $0x10] sm:$0xff] }
 0x7e9   :  { %2380 = vmatprep.subr.mxu0 %v2363_v55  ;;  %v4483_v55 = vlaneseq }
 0x7ea   :  { %2381 = vmatpush1.msra.mxu0 %v2362_v47 }
 0x7eb   :  { %2382 = vmatprep.subr.mxu0 %v2361_v51  ;;  %v2369_v47 = vshrl.u32 %v4483_v55, 7 }
 0x7ec   :  { %2383 = vmatpush1.msra.mxu0 %v2360_v59  ;;  %v2366_v59 = vld [vmem:[%s4090_s7] sm:$0x3] }
 0x7ed   :  { %2384 = vmatprep.subr.mxu0 %v2359_v39  ;;  %v2370_v51 = vsub.s32 0, %v2369_v47  ;;  %v2374_v39 = vsub.s32 1, %v2369_v47 }
 0x7ee   :  { %2385 = vmatpush1.msra.mxu0 %v2358_v58 }
 0x7ef   :  { %2386 = vmatprep.subr.mxu0 %v2357_v9  ;;  %v2375_v58 = vrot.slane %v2366_v59, %v2374_v39 }
 0x7f0   :  { %2387 = vmatpush1.msra.mxu0 %v2356_v56 }
 0x7f1   :  { %2388 = vmatprep.subr.mxu0 %v2355_v52 }
 0x7f2   :  { %2389 = vmatpush1.msra.mxu0 %v2354_v63 }
 0x7f3   :  { %2390 = vmatprep.subr.mxu0 %v2353_v16 }
 0x7f4   :  { %2391 = vmatpush1.msra.mxu0 %v2352_v60 }
 0x7f5   :  { %2392 = vmatprep.subr.mxu0 %v2351_v13 }
 0x7f6   :  { %2393 = vmatpush1.msra.mxu0 %v2350_v5 }
 0x7f7   :  { %2394 = vmatprep.subr.mxu0 %v2349_v37 }
 0x7f8   :  { %2395 = vmatpush1.msra.mxu0 %v2348_v10 }
 0x7f9   :  { %2396 = vmatprep.subr.mxu0 %v2347_v7 }
 0x7fa   :  { %2397 = vmatpush1.msra.mxu0 %v2346_v6 }
 0x7fb   :  { %2398 = vmatprep.subr.mxu0 %v2345_v15 }
 0x7fc   :  { %2399 = vmatpush1.msra.mxu0 %v2344_v11 }
 0x7fd   :  { %2400 = vmatprep.subr.mxu0 %v2343_v45 }
 0x7fe   :  { %2401 = vmatpush1.msra.mxu0 %v2342_v48 }
 0x7ff   :  { %2402 = vmatprep.subr.mxu0 %v2341_v46 }
 0x800   :  { %2403 = vmatpush1.msra.mxu0 %v2340_v40 }
 0x801   :  { %2404 = vmatprep.subr.mxu0 %v2339_v36 }
 0x802   :  { %2405 = vmatpush1.msra.mxu0 %v2338_v17 }
 0x803   :  { %2406 = vmatprep.subr.mxu0 %v2337_v21 }
 0x804   :  { %2407 = vmatpush1.msra.mxu0 %v2336_v22 }
 0x805   :  { %2408 = vmatprep.subr.mxu0 %v2335_v32 }
 0x806   :  { %2409 = vmatpush1.msra.mxu0 %v2334_v19 }
 0x8a7   :  { %v2223_v20 = vpop.f32.mrf.mxu0  ;;  %v2294_v26 = vpop.f32.mrf.mxu1 }
 0x8a8   :  { %v2299_v28 = vadd.f32 %v2223_v20, %v4479_v35  ;;  %v2301_v23 = vadd.f32 %v2294_v26, %v4482_v14 }
 0x8a9   :  { %v2225_v18 = vpop.f32.mrf.mxu0  ;;  %v2296_v27 = vpop.f32.mrf.mxu1 }
 0x8aa   :  { %v2555_v43 = vmul.f32 -1.442695, %v2299_v28  ;;  %v2300_v41 = vadd.f32 %v2225_v18, %v4480_v29  ;;  %v2302_v0 = vadd.f32 %v2296_v27, %v4481_v33 }
 0x8ac   :  { %2685 = vpow2.f32 %v2555_v43  ;;  %v2556_v38 = vmul.f32 -1.442695, %v2300_v41  ;;  %v2557_v34 = vmul.f32 -1.442695, %v2302_v0 }
 0x8ae   :  { %2687 = vpow2.f32 %v2556_v38 }
 0x8af   :  { %2689 = vtanh.f32 %v2301_v23 }
 0x8b0   :  { %2691 = vpow2.f32 %v2557_v34 }
 0x8b9   :  { %v2686_v25 = vpop.eup %2685 }
 0x8ba   :  { %v2312_v24 = vadd.f32 1.0, %v2686_v25 }
 0x8bb   :  { %v2688_v30 = vpop.eup %2687 }
 0x8bc   :  { %2693 = vrcp.f32 %v2312_v24  ;;  %v2313_v61 = vadd.f32 1.0, %v2688_v30  ;;  %v2690_v3 = vpop.eup %2689 }
 0x8bd   :  { %v2692_v8 = vpop.eup %2691 }
 0x8be   :  { %2695 = vrcp.f32 %v2313_v61  ;;  %v2314_v2 = vadd.f32 1.0, %v2692_v8 }
 0x8c0   :  { %2697 = vrcp.f32 %v2314_v2 }
 0x8c9   :  { %v2694_v12 = vpop.eup %2693 }
 0x8ca   :  { %v2323_v31 = vmul.f32 %v2694_v12, %v2690_v3 }
 0x8cb   :  { %v2696_v1 = vpop.eup %2695 }
 0x8cc   :  { %v2322_v57 = vmul.f32 %v2696_v1, %v4059_v62  ;;  %v2371_v62 = vrot.slane %v2366_v59, %v2370_v51 }
 0x8cd   :  { %v2698_v50 = vpop.eup %2697 }
 0x8ce   :  { %v2324_v4 = vadd.f32 %v2323_v31, %v2322_v57 }
 0x8d0   :  { %2699 = vtanh.f32 %v2324_v4 }
 0x8dd   :  { %v2700_v53 = vpop.eup %2699 }
 0x8de   :  { %v2326_v54 = vmul.f32 %v2700_v53, %v2698_v50 }
 0x8e0   :  { %v2333_v42 = vsel %vm2332_vm15, %v2326_v54, %v4062_v44 }
 0x8e1   :  { %2443 = vmatmul.mubr.f32.vlgmr.msra.gmra.mxu0 %v2333_v42 }
 0x9a1   :  { %v2444_v9 = vpop.f32.mrf.mxu0 }
 0x9a2   :  { %v2445_v56 = vadd.f32 %v2444_v9, %v2371_v62 }
 0x9a3   :  { %v2446_v44 = vpop.f32.mrf.mxu0 }
 0x9a4   :  { %v2447_v52 = vadd.f32 %v2446_v44, %v2375_v58  ;;  %2450 = vst.msk [vmem:[#allocation11] sm:$0xff] %vm2449_vm0, %v2445_v56 }
 0x9a5   :  { %2856 = shalt.err (!%p2853_p10)
}
 0x9a6   :  { %2462 = dma.vmem_to_hbm [thread:$0]  %s2460_s17, 128, %s4091_s8, [#allocation5]   ;;  %2452 = vst.msk [vmem:[#allocation12] sm:$0xff] %vm2451_vm1, %v2447_v52 }
 0x9a7   :  { %s2865_s22 = scalar_lea.vmem %s2470_s19, 128  ;;  %p2870_p12 = scmp.lt.s32.totalorder %s2470_s19, %s2470_s19 }
 0x9a8   :  { %p2866_p11 = scmp.ne.s32.totalorder %s2470_s19, %s2865_s22  ;;  %p2871_p13 = scmp.lt.s32.totalorder %s2865_s22, %s2865_s22 }
 0x9aa   :  { %p2872_p0 = por %p2871_p13, %p2870_p12 }
 0x9ac   :  { %p2873_p1 = pnand %p2872_p0, %p2866_p11 }
 0x9ae   :  { %2876 = shalt.err (!%p2873_p1)
}
 0x9af   :  { %2472 = dma.vmem_to_hbm [thread:$0]  %s2470_s19, 128, %s4092_s9, [#allocation13]  }
 0x9b0   :  { %2891 = dma.done.wait [#allocation5], 128  }
 0x9b1   :  { %2892 = vsyncadd [#allocation5], 4294967168 }
 0x9b2   :  { %2893 = dma.done.wait [#allocation13], 128  }
 0x9b3   :  { %2894 = vsyncadd [#allocation13], 4294967168 }
 0x9b4   :  { %2479 = vsyncpa [#allocation4], 1 }
 0x9b5   :  { %2480 = vsyncpa [#allocation7], 1 }
 0x9b6   :  { %2481 = vsyncpa [#allocation10], 1 }
 0x9b7   :  { %2482 = vsyncpa [#allocation5], 1 }
 0x9b8   :  { %2483 = vsyncpa [#allocation13], 1 }

</bundles_post_ra>
